<compile_context>
chip_gen: v5e
topology: v5e:2x2
jax: 0.10.0
libtpu: 0.0.40
codegen_flags: <defaults>
</compile_context>

<pallas_src>
import jax
import jax.numpy as jnp
from jax.experimental import pallas as pl
from jax.experimental.pallas import tpu as pltpu

EPS = 1e-5   # torch.nn.BatchNorm2d default
LANE = 128   # TPU lane width


def _round_up(x, m):
    return ((x + m - 1) // m) * m


def _make_fused_block_kernel(H, W, Cp):
    """Fused conv1+BN1+ReLU -> conv2+BN2 (+identity) -> ReLU for one image."""
    def kernel(xp_ref, w1_ref, b1_ref, w2_ref, b2_ref, o_ref, mid_ref):
        # ---- stage 1: conv1 (BN folded) + ReLU -> VMEM scratch (zero halo) ----
        acc = jnp.zeros((H * W, Cp), jnp.float32)
        for kh in range(3):
            for kw in range(3):
                patch = xp_ref[:, kh:kh + H, kw:kw + W, :].reshape(H * W, Cp)
                acc = acc + jnp.dot(patch, w1_ref[kh, kw],
                                    preferred_element_type=jnp.float32)
        y1 = jnp.maximum(acc + b1_ref[...], 0.0)

        mid_ref[...] = jnp.zeros_like(mid_ref)          # zero the halo border
        mid_ref[1:H + 1, 1:W + 1, :] = y1.reshape(H, W, Cp)

        # ---- stage 2: conv2 (BN folded) + identity + ReLU -> output ----
        acc = jnp.zeros((H * W, Cp), jnp.float32)
        for kh in range(3):
            for kw in range(3):
                patch = mid_ref[kh:kh + H, kw:kw + W, :].reshape(H * W, Cp)
                acc = acc + jnp.dot(patch, w2_ref[kh, kw],
                                    preferred_element_type=jnp.float32)
        identity = xp_ref[:, 1:H + 1, 1:W + 1, :].reshape(H * W, Cp)
        y2 = jnp.maximum(acc + b2_ref[...] + identity, 0.0)
        o_ref[...] = y2.reshape(1, H, W, Cp).astype(o_ref.dtype)

    return kernel


def _fold_bn_into_conv(w_oihw, gamma, beta, mean, var):
    """Return HWIO weights and bias with BatchNorm (inference) folded in."""
    scale = gamma * jax.lax.rsqrt(var + EPS)              # (Cout,)
    w_hwio = jnp.transpose(w_oihw, (2, 3, 1, 0)) * scale  # (3,3,Cin,Cout) * per-Cout
    bias = beta - mean * scale                            # (Cout,)
    return w_hwio, bias


def _pad_weights(w_hwio, bias, cin_p, cout_p):
    kh, kw, cin, cout = w_hwio.shape
    w = jnp.zeros((kh, kw, cin_p, cout_p), jnp.float32).at[:, :, :cin, :cout].set(w_hwio)
    b = jnp.zeros((1, cout_p), jnp.float32).at[0, :cout].set(bias)
    return w, b


def basic_block_forward(x_nchw, params):
    """Pallas implementation of BasicBlock.forward (stride=1, downsample=None)."""
    N, C, H, W = x_nchw.shape
    Cp = max(LANE, _round_up(C, LANE))     # lane-dense channel axis
    Hp, Wp = H + 2, W + 2

    # Fold BN into conv weights/bias once, outside the kernel; pad channels.
    w1, b1 = _fold_bn_into_conv(params["w1"], params["g1"], params["b1"],
                                params["m1"], params["v1"])
    w2, b2 = _fold_bn_into_conv(params["w2"], params["g2"], params["b2"],
                                params["m2"], params["v2"])
    w1, b1 = _pad_weights(w1, b1, Cp, Cp)
    w2, b2 = _pad_weights(w2, b2, Cp, Cp)

    # NCHW -> NHWC, add 1-pixel spatial halo and lane-pad channels (zeros).
    x = jnp.transpose(x_nchw, (0, 2, 3, 1))
    xp = jnp.pad(x, ((0, 0), (1, 1), (1, 1), (0, Cp - C)))

    kernel = _make_fused_block_kernel(H, W, Cp)

    # NOTE: for v6e/v7x one could additionally cast matmul operands to bf16
    # (f32 accumulate); kept f32 here so the result matches the f32 reference
    # on all chip generations (v5e VPU has no native bf16).
    out = pl.pallas_call(
        kernel,
        out_shape=jax.ShapeDtypeStruct((N, H, W, Cp), jnp.float32),
        grid=(N,),
        in_specs=[
            pl.BlockSpec((1, Hp, Wp, Cp), lambda n: (n, 0, 0, 0)),  # padded input
            pl.BlockSpec((3, 3, Cp, Cp), lambda n: (0, 0, 0, 0)),   # folded w1
            pl.BlockSpec((1, Cp), lambda n: (0, 0)),                # folded bias1
            pl.BlockSpec((3, 3, Cp, Cp), lambda n: (0, 0, 0, 0)),   # folded w2
            pl.BlockSpec((1, Cp), lambda n: (0, 0)),                # folded bias2
        ],
        out_specs=pl.BlockSpec((1, H, W, Cp), lambda n: (n, 0, 0, 0)),
        scratch_shapes=[pltpu.VMEM((Hp, Wp, Cp), jnp.float32)],     # conv1 out + halo
        compiler_params=pltpu.CompilerParams(
            dimension_semantics=("parallel",),
            vmem_limit_bytes=32 * 1024 * 1024,
        ),
    )(xp, w1, b1, w2, b2)

    out = out[..., :C]                                   # drop lane padding
    return jnp.transpose(out, (0, 3, 1, 2))              # NHWC -> NCHW


def _reference_forward(x_nchw, params):
    """Pure-JAX reference (unfused, unfolded) for correctness checking."""
    dn = ("NHWC", "HWIO", "NHWC")
    x = jnp.transpose(x_nchw, (0, 2, 3, 1))

    def conv_bn(inp, w_oihw, g, b, m, v):
        w = jnp.transpose(w_oihw, (2, 3, 1, 0))
        y = jax.lax.conv_general_dilated(
            inp, w, window_strides=(1, 1), padding=((1, 1), (1, 1)),
            dimension_numbers=dn)
        return (y - m) * jax.lax.rsqrt(v + EPS) * g + b

    out = jax.nn.relu(conv_bn(x, params["w1"], params["g1"], params["b1"],
                              params["m1"], params["v1"]))
    out = conv_bn(out, params["w2"], params["g2"], params["b2"],
                  params["m2"], params["v2"])
    out = jax.nn.relu(out + x)
    return jnp.transpose(out, (0, 3, 1, 2))


def _init_params(key, inplanes, planes):
    ks = jax.random.split(key, 10)
    # PyTorch conv weight layout: OIHW. BN params are 1-D (C,).
    w1 = 0.1 * jax.random.normal(ks[0], (planes, inplanes, 3, 3), jnp.float32)
    w2 = 0.1 * jax.random.normal(ks[1], (planes, planes, 3, 3), jnp.float32)

    def bn(kg, kb, km, kv, c):
        g = 1.0 + 0.1 * jax.random.normal(kg, (c,), jnp.float32)
        b = 0.1 * jax.random.normal(kb, (c,), jnp.float32)
        m = 0.05 * jax.random.normal(km, (c,), jnp.float32)
        v = jax.random.uniform(kv, (c,), jnp.float32, 0.5, 1.5)
        return g, b, m, v

    g1, b1, m1, v1 = bn(ks[2], ks[3], ks[4], ks[5], planes)
    g2, b2, m2, v2 = bn(ks[6], ks[7], ks[8], ks[9], planes)
    return {"w1": w1, "w2": w2,
            "g1": g1, "b1": b1, "m1": m1, "v1": v1,
            "g2": g2, "b2": b2, "m2": m2, "v2": v2}


if __name__ == "__main__":
    N, C, H, W = 2, 4, 16, 16            # inplanes = planes = 4, stride = 1
    key = jax.random.PRNGKey(0)
    kx, kp = jax.random.split(key)
    x = jax.random.normal(kx, (N, C, H, W), jnp.float32)
    params = _init_params(kp, C, C)

    out = jax.block_until_ready(basic_block_forward(x, params))
    ref = jax.block_until_ready(_reference_forward(x, params))

    assert out.shape == (N, C, H, W)
    assert jnp.allclose(out, ref, atol=5e-4, rtol=5e-4), \
        float(jnp.max(jnp.abs(out - ref)))
    print("KERNEL_OK")
</pallas_src>

<mosaic_0001>
module attributes {stable_mosaic.version = 11 : i64} {
  func.func @kernel(%arg0: i32, %arg1: memref<1x18x18x128xf32, #tpu.memory_space<vmem>>, %arg2: memref<3x3x128x128xf32, #tpu.memory_space<vmem>>, %arg3: memref<1x128xf32, #tpu.memory_space<vmem>>, %arg4: memref<3x3x128x128xf32, #tpu.memory_space<vmem>>, %arg5: memref<1x128xf32, #tpu.memory_space<vmem>>, %arg6: memref<1x16x16x128xf32, #tpu.memory_space<vmem>>, %arg7: memref<18x18x128xf32, #tpu.memory_space<vmem>>) attributes {dimension_semantics = [#tpu.dimension_semantics<parallel>], iteration_bounds = array<i64: 2>, scalar_prefetch = 0 : i64, scratch_operands = 1 : i64, tpu.core_type = #tpu.core_type<tc>, window_params = [{transform_indices = @transform_0, window_bounds = array<i64: 1, 18, 18, 128>}, {pipeline_mode = #tpu.pipeline_mode<synchronous>, transform_indices = @transform_1, window_bounds = array<i64: 3, 3, 128, 128>}, {pipeline_mode = #tpu.pipeline_mode<synchronous>, transform_indices = @transform_2, window_bounds = array<i64: 1, 128>}, {pipeline_mode = #tpu.pipeline_mode<synchronous>, transform_indices = @transform_3, window_bounds = array<i64: 3, 3, 128, 128>}, {pipeline_mode = #tpu.pipeline_mode<synchronous>, transform_indices = @transform_4, window_bounds = array<i64: 1, 128>}, {transform_indices = @transform_5, window_bounds = array<i64: 1, 16, 16, 128>}]} {
    %cst = arith.constant 0.000000e+00 : f32
    %0 = vector.broadcast %cst : f32 to vector<256x128xf32>
    %c0 = arith.constant 0 : index
    %c0_0 = arith.constant 0 : index
    %c0_1 = arith.constant 0 : index
    %c0_2 = arith.constant 0 : index
    %1 = vector.load %arg1[%c0, %c0_0, %c0_1, %c0_2] : memref<1x18x18x128xf32, #tpu.memory_space<vmem>>, vector<1x16x16x128xf32>
    %2 = vector.shape_cast %1 : vector<1x16x16x128xf32> to vector<256x128xf32>
    %c0_3 = arith.constant 0 : index
    %c0_4 = arith.constant 0 : index
    %c0_5 = arith.constant 0 : index
    %c0_6 = arith.constant 0 : index
    %3 = vector.load %arg2[%c0_3, %c0_4, %c0_5, %c0_6] : memref<3x3x128x128xf32, #tpu.memory_space<vmem>>, vector<1x1x128x128xf32>
    %4 = vector.shape_cast %3 : vector<1x1x128x128xf32> to vector<128x128xf32>
    %cst_7 = arith.constant dense<0.000000e+00> : vector<256x128xf32>
    %5 = tpu.matmul %2, %4, %cst_7 {dimension_numbers = #tpu.dot_dimension_numbers<[1], [0], [0], [1], [0, 0, 1, 1], [], []>} : vector<256x128xf32>, vector<128x128xf32>, vector<256x128xf32> -> vector<256x128xf32>
    %6 = arith.addf %0, %5 : vector<256x128xf32>
    %c0_8 = arith.constant 0 : index
    %c0_9 = arith.constant 0 : index
    %c1 = arith.constant 1 : index
    %c0_10 = arith.constant 0 : index
    %7 = vector.load %arg1[%c0_8, %c0_9, %c1, %c0_10] : memref<1x18x18x128xf32, #tpu.memory_space<vmem>>, vector<1x16x16x128xf32>
    %8 = vector.shape_cast %7 : vector<1x16x16x128xf32> to vector<256x128xf32>
    %c0_11 = arith.constant 0 : index
    %c1_12 = arith.constant 1 : index
    %c0_13 = arith.constant 0 : index
    %c0_14 = arith.constant 0 : index
    %9 = vector.load %arg2[%c0_11, %c1_12, %c0_13, %c0_14] : memref<3x3x128x128xf32, #tpu.memory_space<vmem>>, vector<1x1x128x128xf32>
    %10 = vector.shape_cast %9 : vector<1x1x128x128xf32> to vector<128x128xf32>
    %cst_15 = arith.constant dense<0.000000e+00> : vector<256x128xf32>
    %11 = tpu.matmul %8, %10, %cst_15 {dimension_numbers = #tpu.dot_dimension_numbers<[1], [0], [0], [1], [0, 0, 1, 1], [], []>} : vector<256x128xf32>, vector<128x128xf32>, vector<256x128xf32> -> vector<256x128xf32>
    %12 = arith.addf %6, %11 : vector<256x128xf32>
    %c0_16 = arith.constant 0 : index
    %c0_17 = arith.constant 0 : index
    %c2 = arith.constant 2 : index
    %c0_18 = arith.constant 0 : index
    %13 = vector.load %arg1[%c0_16, %c0_17, %c2, %c0_18] : memref<1x18x18x128xf32, #tpu.memory_space<vmem>>, vector<1x16x16x128xf32>
    %14 = vector.shape_cast %13 : vector<1x16x16x128xf32> to vector<256x128xf32>
    %c0_19 = arith.constant 0 : index
    %c2_20 = arith.constant 2 : index
    %c0_21 = arith.constant 0 : index
    %c0_22 = arith.constant 0 : index
    %15 = vector.load %arg2[%c0_19, %c2_20, %c0_21, %c0_22] : memref<3x3x128x128xf32, #tpu.memory_space<vmem>>, vector<1x1x128x128xf32>
    %16 = vector.shape_cast %15 : vector<1x1x128x128xf32> to vector<128x128xf32>
    %cst_23 = arith.constant dense<0.000000e+00> : vector<256x128xf32>
    %17 = tpu.matmul %14, %16, %cst_23 {dimension_numbers = #tpu.dot_dimension_numbers<[1], [0], [0], [1], [0, 0, 1, 1], [], []>} : vector<256x128xf32>, vector<128x128xf32>, vector<256x128xf32> -> vector<256x128xf32>
    %18 = arith.addf %12, %17 : vector<256x128xf32>
    %c0_24 = arith.constant 0 : index
    %c1_25 = arith.constant 1 : index
    %c0_26 = arith.constant 0 : index
    %c0_27 = arith.constant 0 : index
    %19 = vector.load %arg1[%c0_24, %c1_25, %c0_26, %c0_27] : memref<1x18x18x128xf32, #tpu.memory_space<vmem>>, vector<1x16x16x128xf32>
    %20 = vector.shape_cast %19 : vector<1x16x16x128xf32> to vector<256x128xf32>
    %c1_28 = arith.constant 1 : index
    %c0_29 = arith.constant 0 : index
    %c0_30 = arith.constant 0 : index
    %c0_31 = arith.constant 0 : index
    %21 = vector.load %arg2[%c1_28, %c0_29, %c0_30, %c0_31] : memref<3x3x128x128xf32, #tpu.memory_space<vmem>>, vector<1x1x128x128xf32>
    %22 = vector.shape_cast %21 : vector<1x1x128x128xf32> to vector<128x128xf32>
    %cst_32 = arith.constant dense<0.000000e+00> : vector<256x128xf32>
    %23 = tpu.matmul %20, %22, %cst_32 {dimension_numbers = #tpu.dot_dimension_numbers<[1], [0], [0], [1], [0, 0, 1, 1], [], []>} : vector<256x128xf32>, vector<128x128xf32>, vector<256x128xf32> -> vector<256x128xf32>
    %24 = arith.addf %18, %23 : vector<256x128xf32>
    %c0_33 = arith.constant 0 : index
    %c1_34 = arith.constant 1 : index
    %c1_35 = arith.constant 1 : index
    %c0_36 = arith.constant 0 : index
    %25 = vector.load %arg1[%c0_33, %c1_34, %c1_35, %c0_36] : memref<1x18x18x128xf32, #tpu.memory_space<vmem>>, vector<1x16x16x128xf32>
    %26 = vector.shape_cast %25 : vector<1x16x16x128xf32> to vector<256x128xf32>
    %c1_37 = arith.constant 1 : index
    %c1_38 = arith.constant 1 : index
    %c0_39 = arith.constant 0 : index
    %c0_40 = arith.constant 0 : index
    %27 = vector.load %arg2[%c1_37, %c1_38, %c0_39, %c0_40] : memref<3x3x128x128xf32, #tpu.memory_space<vmem>>, vector<1x1x128x128xf32>
    %28 = vector.shape_cast %27 : vector<1x1x128x128xf32> to vector<128x128xf32>
    %cst_41 = arith.constant dense<0.000000e+00> : vector<256x128xf32>
    %29 = tpu.matmul %26, %28, %cst_41 {dimension_numbers = #tpu.dot_dimension_numbers<[1], [0], [0], [1], [0, 0, 1, 1], [], []>} : vector<256x128xf32>, vector<128x128xf32>, vector<256x128xf32> -> vector<256x128xf32>
    %30 = arith.addf %24, %29 : vector<256x128xf32>
    %c0_42 = arith.constant 0 : index
    %c1_43 = arith.constant 1 : index
    %c2_44 = arith.constant 2 : index
    %c0_45 = arith.constant 0 : index
    %31 = vector.load %arg1[%c0_42, %c1_43, %c2_44, %c0_45] : memref<1x18x18x128xf32, #tpu.memory_space<vmem>>, vector<1x16x16x128xf32>
    %32 = vector.shape_cast %31 : vector<1x16x16x128xf32> to vector<256x128xf32>
    %c1_46 = arith.constant 1 : index
    %c2_47 = arith.constant 2 : index
    %c0_48 = arith.constant 0 : index
    %c0_49 = arith.constant 0 : index
    %33 = vector.load %arg2[%c1_46, %c2_47, %c0_48, %c0_49] : memref<3x3x128x128xf32, #tpu.memory_space<vmem>>, vector<1x1x128x128xf32>
    %34 = vector.shape_cast %33 : vector<1x1x128x128xf32> to vector<128x128xf32>
    %cst_50 = arith.constant dense<0.000000e+00> : vector<256x128xf32>
    %35 = tpu.matmul %32, %34, %cst_50 {dimension_numbers = #tpu.dot_dimension_numbers<[1], [0], [0], [1], [0, 0, 1, 1], [], []>} : vector<256x128xf32>, vector<128x128xf32>, vector<256x128xf32> -> vector<256x128xf32>
    %36 = arith.addf %30, %35 : vector<256x128xf32>
    %c0_51 = arith.constant 0 : index
    %c2_52 = arith.constant 2 : index
    %c0_53 = arith.constant 0 : index
    %c0_54 = arith.constant 0 : index
    %37 = vector.load %arg1[%c0_51, %c2_52, %c0_53, %c0_54] : memref<1x18x18x128xf32, #tpu.memory_space<vmem>>, vector<1x16x16x128xf32>
    %38 = vector.shape_cast %37 : vector<1x16x16x128xf32> to vector<256x128xf32>
    %c2_55 = arith.constant 2 : index
    %c0_56 = arith.constant 0 : index
    %c0_57 = arith.constant 0 : index
    %c0_58 = arith.constant 0 : index
    %39 = vector.load %arg2[%c2_55, %c0_56, %c0_57, %c0_58] : memref<3x3x128x128xf32, #tpu.memory_space<vmem>>, vector<1x1x128x128xf32>
    %40 = vector.shape_cast %39 : vector<1x1x128x128xf32> to vector<128x128xf32>
    %cst_59 = arith.constant dense<0.000000e+00> : vector<256x128xf32>
    %41 = tpu.matmul %38, %40, %cst_59 {dimension_numbers = #tpu.dot_dimension_numbers<[1], [0], [0], [1], [0, 0, 1, 1], [], []>} : vector<256x128xf32>, vector<128x128xf32>, vector<256x128xf32> -> vector<256x128xf32>
    %42 = arith.addf %36, %41 : vector<256x128xf32>
    %c0_60 = arith.constant 0 : index
    %c2_61 = arith.constant 2 : index
    %c1_62 = arith.constant 1 : index
    %c0_63 = arith.constant 0 : index
    %43 = vector.load %arg1[%c0_60, %c2_61, %c1_62, %c0_63] : memref<1x18x18x128xf32, #tpu.memory_space<vmem>>, vector<1x16x16x128xf32>
    %44 = vector.shape_cast %43 : vector<1x16x16x128xf32> to vector<256x128xf32>
    %c2_64 = arith.constant 2 : index
    %c1_65 = arith.constant 1 : index
    %c0_66 = arith.constant 0 : index
    %c0_67 = arith.constant 0 : index
    %45 = vector.load %arg2[%c2_64, %c1_65, %c0_66, %c0_67] : memref<3x3x128x128xf32, #tpu.memory_space<vmem>>, vector<1x1x128x128xf32>
    %46 = vector.shape_cast %45 : vector<1x1x128x128xf32> to vector<128x128xf32>
    %cst_68 = arith.constant dense<0.000000e+00> : vector<256x128xf32>
    %47 = tpu.matmul %44, %46, %cst_68 {dimension_numbers = #tpu.dot_dimension_numbers<[1], [0], [0], [1], [0, 0, 1, 1], [], []>} : vector<256x128xf32>, vector<128x128xf32>, vector<256x128xf32> -> vector<256x128xf32>
    %48 = arith.addf %42, %47 : vector<256x128xf32>
    %c0_69 = arith.constant 0 : index
    %c2_70 = arith.constant 2 : index
    %c2_71 = arith.constant 2 : index
    %c0_72 = arith.constant 0 : index
    %49 = vector.load %arg1[%c0_69, %c2_70, %c2_71, %c0_72] : memref<1x18x18x128xf32, #tpu.memory_space<vmem>>, vector<1x16x16x128xf32>
    %50 = vector.shape_cast %49 : vector<1x16x16x128xf32> to vector<256x128xf32>
    %c2_73 = arith.constant 2 : index
    %c2_74 = arith.constant 2 : index
    %c0_75 = arith.constant 0 : index
    %c0_76 = arith.constant 0 : index
    %51 = vector.load %arg2[%c2_73, %c2_74, %c0_75, %c0_76] : memref<3x3x128x128xf32, #tpu.memory_space<vmem>>, vector<1x1x128x128xf32>
    %52 = vector.shape_cast %51 : vector<1x1x128x128xf32> to vector<128x128xf32>
    %cst_77 = arith.constant dense<0.000000e+00> : vector<256x128xf32>
    %53 = tpu.matmul %50, %52, %cst_77 {dimension_numbers = #tpu.dot_dimension_numbers<[1], [0], [0], [1], [0, 0, 1, 1], [], []>} : vector<256x128xf32>, vector<128x128xf32>, vector<256x128xf32> -> vector<256x128xf32>
    %54 = arith.addf %48, %53 : vector<256x128xf32>
    %c0_78 = arith.constant 0 : index
    %c0_79 = arith.constant 0 : index
    %55 = vector.load %arg3[%c0_78, %c0_79] : memref<1x128xf32, #tpu.memory_space<vmem>>, vector<1x128xf32>
    %56 = vector.broadcast %55 : vector<1x128xf32> to vector<256x128xf32>
    %57 = arith.addf %54, %56 : vector<256x128xf32>
    %cst_80 = arith.constant 0.000000e+00 : f32
    %58 = vector.broadcast %cst_80 : f32 to vector<256x128xf32>
    %59 = arith.maximumf %57, %58 : vector<256x128xf32>
    %cst_81 = arith.constant 0.000000e+00 : f32
    %60 = vector.broadcast %cst_81 : f32 to vector<18x18x128xf32>
    %c0_82 = arith.constant 0 : index
    %c0_83 = arith.constant 0 : index
    %c0_84 = arith.constant 0 : index
    %61 = vector.load %arg7[%c0_82, %c0_83, %c0_84] : memref<18x18x128xf32, #tpu.memory_space<vmem>>, vector<18x18x128xf32>
    tpu.vector_store %arg7[%c0_82, %c0_83, %c0_84], %60 {strides = array<i32>} : memref<18x18x128xf32, #tpu.memory_space<vmem>>, vector<18x18x128xf32>,
    %62 = vector.shape_cast %59 : vector<256x128xf32> to vector<16x16x128xf32>
    %c1_85 = arith.constant 1 : index
    %c1_86 = arith.constant 1 : index
    %c0_87 = arith.constant 0 : index
    %63 = vector.load %arg7[%c1_85, %c1_86, %c0_87] : memref<18x18x128xf32, #tpu.memory_space<vmem>>, vector<16x16x128xf32>
    tpu.vector_store %arg7[%c1_85, %c1_86, %c0_87], %62 {strides = array<i32>} : memref<18x18x128xf32, #tpu.memory_space<vmem>>, vector<16x16x128xf32>,
    %cst_88 = arith.constant 0.000000e+00 : f32
    %64 = vector.broadcast %cst_88 : f32 to vector<256x128xf32>
    %c0_89 = arith.constant 0 : index
    %c0_90 = arith.constant 0 : index
    %c0_91 = arith.constant 0 : index
    %65 = vector.load %arg7[%c0_89, %c0_90, %c0_91] : memref<18x18x128xf32, #tpu.memory_space<vmem>>, vector<16x16x128xf32>
    %66 = vector.shape_cast %65 : vector<16x16x128xf32> to vector<256x128xf32>
    %c0_92 = arith.constant 0 : index
    %c0_93 = arith.constant 0 : index
    %c0_94 = arith.constant 0 : index
    %c0_95 = arith.constant 0 : index
    %67 = vector.load %arg4[%c0_92, %c0_93, %c0_94, %c0_95] : memref<3x3x128x128xf32, #tpu.memory_space<vmem>>, vector<1x1x128x128xf32>
    %68 = vector.shape_cast %67 : vector<1x1x128x128xf32> to vector<128x128xf32>
    %cst_96 = arith.constant dense<0.000000e+00> : vector<256x128xf32>
    %69 = tpu.matmul %66, %68, %cst_96 {dimension_numbers = #tpu.dot_dimension_numbers<[1], [0], [0], [1], [0, 0, 1, 1], [], []>} : vector<256x128xf32>, vector<128x128xf32>, vector<256x128xf32> -> vector<256x128xf32>
    %70 = arith.addf %64, %69 : vector<256x128xf32>
    %c0_97 = arith.constant 0 : index
    %c1_98 = arith.constant 1 : index
    %c0_99 = arith.constant 0 : index
    %71 = vector.load %arg7[%c0_97, %c1_98, %c0_99] : memref<18x18x128xf32, #tpu.memory_space<vmem>>, vector<16x16x128xf32>
    %72 = vector.shape_cast %71 : vector<16x16x128xf32> to vector<256x128xf32>
    %c0_100 = arith.constant 0 : index
    %c1_101 = arith.constant 1 : index
    %c0_102 = arith.constant 0 : index
    %c0_103 = arith.constant 0 : index
    %73 = vector.load %arg4[%c0_100, %c1_101, %c0_102, %c0_103] : memref<3x3x128x128xf32, #tpu.memory_space<vmem>>, vector<1x1x128x128xf32>
    %74 = vector.shape_cast %73 : vector<1x1x128x128xf32> to vector<128x128xf32>
    %cst_104 = arith.constant dense<0.000000e+00> : vector<256x128xf32>
    %75 = tpu.matmul %72, %74, %cst_104 {dimension_numbers = #tpu.dot_dimension_numbers<[1], [0], [0], [1], [0, 0, 1, 1], [], []>} : vector<256x128xf32>, vector<128x128xf32>, vector<256x128xf32> -> vector<256x128xf32>
    %76 = arith.addf %70, %75 : vector<256x128xf32>
    %c0_105 = arith.constant 0 : index
    %c2_106 = arith.constant 2 : index
    %c0_107 = arith.constant 0 : index
    %77 = vector.load %arg7[%c0_105, %c2_106, %c0_107] : memref<18x18x128xf32, #tpu.memory_space<vmem>>, vector<16x16x128xf32>
    %78 = vector.shape_cast %77 : vector<16x16x128xf32> to vector<256x128xf32>
    %c0_108 = arith.constant 0 : index
    %c2_109 = arith.constant 2 : index
    %c0_110 = arith.constant 0 : index
    %c0_111 = arith.constant 0 : index
    %79 = vector.load %arg4[%c0_108, %c2_109, %c0_110, %c0_111] : memref<3x3x128x128xf32, #tpu.memory_space<vmem>>, vector<1x1x128x128xf32>
    %80 = vector.shape_cast %79 : vector<1x1x128x128xf32> to vector<128x128xf32>
    %cst_112 = arith.constant dense<0.000000e+00> : vector<256x128xf32>
    %81 = tpu.matmul %78, %80, %cst_112 {dimension_numbers = #tpu.dot_dimension_numbers<[1], [0], [0], [1], [0, 0, 1, 1], [], []>} : vector<256x128xf32>, vector<128x128xf32>, vector<256x128xf32> -> vector<256x128xf32>
    %82 = arith.addf %76, %81 : vector<256x128xf32>
    %c1_113 = arith.constant 1 : index
    %c0_114 = arith.constant 0 : index
    %c0_115 = arith.constant 0 : index
    %83 = vector.load %arg7[%c1_113, %c0_114, %c0_115] : memref<18x18x128xf32, #tpu.memory_space<vmem>>, vector<16x16x128xf32>
    %84 = vector.shape_cast %83 : vector<16x16x128xf32> to vector<256x128xf32>
    %c1_116 = arith.constant 1 : index
    %c0_117 = arith.constant 0 : index
    %c0_118 = arith.constant 0 : index
    %c0_119 = arith.constant 0 : index
    %85 = vector.load %arg4[%c1_116, %c0_117, %c0_118, %c0_119] : memref<3x3x128x128xf32, #tpu.memory_space<vmem>>, vector<1x1x128x128xf32>
    %86 = vector.shape_cast %85 : vector<1x1x128x128xf32> to vector<128x128xf32>
    %cst_120 = arith.constant dense<0.000000e+00> : vector<256x128xf32>
    %87 = tpu.matmul %84, %86, %cst_120 {dimension_numbers = #tpu.dot_dimension_numbers<[1], [0], [0], [1], [0, 0, 1, 1], [], []>} : vector<256x128xf32>, vector<128x128xf32>, vector<256x128xf32> -> vector<256x128xf32>
    %88 = arith.addf %82, %87 : vector<256x128xf32>
    %c1_121 = arith.constant 1 : index
    %c1_122 = arith.constant 1 : index
    %c0_123 = arith.constant 0 : index
    %89 = vector.load %arg7[%c1_121, %c1_122, %c0_123] : memref<18x18x128xf32, #tpu.memory_space<vmem>>, vector<16x16x128xf32>
    %90 = vector.shape_cast %89 : vector<16x16x128xf32> to vector<256x128xf32>
    %c1_124 = arith.constant 1 : index
    %c1_125 = arith.constant 1 : index
    %c0_126 = arith.constant 0 : index
    %c0_127 = arith.constant 0 : index
    %91 = vector.load %arg4[%c1_124, %c1_125, %c0_126, %c0_127] : memref<3x3x128x128xf32, #tpu.memory_space<vmem>>, vector<1x1x128x128xf32>
    %92 = vector.shape_cast %91 : vector<1x1x128x128xf32> to vector<128x128xf32>
    %cst_128 = arith.constant dense<0.000000e+00> : vector<256x128xf32>
    %93 = tpu.matmul %90, %92, %cst_128 {dimension_numbers = #tpu.dot_dimension_numbers<[1], [0], [0], [1], [0, 0, 1, 1], [], []>} : vector<256x128xf32>, vector<128x128xf32>, vector<256x128xf32> -> vector<256x128xf32>
    %94 = arith.addf %88, %93 : vector<256x128xf32>
    %c1_129 = arith.constant 1 : index
    %c2_130 = arith.constant 2 : index
    %c0_131 = arith.constant 0 : index
    %95 = vector.load %arg7[%c1_129, %c2_130, %c0_131] : memref<18x18x128xf32, #tpu.memory_space<vmem>>, vector<16x16x128xf32>
    %96 = vector.shape_cast %95 : vector<16x16x128xf32> to vector<256x128xf32>
    %c1_132 = arith.constant 1 : index
    %c2_133 = arith.constant 2 : index
    %c0_134 = arith.constant 0 : index
    %c0_135 = arith.constant 0 : index
    %97 = vector.load %arg4[%c1_132, %c2_133, %c0_134, %c0_135] : memref<3x3x128x128xf32, #tpu.memory_space<vmem>>, vector<1x1x128x128xf32>
    %98 = vector.shape_cast %97 : vector<1x1x128x128xf32> to vector<128x128xf32>
    %cst_136 = arith.constant dense<0.000000e+00> : vector<256x128xf32>
    %99 = tpu.matmul %96, %98, %cst_136 {dimension_numbers = #tpu.dot_dimension_numbers<[1], [0], [0], [1], [0, 0, 1, 1], [], []>} : vector<256x128xf32>, vector<128x128xf32>, vector<256x128xf32> -> vector<256x128xf32>
    %100 = arith.addf %94, %99 : vector<256x128xf32>
    %c2_137 = arith.constant 2 : index
    %c0_138 = arith.constant 0 : index
    %c0_139 = arith.constant 0 : index
    %101 = vector.load %arg7[%c2_137, %c0_138, %c0_139] : memref<18x18x128xf32, #tpu.memory_space<vmem>>, vector<16x16x128xf32>
    %102 = vector.shape_cast %101 : vector<16x16x128xf32> to vector<256x128xf32>
    %c2_140 = arith.constant 2 : index
    %c0_141 = arith.constant 0 : index
    %c0_142 = arith.constant 0 : index
    %c0_143 = arith.constant 0 : index
    %103 = vector.load %arg4[%c2_140, %c0_141, %c0_142, %c0_143] : memref<3x3x128x128xf32, #tpu.memory_space<vmem>>, vector<1x1x128x128xf32>
    %104 = vector.shape_cast %103 : vector<1x1x128x128xf32> to vector<128x128xf32>
    %cst_144 = arith.constant dense<0.000000e+00> : vector<256x128xf32>
    %105 = tpu.matmul %102, %104, %cst_144 {dimension_numbers = #tpu.dot_dimension_numbers<[1], [0], [0], [1], [0, 0, 1, 1], [], []>} : vector<256x128xf32>, vector<128x128xf32>, vector<256x128xf32> -> vector<256x128xf32>
    %106 = arith.addf %100, %105 : vector<256x128xf32>
    %c2_145 = arith.constant 2 : index
    %c1_146 = arith.constant 1 : index
    %c0_147 = arith.constant 0 : index
    %107 = vector.load %arg7[%c2_145, %c1_146, %c0_147] : memref<18x18x128xf32, #tpu.memory_space<vmem>>, vector<16x16x128xf32>
    %108 = vector.shape_cast %107 : vector<16x16x128xf32> to vector<256x128xf32>
    %c2_148 = arith.constant 2 : index
    %c1_149 = arith.constant 1 : index
    %c0_150 = arith.constant 0 : index
    %c0_151 = arith.constant 0 : index
    %109 = vector.load %arg4[%c2_148, %c1_149, %c0_150, %c0_151] : memref<3x3x128x128xf32, #tpu.memory_space<vmem>>, vector<1x1x128x128xf32>
    %110 = vector.shape_cast %109 : vector<1x1x128x128xf32> to vector<128x128xf32>
    %cst_152 = arith.constant dense<0.000000e+00> : vector<256x128xf32>
    %111 = tpu.matmul %108, %110, %cst_152 {dimension_numbers = #tpu.dot_dimension_numbers<[1], [0], [0], [1], [0, 0, 1, 1], [], []>} : vector<256x128xf32>, vector<128x128xf32>, vector<256x128xf32> -> vector<256x128xf32>
    %112 = arith.addf %106, %111 : vector<256x128xf32>
    %c2_153 = arith.constant 2 : index
    %c2_154 = arith.constant 2 : index
    %c0_155 = arith.constant 0 : index
    %113 = vector.load %arg7[%c2_153, %c2_154, %c0_155] : memref<18x18x128xf32, #tpu.memory_space<vmem>>, vector<16x16x128xf32>
    %114 = vector.shape_cast %113 : vector<16x16x128xf32> to vector<256x128xf32>
    %c2_156 = arith.constant 2 : index
    %c2_157 = arith.constant 2 : index
    %c0_158 = arith.constant 0 : index
    %c0_159 = arith.constant 0 : index
    %115 = vector.load %arg4[%c2_156, %c2_157, %c0_158, %c0_159] : memref<3x3x128x128xf32, #tpu.memory_space<vmem>>, vector<1x1x128x128xf32>
    %116 = vector.shape_cast %115 : vector<1x1x128x128xf32> to vector<128x128xf32>
    %cst_160 = arith.constant dense<0.000000e+00> : vector<256x128xf32>
    %117 = tpu.matmul %114, %116, %cst_160 {dimension_numbers = #tpu.dot_dimension_numbers<[1], [0], [0], [1], [0, 0, 1, 1], [], []>} : vector<256x128xf32>, vector<128x128xf32>, vector<256x128xf32> -> vector<256x128xf32>
    %118 = arith.addf %112, %117 : vector<256x128xf32>
    %c0_161 = arith.constant 0 : index
    %c1_162 = arith.constant 1 : index
    %c1_163 = arith.constant 1 : index
    %c0_164 = arith.constant 0 : index
    %119 = vector.load %arg1[%c0_161, %c1_162, %c1_163, %c0_164] : memref<1x18x18x128xf32, #tpu.memory_space<vmem>>, vector<1x16x16x128xf32>
    %120 = vector.shape_cast %119 : vector<1x16x16x128xf32> to vector<256x128xf32>
    %c0_165 = arith.constant 0 : index
    %c0_166 = arith.constant 0 : index
    %121 = vector.load %arg5[%c0_165, %c0_166] : memref<1x128xf32, #tpu.memory_space<vmem>>, vector<1x128xf32>
    %122 = vector.broadcast %121 : vector<1x128xf32> to vector<256x128xf32>
    %123 = arith.addf %118, %122 : vector<256x128xf32>
    %124 = arith.addf %123, %120 : vector<256x128xf32>
    %cst_167 = arith.constant 0.000000e+00 : f32
    %125 = vector.broadcast %cst_167 : f32 to vector<256x128xf32>
    %126 = arith.maximumf %124, %125 : vector<256x128xf32>
    %127 = vector.shape_cast %126 : vector<256x128xf32> to vector<1x16x16x128xf32>
    %c0_168 = arith.constant 0 : index
    %c0_169 = arith.constant 0 : index
    %c0_170 = arith.constant 0 : index
    %c0_171 = arith.constant 0 : index
    %128 = vector.load %arg6[%c0_168, %c0_169, %c0_170, %c0_171] : memref<1x16x16x128xf32, #tpu.memory_space<vmem>>, vector<1x16x16x128xf32>
    tpu.vector_store %arg6[%c0_168, %c0_169, %c0_170, %c0_171], %127 {strides = array<i32>} : memref<1x16x16x128xf32, #tpu.memory_space<vmem>>, vector<1x16x16x128xf32>,
    return
  }
  func.func @transform_0(%arg0: i32) -> (i32, i32, i32, i32) {
    %c0_i32 = arith.constant 0 : i32
    %c0_i32_0 = arith.constant 0 : i32
    %c0_i32_1 = arith.constant 0 : i32
    %c0_i32_2 = arith.constant 0 : i32
    return %arg0, %c0_i32, %c0_i32_0, %c0_i32_1 : i32, i32, i32, i32
  }
  func.func @transform_1(%arg0: i32) -> (i32, i32, i32, i32) {
    %c0_i32 = arith.constant 0 : i32
    %c0_i32_0 = arith.constant 0 : i32
    %c0_i32_1 = arith.constant 0 : i32
    %c0_i32_2 = arith.constant 0 : i32
    %c0_i32_3 = arith.constant 0 : i32
    return %c0_i32, %c0_i32_0, %c0_i32_1, %c0_i32_2 : i32, i32, i32, i32
  }
  func.func @transform_2(%arg0: i32) -> (i32, i32) {
    %c0_i32 = arith.constant 0 : i32
    %c0_i32_0 = arith.constant 0 : i32
    %c0_i32_1 = arith.constant 0 : i32
    return %c0_i32, %c0_i32_0 : i32, i32
  }
  func.func @transform_3(%arg0: i32) -> (i32, i32, i32, i32) {
    %c0_i32 = arith.constant 0 : i32
    %c0_i32_0 = arith.constant 0 : i32
    %c0_i32_1 = arith.constant 0 : i32
    %c0_i32_2 = arith.constant 0 : i32
    %c0_i32_3 = arith.constant 0 : i32
    return %c0_i32, %c0_i32_0, %c0_i32_1, %c0_i32_2 : i32, i32, i32, i32
  }
  func.func @transform_4(%arg0: i32) -> (i32, i32) {
    %c0_i32 = arith.constant 0 : i32
    %c0_i32_0 = arith.constant 0 : i32
    %c0_i32_1 = arith.constant 0 : i32
    return %c0_i32, %c0_i32_0 : i32, i32
  }
  func.func @transform_5(%arg0: i32) -> (i32, i32, i32, i32) {
    %c0_i32 = arith.constant 0 : i32
    %c0_i32_0 = arith.constant 0 : i32
    %c0_i32_1 = arith.constant 0 : i32
    %c0_i32_2 = arith.constant 0 : i32
    return %arg0, %c0_i32, %c0_i32_0, %c0_i32_1 : i32, i32, i32, i32
  }
}

</mosaic_0001>

<bundles_post_ra>
// kernel: tpu_custom_call.1
= control target key start
LH: loop header
LB: loop body
LE: loop exit
PB: predicated region body
PF: predicated region fallthrough
CT: control target
= control target key end

     0   :  { %10 = vsyncpa [#allocation4], 0  ;;  %s6718_s0 = inlined_call_operand.vmem [shape: f32[2,18,18,128], index: 0, kind: input, shape index: {}]   ;;  %s6719_s1 = inlined_call_operand.vmem [shape: f32[3,3,128,128], index: 1, kind: input, shape index: {}]   ;;  %s6720_s2 = inlined_call_operand.vmem [shape: f32[1,128], index: 2, kind: input, shape index: {}]   ;;  %s6721_s3 = inlined_call_operand.hbm [shape: f32[3,3,128,128], index: 3, kind: input, shape index: {}]   ;;  %s6722_s4 = inlined_call_operand.vmem [shape: f32[1,128], index: 4, kind: input, shape index: {}]   ;;  %s6723_s5 = inlined_call_operand.hbm [shape: f32[2,16,16,128], index: 5, kind: output, shape index: {}]  }
   0x1   :  { %11 = vsyncpa [#allocation5], 0 }
   0x2   :  { %13 = vsyncpa [#allocation5 + $0x1], 0  ;;  %s4609_s18 = smov 0   ;;  %s4611_s19 = smov 0  }
   0x3   :  { %s4613_s20 = smov 0   ;;  %s4615_s21 = smov 0  }
   0x4 LB: > { %s4630_s22 = sadd.s32 4294967295, %s4571_s21   ;;  %s4014_s23 = sadd.s32 4294967294, %s4571_s21   ;;  %s4571_s21 = sphi %s4615_s21, %s6829_s21   ;;  %s4567_s20 = sphi %s4613_s20, %s6828_s20   ;;  %s4563_s19 = sphi %s4611_s19, %s6827_s19   ;;  %s4559_s18 = sphi %s4609_s18, %s6826_s18  }
   0x5   : > { %s4634_s24 = sadd.s32 1, %s4571_s21   ;;  %s136_s25 = sadd.s32 1, %s4567_s20 }
   0x6   : > { %s133_s26 = ssub.s32 %s4571_s21, %s4634_s24  ;;  %p146_p0 = scmp.ne.s32.totalorder %s4567_s20, %s4563_s19 }
   0x7   : > { %p134_p1 = scmp.eq.s32.totalorder %s133_s26, 0  ;;  %p147_p2 = scmp.eq.s32.totalorder %s4630_s22, 1 }
   0x8   : > { %p152_p3 = scmp.ne.s32.totalorder %s4563_s19, %s4559_s18  ;;  %p153_p4 = scmp.eq.s32.totalorder %s4014_s23, 1 }
   0x9   : > { %s4645_s27 = scalar_select %p134_p1, %s4567_s20, %s136_s25  }
   0xa   : > { %p4647_p5 = por %p147_p2, %p146_p0  ;;  %p4651_p6 = por %p153_p4, %p152_p3 }
   0xb   : > { %p4015_p7 = scmp.ge.s32.totalorder %s4571_s21, 1  ;;  %p160_p8 = scmp.lt.s32.totalorder %s4571_s21, 3 }
   0xc   : > { %p4427_p9 = scmp.eq.s32.totalorder %s4630_s22, 0  ;;  %s177_s7 = sshll.u32 %s6721_s3, 4  ;;  %s178_s7 = int_to_ptr.hbm [resolvable:$true] %s177_s7 }
   0xd   : > { %p161_p10 = pnand %p4015_p7, %p160_p8  ;;  %s4573_s8 = smov [#allocation3]  }
   0xe   : > { %s179_s9 = sshll.u32 %s4573_s8, 4  ;;  %s4574_s10 = smov 128   ;;  %s180_s9 = int_to_ptr.vmem [resolvable:$true] %s179_s9 }
   0xf   : > { %p4419_p11 = pneg %p161_p10  ;;  %s4575_s11 = smov 8  }
  0x10   : > { %206 = sbr.rel (%p161_p10) target bundleno = 1464 (0x5b8), region = 40 }
  0x11   : > { %p4420_p12 = pnand %p4427_p9, %p4419_p11 }
  0x13   : > { %4422 = dma.hbm_to_vmem [thread:$0]  (!%p4420_p12), %s178_s7, 18432, %s180_s9, [#allocation4], %s4574_s10, %s4574_s10, %s4575_s11  }
  0x15   : > { %4550 = dma.done.wait (%p4427_p9), [#allocation4], 18432  }
  0x16   : > { %4552 = vsyncadd (%p4427_p9), [#allocation4], 4294948864  ;;  %v4037_v0 = vld [vmem:[%s6719_s1 + $0xf8] sm:$0xff]  ;;  %v4036_v2 = vld [vmem:[%s6719_s1 + $0xf0] sm:$0xff]  ;;  %p235_p13 = scmp.lt.s32.totalorder %s4630_s22, 1  ;;  %s4379_s9 = sshll.u32 %s4630_s22, 8 }
  0x17   : > { %v287_v1 = vld [vmem:[%s6719_s1 + $0x78] sm:$0xff]  ;;  %337 = vmatpush.msra.mxu0 %v4037_v0  ;;  %4380 = vmatpush.msra.mxu2 %v4037_v0  ;;  %v286_v3 = vld [vmem:[%s6719_s1 + $0x70] sm:$0xff]  ;;  %v4035_v4 = vld [vmem:[%s6719_s1 + $0xe8] sm:$0xff]  ;;  %s3936_s13 = scalar_lea.hbm %s6723_s5, %s4379_s9  ;;  %s4525_s25 = scalar_lea.hbm %s6723_s5, 512 }
  0x18   : > { %4396 = vmatpush.msra.mxu3 %v287_v1  ;;  %450 = vmatpush.msra.mxu1 %v287_v1  ;;  %v285_v5 = vld [vmem:[%s6719_s1 + $0x68] sm:$0xff]  ;;  %v4034_v6 = vld [vmem:[%s6719_s1 + $0xe0] sm:$0xff]  ;;  %v4033_v8 = vld [vmem:[%s6719_s1 + $0xd8] sm:$0xff]  ;;  %s236_s6 = scalar_select %p235_p13, %s4630_s22, 1 }
  0x19   : > { %338 = vmatpush.msra.mxu0 %v4036_v2  ;;  %4381 = vmatpush.msra.mxu2 %v4036_v2  ;;  %v284_v7 = vld [vmem:[%s6719_s1 + $0x60] sm:$0xff]  ;;  %v283_v9 = vld [vmem:[%s6719_s1 + $0x58] sm:$0xff]  ;;  %v4032_v10 = vld [vmem:[%s6719_s1 + $0xd0] sm:$0xff] }
  0x1a   : > { %4397 = vmatpush.msra.mxu3 %v286_v3  ;;  %451 = vmatpush.msra.mxu1 %v286_v3  ;;  %v282_v11 = vld [vmem:[%s6719_s1 + $0x50] sm:$0xff]  ;;  %v4031_v12 = vld [vmem:[%s6719_s1 + $0xc8] sm:$0xff]  ;;  %v4030_v14 = vld [vmem:[%s6719_s1 + $0xc0] sm:$0xff]  ;;  %s4412_s15 = smul.u32 432, %s236_s6  ;;  %s232_s6 = sand.u32 1, %s4563_s19  }
  0x1b   : > { %339 = vmatpush.msra.mxu0 %v4035_v4  ;;  %4382 = vmatpush.msra.mxu2 %v4035_v4  ;;  %v281_v13 = vld [vmem:[%s6719_s1 + $0x48] sm:$0xff]  ;;  %v280_v15 = vld [vmem:[%s6719_s1 + $0x40] sm:$0xff]  ;;  %v4029_v16 = vld [vmem:[%s6719_s1 + $0xb8] sm:$0xff]  ;;  %s4020_s7 = sshll.u32 %s232_s6, 8  ;;  %s3925_s22 = scalar_lea.sflag [#allocation5], %s232_s6 }
  0x1c   : > { %4398 = vmatpush.msra.mxu3 %v285_v5  ;;  %452 = vmatpush.msra.mxu1 %v285_v5  ;;  %v279_v17 = vld [vmem:[%s6719_s1 + $0x38] sm:$0xff]  ;;  %v4028_v18 = vld [vmem:[%s6719_s1 + $0xb0] sm:$0xff]  ;;  %v4027_v20 = vld [vmem:[%s6719_s1 + $0xa8] sm:$0xff]  ;;  %s4759_s10 = scalar_lea.vmem %s6718_s0, %s4412_s15  ;;  %s6436_s8 = scalar_lea.vmem [#allocation6], %s4020_s7 }
  0x1d   : > { %340 = vmatpush.msra.mxu0 %v4034_v6  ;;  %4383 = vmatpush.msra.mxu2 %v4034_v6  ;;  %v278_v19 = vld [vmem:[%s6719_s1 + $0x30] sm:$0xff]  ;;  %v277_v21 = vld [vmem:[%s6719_s1 + $0x28] sm:$0xff]  ;;  %v4026_v22 = vld [vmem:[%s6719_s1 + $0xa0] sm:$0xff]  ;;  %s3937_s14 = sshll.u32 %s6436_s8, 4  ;;  %s3939_s15 = sshll.u32 %s3936_s13, 4  ;;  %s3938_s14 = int_to_ptr.vmem [resolvable:$true] %s3937_s14  ;;  %s3940_s15 = int_to_ptr.hbm [resolvable:$true] %s3939_s15 }
  0x1e   : > { %4399 = vmatpush.msra.mxu3 %v284_v7  ;;  %453 = vmatpush.msra.mxu1 %v284_v7  ;;  %v276_v23 = vld [vmem:[%s6719_s1 + $0x20] sm:$0xff]  ;;  %v4025_v24 = vld [vmem:[%s6719_s1 + $0x98] sm:$0xff]  ;;  %v4024_v26 = vld [vmem:[%s6719_s1 + $0x90] sm:$0xff]  ;;  %s4519_s16 = sshra.s32 %s3940_s15, 4  ;;  %s4520_s16 = int_to_ptr.hbm [resolvable:$true] %s4519_s16 }
  0x1f   : > { %341 = vmatpush.msra.mxu0 %v4033_v8  ;;  %4384 = vmatpush.msra.mxu2 %v4033_v8  ;;  %v275_v25 = vld [vmem:[%s6719_s1 + $0x18] sm:$0xff]  ;;  %v274_v27 = vld [vmem:[%s6719_s1 + $0x10] sm:$0xff]  ;;  %v4023_v28 = vld [vmem:[%s6719_s1 + $0x88] sm:$0xff]  ;;  %s4521_s17 = scalar_lea.hbm %s4520_s16, 256  ;;  %p4526_p3 = scmp.lt.s32.totalorder %s4520_s16, %s6723_s5 }
  0x20   : > { %4400 = vmatpush.msra.mxu3 %v283_v9  ;;  %454 = vmatpush.msra.mxu1 %v283_v9  ;;  %v273_v29 = vld [vmem:[%s6719_s1 + $0x8] sm:$0xff]  ;;  %v4022_v30 = vld [vmem:[%s6719_s1 + $0x80] sm:$0xff]  ;;  %v4053_v35 = vld [vmem:[%s6719_s1 + $0x178] sm:$0xff]  ;;  %p4522_p0 = scmp.ne.s32.totalorder %s4520_s16, %s4521_s17  ;;  %p4527_p4 = scmp.lt.s32.totalorder %s4525_s25, %s4521_s17 }
  0x21   : > { %342 = vmatpush.msra.mxu0 %v4032_v10  ;;  %4385 = vmatpush.msra.mxu2 %v4032_v10  ;;  %v272_v31 = vld [vmem:[%s6719_s1] sm:$0xff]  ;;  %v4101_v36 = vld [vmem:[%s6719_s1 + $0x1f8] sm:$0xff]  ;;  %v4052_v38 = vld [vmem:[%s6719_s1 + $0x170] sm:$0xff] }
  0x22   : > { %4401 = vmatpush.msra.mxu3 %v282_v11  ;;  %455 = vmatpush.msra.mxu1 %v282_v11  ;;  %v288_v32 = vld [vmem:[%s4759_s10 + $0x1] sm:$0xff]  ;;  %v4149_v37 = vld [vmem:[%s6719_s1 + $0x278] sm:$0xff]  ;;  %v4100_v40 = vld [vmem:[%s6719_s1 + $0x1f0] sm:$0xff]  ;;  %p4523_p1 = pnand %p4522_p0, %p4647_p5  ;;  %p4528_p7 = por %p4527_p4, %p4526_p3 }
  0x23   : > { %343 = vmatpush.msra.mxu0 %v4031_v12  ;;  %4386 = vmatpush.msra.mxu2 %v4031_v12  ;;  %v4772_v33 = vld [vmem:[%s4759_s10 + $0xc1] sm:$0xff]  ;;  %v4148_v41 = vld [vmem:[%s6719_s1 + $0x270] sm:$0xff]  ;;  %v4049_v50 = vld [vmem:[%s6719_s1 + $0x158] sm:$0xff] }
  0x24   : > { %4402 = vmatpush.msra.mxu3 %v281_v13  ;;  %456 = vmatpush.msra.mxu1 %v281_v13  ;;  %v4775_v34 = vld [vmem:[%s4759_s10 + $0xc0] sm:$0xff]  ;;  %v4051_v42 = vld [vmem:[%s6719_s1 + $0x168] sm:$0xff]  ;;  %v4097_v53 = vld [vmem:[%s6719_s1 + $0x1d8] sm:$0xff]  ;;  %p4524_p2 = pneg %p4523_p1 }
  0x25   : > { %344 = vmatpush.msra.mxu0 %v4030_v14  ;;  %4387 = vmatpush.msra.mxu2 %v4030_v14  ;;  %v240_v39 = vld [vmem:[%s4759_s10] sm:$0xff]  ;;  %v4099_v43 = vld [vmem:[%s6719_s1 + $0x1e8] sm:$0xff]  ;;  %v4048_v54 = vld [vmem:[%s6719_s1 + $0x150] sm:$0xff] }
  0x26   : > { %4403 = vmatpush.msra.mxu3 %v280_v15  ;;  %457 = vmatpush.msra.mxu1 %v280_v15  ;;  %v4147_v44 = vld [vmem:[%s6719_s1 + $0x268] sm:$0xff]  ;;  %v4050_v46 = vld [vmem:[%s6719_s1 + $0x160] sm:$0xff]  ;;  %v4145_v55 = vld [vmem:[%s6719_s1 + $0x258] sm:$0xff]  ;;  %p4529_p8 = pnand %p4528_p7, %p4524_p2 }
  0x27   : > { %345 = vmatpush.msra.mxu0 %v4029_v16  ;;  %4388 = vmatpush.msra.mxu2 %v4029_v16  ;;  %v289_v45 = vld [vmem:[%s4759_s10 + $0x9] sm:$0xff]  ;;  %v4098_v49 = vld [vmem:[%s6719_s1 + $0x1e0] sm:$0xff]  ;;  %v4848_v59 = vld [vmem:[%s4759_s10 + $0xd8] sm:$0xff] }
  0x28   : > { %4404 = vmatpush.msra.mxu3 %v279_v17  ;;  %458 = vmatpush.msra.mxu1 %v279_v17  ;;  %v4812_v47 = vld [vmem:[%s4759_s10 + $0xc9] sm:$0xff]  ;;  %v4146_v51 = vld [vmem:[%s6719_s1 + $0x260] sm:$0xff]  ;;  %v4854_v60 = vld [vmem:[%s4759_s10 + $0x18] sm:$0xff] }
  0x29   : > { %346 = vmatpush.msra.mxu0 %v4028_v18  ;;  %4389 = vmatpush.msra.mxu2 %v4028_v18  ;;  %v4815_v48 = vld [vmem:[%s4759_s10 + $0xc8] sm:$0xff]  ;;  %v4096_v56 = vld [vmem:[%s6719_s1 + $0x1d0] sm:$0xff]  ;;  %v4842_v57 = vld [vmem:[%s4759_s10 + $0x19] sm:$0xff] }
  0x2a   : > { %4405 = vmatpush.msra.mxu3 %v278_v19  ;;  %459 = vmatpush.msra.mxu1 %v278_v19  ;;  %v241_v52 = vld [vmem:[%s4759_s10 + $0x8] sm:$0xff]  ;;  %v4845_v58 = vld [vmem:[%s4759_s10 + $0xd9] sm:$0xff]  ;;  %v4144_v63 = vld [vmem:[%s6719_s1 + $0x250] sm:$0xff] }
  0x2b   : > { %347 = vmatpush.msra.mxu0 %v4027_v20  ;;  %4390 = vmatpush.msra.mxu2 %v4027_v20  ;;  %v4047_v61 = vld [vmem:[%s6719_s1 + $0x148] sm:$0xff]  ;;  %v4873_v2 = vld [vmem:[%s4759_s10 + $0xe0] sm:$0xff]  ;;  %v4892_v7 = vld [vmem:[%s4759_s10 + $0x31] sm:$0xff] }
  0x2c   : > { %4406 = vmatpush.msra.mxu3 %v277_v21  ;;  %460 = vmatpush.msra.mxu1 %v277_v21  ;;  %v4095_v62 = vld [vmem:[%s6719_s1 + $0x1c8] sm:$0xff]  ;;  %v4879_v3 = vld [vmem:[%s4759_s10 + $0x20] sm:$0xff]  ;;  %v308_v8 = vld [vmem:[%s4759_s10 + $0xf1] sm:$0xff] }
  0x2d   : > { %348 = vmatpush.msra.mxu0 %v4026_v22  ;;  %4391 = vmatpush.msra.mxu2 %v4026_v22  ;;  %v4867_v0 = vld [vmem:[%s4759_s10 + $0x21] sm:$0xff]  ;;  %v4896_v9 = vld [vmem:[%s4759_s10 + $0xf0] sm:$0xff]  ;;  %v4045_v11 = vld [vmem:[%s6719_s1 + $0x138] sm:$0xff] }
  0x2e   : > { %4407 = vmatpush.msra.mxu3 %v276_v23  ;;  %461 = vmatpush.msra.mxu1 %v276_v23  ;;  %v4870_v1 = vld [vmem:[%s4759_s10 + $0xe1] sm:$0xff]  ;;  %v4901_v10 = vld [vmem:[%s4759_s10 + $0x30] sm:$0xff]  ;;  %v4093_v12 = vld [vmem:[%s6719_s1 + $0x1b8] sm:$0xff] }
  0x2f   : > { %349 = vmatpush.msra.mxu0 %v4025_v24  ;;  %4392 = vmatpush.msra.mxu2 %v4025_v24  ;;  %v4046_v4 = vld [vmem:[%s6719_s1 + $0x140] sm:$0xff]  ;;  %v4143_v6 = vld [vmem:[%s6719_s1 + $0x248] sm:$0xff]  ;;  %v261_v16 = vld [vmem:[%s4759_s10 + $0xf8] sm:$0xff] }
  0x30   : > { %4408 = vmatpush.msra.mxu3 %v275_v25  ;;  %462 = vmatpush.msra.mxu1 %v275_v25  ;;  %v4094_v5 = vld [vmem:[%s6719_s1 + $0x1c0] sm:$0xff]  ;;  %v4920_v17 = vld [vmem:[%s4759_s10 + $0x38] sm:$0xff]  ;;  %v4044_v18 = vld [vmem:[%s6719_s1 + $0x130] sm:$0xff] }
  0x31   : > { %350 = vmatpush.msra.mxu0 %v4024_v26  ;;  %4393 = vmatpush.msra.mxu2 %v4024_v26  ;;  %v4142_v13 = vld [vmem:[%s6719_s1 + $0x240] sm:$0xff]  ;;  %v4092_v19 = vld [vmem:[%s6719_s1 + $0x1b0] sm:$0xff]  ;;  %v4141_v20 = vld [vmem:[%s6719_s1 + $0x238] sm:$0xff] }
  0x32   : > { %4409 = vmatpush.msra.mxu3 %v274_v27  ;;  %463 = vmatpush.msra.mxu1 %v274_v27  ;;  %v4914_v14 = vld [vmem:[%s4759_s10 + $0x39] sm:$0xff]  ;;  %v4933_v21 = vld [vmem:[%s4759_s10 + $0x49] sm:$0xff] }
  0x33   : > { %351 = vmatpush.msra.mxu0 %v4023_v28  ;;  %4394 = vmatpush.msra.mxu2 %v4023_v28  ;;  %v309_v15 = vld [vmem:[%s4759_s10 + $0xf9] sm:$0xff]  ;;  %v310_v22 = vld [vmem:[%s4759_s10 + $0x109] sm:$0xff]  ;;  %v4952_v28 = vld [vmem:[%s4759_s10 + $0x51] sm:$0xff] }
  0x34   : > { %4410 = vmatpush.msra.mxu3 %v273_v29  ;;  %464 = vmatpush.msra.mxu1 %v273_v29  ;;  %v262_v23 = vld [vmem:[%s4759_s10 + $0x108] sm:$0xff]  ;;  %v4140_v27 = vld [vmem:[%s6719_s1 + $0x230] sm:$0xff] }
  0x35   : > { %352 = vmatpush.msra.mxu0 %v4022_v30  ;;  %4395 = vmatpush.msra.mxu2 %v4022_v30  ;;  %v4939_v24 = vld [vmem:[%s4759_s10 + $0x48] sm:$0xff]  ;;  %v311_v29 = vld [vmem:[%s4759_s10 + $0x111] sm:$0xff] }
  0x36   : > { %4411 = vmatpush.msra.mxu3 %v272_v31  ;;  %353 = vmatmul.f32.vlgmr.msra.gmra.mxu0 %v288_v32  ;;  %v4043_v25 = vld [vmem:[%s6719_s1 + $0x128] sm:$0xff]  ;;  %v263_v30 = vld [vmem:[%s4759_s10 + $0x110] sm:$0xff]  ;;  %v4042_v32 = vld [vmem:[%s6719_s1 + $0x120] sm:$0xff] }
  0x37   : > { %401 = vmatmul.f32.vlgmr.msra.gmra.mxu2 %v4772_v33  ;;  %514 = vmatmul.f32.vlgmr.msra.gmra.mxu3 %v4775_v34  ;;  %v4091_v26 = vld [vmem:[%s6719_s1 + $0x1a8] sm:$0xff] }
  0x38   : > { %612 = vmatpush.msrb.mxu2 %v4053_v35  ;;  %807 = vmatpush.msrb.mxu3 %v4101_v36  ;;  %v4090_v35 = vld [vmem:[%s6719_s1 + $0x1a0] sm:$0xff]  ;;  %v4139_v36 = vld [vmem:[%s6719_s1 + $0x228] sm:$0xff] }
  0x39   : > { %465 = vmatpush.msra.mxu1 %v272_v31  ;;  %1001 = vmatpush.msrb.mxu0 %v4149_v37  ;;  %v4958_v31 = vld [vmem:[%s4759_s10 + $0x50] sm:$0xff]  ;;  %v4971_v37 = vld [vmem:[%s4759_s10 + $0x61] sm:$0xff] }
  0x3a   : > { %613 = vmatpush.msrb.mxu2 %v4052_v38  ;;  %466 = vmatmul.f32.vlgmr.msra.gmra.mxu1 %v240_v39  ;;  %v312_v38 = vld [vmem:[%s4759_s10 + $0x121] sm:$0xff] }
  0x3b   : > { %808 = vmatpush.msrb.mxu3 %v4100_v40  ;;  %1002 = vmatpush.msrb.mxu0 %v4148_v41  ;;  %v264_v39 = vld [vmem:[%s4759_s10 + $0x120] sm:$0xff]  ;;  %v4041_v41 = vld [vmem:[%s6719_s1 + $0x118] sm:$0xff] }
  0x3c   : > { %614 = vmatpush.msrb.mxu2 %v4051_v42  ;;  %v4977_v40 = vld [vmem:[%s4759_s10 + $0x60] sm:$0xff]  ;;  %v4089_v42 = vld [vmem:[%s6719_s1 + $0x198] sm:$0xff] }
  0x3d   : > { %809 = vmatpush.msrb.mxu3 %v4099_v43  ;;  %1003 = vmatpush.msrb.mxu0 %v4147_v44  ;;  %v4138_v43 = vld [vmem:[%s6719_s1 + $0x220] sm:$0xff]  ;;  %v4990_v44 = vld [vmem:[%s4759_s10 + $0x69] sm:$0xff] }
  0x3e   : > { %356 = vmatmul.f32.gmra.mxu0 %v289_v45  ;;  %615 = vmatpush.msrb.mxu2 %v4050_v46  ;;  %v313_v45 = vld [vmem:[%s4759_s10 + $0x129] sm:$0xff] }
  0x3f   : > { %404 = vmatmul.f32.gmra.mxu2 %v4812_v47  ;;  %517 = vmatmul.f32.gmra.mxu3 %v4815_v48  ;;  %v265_v46 = vld [vmem:[%s4759_s10 + $0x128] sm:$0xff] }
  0x40   : > { %810 = vmatpush.msrb.mxu3 %v4098_v49  ;;  %616 = vmatpush.msrb.mxu2 %v4049_v50  ;;  %v4996_v49 = vld [vmem:[%s4759_s10 + $0x68] sm:$0xff]  ;;  %v4040_v50 = vld [vmem:[%s6719_s1 + $0x110] sm:$0xff] }
  0x41   : > { %1004 = vmatpush.msrb.mxu0 %v4146_v51  ;;  %v4088_v51 = vld [vmem:[%s6719_s1 + $0x190] sm:$0xff] }
  0x42   : > { %469 = vmatmul.f32.gmra.mxu1 %v241_v52  ;;  %811 = vmatpush.msrb.mxu3 %v4097_v53  ;;  %v4137_v52 = vld [vmem:[%s6719_s1 + $0x218] sm:$0xff] }
  0x43   : > { %617 = vmatpush.msrb.mxu2 %v4048_v54  ;;  %1005 = vmatpush.msrb.mxu0 %v4145_v55  ;;  %v4197_v53 = vld [vmem:[%s6719_s1 + $0x2f8] sm:$0xff]  ;;  %v4196_v54 = vld [vmem:[%s6719_s1 + $0x2f0] sm:$0xff] }
  0x44   : > { %812 = vmatpush.msrb.mxu3 %v4096_v56  ;;  %1195 = vmatpush.msrb.mxu1 %v4197_v53  ;;  %v5015_v55 = vld [vmem:[%s4759_s10 + $0x79] sm:$0xff]  ;;  %v4184_v53 = vld [vmem:[%s6719_s1 + $0x290] sm:$0xff] }
  0x45   : > { %618 = vmatpush.msrb.mxu2 %v4047_v61  ;;  %1006 = vmatpush.msrb.mxu0 %v4144_v63  ;;  %v314_v56 = vld [vmem:[%s4759_s10 + $0x139] sm:$0xff]  ;;  %v4039_v63 = vld [vmem:[%s6719_s1 + $0x108] sm:$0xff] }
  0x46   : > { %359 = vmatmul.f32.gmra.mxu0 %v4842_v57  ;;  %813 = vmatpush.msrb.mxu3 %v4095_v62  ;;  %v266_v61 = vld [vmem:[%s4759_s10 + $0x138] sm:$0xff] }
  0x47   : > { %407 = vmatmul.f32.gmra.mxu2 %v4845_v58  ;;  %520 = vmatmul.f32.gmra.mxu3 %v4848_v59  ;;  %v5021_v62 = vld [vmem:[%s4759_s10 + $0x78] sm:$0xff] }
  0x48   : > { %619 = vmatpush.msrb.mxu2 %v4046_v4  ;;  %814 = vmatpush.msrb.mxu3 %v4094_v5  ;;  %v4195_v4 = vld [vmem:[%s6719_s1 + $0x2e8] sm:$0xff] }
  0x49   : > { %1007 = vmatpush.msrb.mxu0 %v4143_v6  ;;  %1196 = vmatpush.msrb.mxu1 %v4196_v54  ;;  %v4087_v5 = vld [vmem:[%s6719_s1 + $0x188] sm:$0xff]  ;;  %v4136_v6 = vld [vmem:[%s6719_s1 + $0x210] sm:$0xff] }
  0x4a   : > { %472 = vmatmul.f32.gmra.mxu1 %v4854_v60  ;;  %620 = vmatpush.msrb.mxu2 %v4045_v11  ;;  %v4193_v11 = vld [vmem:[%s6719_s1 + $0x2d8] sm:$0xff]  ;;  %v5121_v54 = vld [vmem:[%s4759_s10 + $0xa9] sm:$0xff] }
  0x4b   : > { %815 = vmatpush.msrb.mxu3 %v4093_v12  ;;  %1008 = vmatpush.msrb.mxu0 %v4142_v13  ;;  %v5043_v12 = vld [vmem:[%s4759_s10 + $0x81] sm:$0xff] }
  0x4c   : > { %621 = vmatpush.msrb.mxu2 %v4044_v18  ;;  %1197 = vmatpush.msrb.mxu1 %v4195_v4  ;;  %v315_v13 = vld [vmem:[%s4759_s10 + $0x141] sm:$0xff] }
  0x4d   : > { %816 = vmatpush.msrb.mxu3 %v4092_v19  ;;  %1009 = vmatpush.msrb.mxu0 %v4141_v20  ;;  %v5052_v18 = vld [vmem:[%s4759_s10 + $0x80] sm:$0xff]  ;;  %v4191_v20 = vld [vmem:[%s6719_s1 + $0x2c8] sm:$0xff] }
  0x4e   : > { %362 = vmatmul.f32.gmra.mxu0 %v4867_v0  ;;  %622 = vmatpush.msrb.mxu2 %v4043_v25  ;;  %v4038_v19 = vld [vmem:[%s6719_s1 + $0x100] sm:$0xff]  ;;  %v5130_v4 = vld [vmem:[%s4759_s10 + $0xa8] sm:$0xff] }
  0x4f   : > { %410 = vmatmul.f32.gmra.mxu2 %v4870_v1  ;;  %523 = vmatmul.f32.gmra.mxu3 %v4873_v2  ;;  %v4190_v25 = vld [vmem:[%s6719_s1 + $0x2c0] sm:$0xff] }
  0x50   : > { %817 = vmatpush.msrb.mxu3 %v4091_v26  ;;  %1010 = vmatpush.msrb.mxu0 %v4140_v27  ;;  %v5071_v26 = vld [vmem:[%s4759_s10 + $0x91] sm:$0xff]  ;;  %v4134_v27 = vld [vmem:[%s6719_s1 + $0x200] sm:$0xff] }
  0x51   : > { %623 = vmatpush.msrb.mxu2 %v4042_v32  ;;  %v4189_v32 = vld [vmem:[%s6719_s1 + $0x2b8] sm:$0xff] }
  0x52   : > { %475 = vmatmul.f32.gmra.mxu1 %v4879_v3  ;;  %818 = vmatpush.msrb.mxu3 %v4090_v35  ;;  %v5083_v35 = vld [vmem:[%s4759_s10 + $0x90] sm:$0xff] }
  0x53   : > { %1011 = vmatpush.msrb.mxu0 %v4139_v36  ;;  %624 = vmatpush.msrb.mxu2 %v4041_v41  ;;  %v4245_v36 = vld [vmem:[%s6719_s1 + $0x378] sm:$0xff]  ;;  %v4187_v41 = vld [vmem:[%s6719_s1 + $0x2a8] sm:$0xff] }
  0x54   : > { %819 = vmatpush.msrb.mxu3 %v4089_v42  ;;  %v5099_v42 = vld [vmem:[%s4759_s10 + $0x99] sm:$0xff] }
  0x55   : > { %1012 = vmatpush.msrb.mxu0 %v4138_v43  ;;  %625 = vmatpush.msrb.mxu2 %v4040_v50  ;;  %v317_v43 = vld [vmem:[%s4759_s10 + $0x159] sm:$0xff] }
  0x56   : > { %365 = vmatmul.f32.gmra.mxu0 %v4892_v7  ;;  %820 = vmatpush.msrb.mxu3 %v4088_v51  ;;  %v5108_v50 = vld [vmem:[%s4759_s10 + $0x98] sm:$0xff] }
  0x57   : > { %413 = vmatmul.f32.gmra.mxu2 %v308_v8  ;;  %526 = vmatmul.f32.gmra.mxu3 %v4896_v9  ;;  %v4194_v8 = vld [vmem:[%s6719_s1 + $0x2e0] sm:$0xff]  ;;  %v4341_v51 = vld [vmem:[%s6719_s1 + $0x478] sm:$0xff] }
  0x58   : > { %1013 = vmatpush.msrb.mxu0 %v4137_v52  ;;  %626 = vmatpush.msrb.mxu2 %v4039_v63  ;;  %v4185_v52 = vld [vmem:[%s6719_s1 + $0x298] sm:$0xff]  ;;  %v4183_v63 = vld [vmem:[%s6719_s1 + $0x288] sm:$0xff] }
  0x59   : > { %821 = vmatpush.msrb.mxu3 %v4087_v5  ;;  %1198 = vmatpush.msrb.mxu1 %v4194_v8  ;;  %v4244_v5 = vld [vmem:[%s6719_s1 + $0x370] sm:$0xff]  ;;  %v4182_v8 = vld [vmem:[%s6719_s1 + $0x280] sm:$0xff] }
  0x5a   : > { %478 = vmatmul.f32.gmra.mxu1 %v4901_v10  ;;  %1014 = vmatpush.msrb.mxu0 %v4136_v6  ;;  %v4292_v6 = vld [vmem:[%s6719_s1 + $0x3f0] sm:$0xff] }
  0x5b   : > { %1199 = vmatpush.msrb.mxu1 %v4193_v11  ;;  %627 = vmatpush.msrb.mxu2 %v4038_v19  ;;  %v5143_v11 = vld [vmem:[%s4759_s10 + $0xb1] sm:$0xff] }
  0x5c   : > { %v4340_v19 = vld [vmem:[%s6719_s1 + $0x470] sm:$0xff] }
  0x5d   : > { %1390 = vmatpush.msra.mxu2 %v4245_v36  ;;  %v564_v36 = vld [vmem:[%s4759_s10 + $0xa] sm:$0xff] }
  0x5e   : > { %368 = vmatmul.f32.gmra.mxu0 %v4914_v14 }
  0x5f   : > { %416 = vmatmul.f32.gmra.mxu2 %v309_v15  ;;  %529 = vmatmul.f32.gmra.mxu3 %v261_v16  ;;  %v267_v15 = vld [vmem:[%s4759_s10 + $0x140] sm:$0xff]  ;;  %v4192_v16 = vld [vmem:[%s6719_s1 + $0x2d0] sm:$0xff] }
  0x60   : > { %1200 = vmatpush.msrb.mxu1 %v4192_v16  ;;  %1391 = vmatpush.msra.mxu2 %v4244_v5  ;;  %v5149_v16 = vld [vmem:[%s4759_s10 + $0xb0] sm:$0xff]  ;;  %v4153_v5 = vld [vmem:[%s4759_s10 + $0x3a] sm:$0xff] }
  0x62   : > { %481 = vmatmul.f32.gmra.mxu1 %v4920_v17 }
  0x63   : > { %1201 = vmatpush.msrb.mxu1 %v4191_v20 }
  0x65   : > { %1202 = vmatpush.msrb.mxu1 %v4190_v25  ;;  %v4150_v25 = vld [vmem:[%s4759_s10 + $0x1a] sm:$0xff] }
  0x66   : > { %371 = vmatmul.f32.gmra.mxu0 %v4933_v21 }
  0x67   : > { %419 = vmatmul.f32.gmra.mxu2 %v310_v22  ;;  %532 = vmatmul.f32.gmra.mxu3 %v262_v23  ;;  %v4086_v22 = vld [vmem:[%s6719_s1 + $0x180] sm:$0xff]  ;;  %v4135_v23 = vld [vmem:[%s6719_s1 + $0x208] sm:$0xff] }
  0x68   : > { %822 = vmatpush.msrb.mxu3 %v4086_v22  ;;  %1015 = vmatpush.msrb.mxu0 %v4135_v23  ;;  %v563_v22 = vld [vmem:[%s4759_s10 + $0x2] sm:$0xff] }
  0x69   : > { %1203 = vmatpush.msrb.mxu1 %v4189_v32 }
  0x6a   : > { %484 = vmatmul.f32.gmra.mxu1 %v4939_v24  ;;  %1016 = vmatpush.msrb.mxu0 %v4134_v27  ;;  %v4243_v27 = vld [vmem:[%s6719_s1 + $0x368] sm:$0xff] }
  0x6b   : > { %1392 = vmatpush.msra.mxu2 %v4243_v27 }
  0x6c   : > { %1778 = vmatpush.msra.mxu0 %v4341_v51 }
  0x6e   : > { %374 = vmatmul.f32.gmra.mxu0 %v4952_v28 }
  0x6f   : > { %422 = vmatmul.f32.gmra.mxu2 %v311_v29  ;;  %535 = vmatmul.f32.gmra.mxu3 %v263_v30  ;;  %v316_v29 = vld [vmem:[%s4759_s10 + $0x151] sm:$0xff] }
  0x70   : > { %v268_v30 = vld [vmem:[%s4759_s10 + $0x150] sm:$0xff]  ;;  %1779 = vmatpush.msra.mxu0 %v4340_v19 }
  0x72   : > { %487 = vmatmul.f32.gmra.mxu1 %v4958_v31 }
  0x76   : > { %377 = vmatmul.f32.gmra.mxu0 %v4971_v37 }
  0x77   : > { %425 = vmatmul.f32.gmra.mxu2 %v312_v38  ;;  %538 = vmatmul.f32.gmra.mxu3 %v264_v39  ;;  %v4188_v38 = vld [vmem:[%s6719_s1 + $0x2b0] sm:$0xff]  ;;  %v4293_v39 = vld [vmem:[%s6719_s1 + $0x3f8] sm:$0xff] }
  0x78   : > { %1584 = vmatpush.msra.mxu3 %v4293_v39  ;;  %1204 = vmatpush.msrb.mxu1 %v4188_v38  ;;  %v4151_v39 = vld [vmem:[%s4759_s10 + $0x22] sm:$0xff] }
  0x7a   : > { %490 = vmatmul.f32.gmra.mxu1 %v4977_v40  ;;  %1585 = vmatpush.msra.mxu3 %v4292_v6  ;;  %v4338_v6 = vld [vmem:[%s6719_s1 + $0x460] sm:$0xff] }
  0x7b   : > { %1205 = vmatpush.msrb.mxu1 %v4187_v41  ;;  %v4339_v41 = vld [vmem:[%s6719_s1 + $0x468] sm:$0xff] }
  0x7c   : > { %1780 = vmatpush.msra.mxu0 %v4339_v41 }
  0x7e   : > { %380 = vmatmul.f32.gmra.mxu0 %v4990_v44 }
  0x7f   : > { %428 = vmatmul.f32.gmra.mxu2 %v313_v45  ;;  %541 = vmatmul.f32.gmra.mxu3 %v265_v46  ;;  %v269_v45 = vld [vmem:[%s4759_s10 + $0x158] sm:$0xff]  ;;  %v4186_v46 = vld [vmem:[%s6719_s1 + $0x2a0] sm:$0xff] }
  0x80   : > { %1206 = vmatpush.msrb.mxu1 %v4186_v46  ;;  %1781 = vmatpush.msra.mxu0 %v4338_v6  ;;  %v4336_v6 = vld [vmem:[%s6719_s1 + $0x450] sm:$0xff] }
  0x82   : > { %493 = vmatmul.f32.gmra.mxu1 %v4996_v49 }
  0x83   : > { %1207 = vmatpush.msrb.mxu1 %v4185_v52  ;;  %v4242_v52 = vld [vmem:[%s6719_s1 + $0x360] sm:$0xff] }
  0x84   : > { %1393 = vmatpush.msra.mxu2 %v4242_v52  ;;  %v4288_v52 = vld [vmem:[%s6719_s1 + $0x3d0] sm:$0xff] }
  0x85   : > { %1208 = vmatpush.msrb.mxu1 %v4184_v53  ;;  %v4290_v53 = vld [vmem:[%s6719_s1 + $0x3e0] sm:$0xff] }
  0x86   : > { %383 = vmatmul.f32.gmra.mxu0 %v5015_v55 }
  0x87   : > { %431 = vmatmul.f32.gmra.mxu2 %v314_v56  ;;  %544 = vmatmul.f32.gmra.mxu3 %v266_v61  ;;  %v318_v56 = vld [vmem:[%s4759_s10 + $0x169] sm:$0xff] }
  0x88   : > { %v270_v61 = vld [vmem:[%s4759_s10 + $0x168] sm:$0xff]  ;;  %1209 = vmatpush.msrb.mxu1 %v4183_v63 }
  0x8a   : > { %496 = vmatmul.f32.gmra.mxu1 %v5021_v62 }
  0x8b   : > { %1210 = vmatpush.msrb.mxu1 %v4182_v8 }
  0x8e   : > { %386 = vmatmul.f32.gmra.mxu0 %v5043_v12 }
  0x8f   : > { %434 = vmatmul.f32.gmra.mxu2 %v315_v13  ;;  %547 = vmatmul.f32.gmra.mxu3 %v267_v15  ;;  %v319_v13 = vld [vmem:[%s4759_s10 + $0x171] sm:$0xff] }
  0x90   : > { %v271_v15 = vld [vmem:[%s4759_s10 + $0x170] sm:$0xff] }
  0x92   : > { %499 = vmatmul.f32.gmra.mxu1 %v5052_v18 }
  0x96   : > { %389 = vmatmul.f32.gmra.mxu0 %v5071_v26 }
  0x97   : > { %437 = vmatmul.f32.gmra.mxu2 %v316_v29  ;;  %550 = vmatmul.f32.gmra.mxu3 %v268_v30  ;;  %v4291_v29 = vld [vmem:[%s6719_s1 + $0x3e8] sm:$0xff] }
  0x98   : > { %1586 = vmatpush.msra.mxu3 %v4291_v29 }
  0x9a   : > { %502 = vmatmul.f32.gmra.mxu1 %v5083_v35  ;;  %1587 = vmatpush.msra.mxu3 %v4290_v53 }
  0x9e   : > { %392 = vmatmul.f32.gmra.mxu0 %v5099_v42 }
  0x9f   : > { %440 = vmatmul.f32.gmra.mxu2 %v317_v43  ;;  %553 = vmatmul.f32.gmra.mxu3 %v269_v45 }
  0xa2   : > { %505 = vmatmul.f32.gmra.mxu1 %v5108_v50 }
  0xa6   : > { %395 = vmatmul.f32.gmra.mxu0 %v5121_v54 }
  0xa7   : > { %443 = vmatmul.f32.gmra.mxu2 %v318_v56  ;;  %556 = vmatmul.f32.gmra.mxu3 %v270_v61 }
  0xaa   : > { %508 = vmatmul.f32.gmra.mxu1 %v5130_v4 }
  0xae   : > { %398 = vmatmul.f32.gmra.mxu0 %v5143_v11 }
  0xaf   : > { %446 = vmatmul.f32.gmra.mxu2 %v319_v13  ;;  %559 = vmatmul.f32.gmra.mxu3 %v271_v15 }
  0xb2   : > { %511 = vmatmul.f32.gmra.mxu1 %v5149_v16 }
  0xb3   : > { %v5155_v20 = vpop.f32.mrf.mxu0 }
  0xb6   : > { %1017 = vmatmul.f32.vlgmr.msrb.gmra.mxu0 %v4842_v57 }
  0xb7   : > { %628 = vmatmul.f32.vlgmr.msrb.gmra.mxu2 %v563_v22  ;;  %823 = vmatmul.f32.vlgmr.msrb.gmra.mxu3 %v4854_v60  ;;  %v5160_v23 = vpop.f32.mrf.mxu1  ;;  %v4241_v22 = vld [vmem:[%s6719_s1 + $0x358] sm:$0xff] }
  0xb8   : > { %1394 = vmatpush.msra.mxu2 %v4241_v22 }
  0xba   : > { %v402_v30 = vpop.f32.mrf.mxu2  ;;  %v515_v32 = vpop.f32.mrf.mxu3  ;;  %1211 = vmatmul.f32.vlgmr.msrb.gmra.mxu1 %v4150_v25 }
  0xbb   : > { %v5169_v57 = vadd.f32 %v515_v32, %v402_v30  ;;  %v5171_v60 = vpop.f32.mrf.mxu0  ;;  %v4155_v32 = vld [vmem:[%s4759_s10 + $0x52] sm:$0xff] }
  0xbe   : > { %1020 = vmatmul.f32.gmra.mxu0 %v4867_v0 }
  0xbf   : > { %631 = vmatmul.f32.gmra.mxu2 %v564_v36  ;;  %826 = vmatmul.f32.gmra.mxu3 %v4879_v3  ;;  %v5176_v38 = vpop.f32.mrf.mxu1  ;;  %v4152_v3 = vld [vmem:[%s4759_s10 + $0x32] sm:$0xff] }
  0xc0   : > { %v4337_v36 = vld [vmem:[%s6719_s1 + $0x458] sm:$0xff] }
  0xc1   : > { %1782 = vmatpush.msra.mxu0 %v4337_v36 }
  0xc2   : > { %v405_v43 = vpop.f32.mrf.mxu2  ;;  %v518_v45 = vpop.f32.mrf.mxu3  ;;  %1214 = vmatmul.f32.gmra.mxu1 %v4151_v39 }
  0xc3   : > { %v5182_v46 = vadd.f32 %v518_v45, %v405_v43  ;;  %v5184_v51 = vpop.f32.mrf.mxu0  ;;  %1783 = vmatpush.msra.mxu0 %v4336_v6 }
  0xc6   : > { %1023 = vmatmul.f32.gmra.mxu0 %v4892_v7 }
  0xc7   : > { %634 = vmatmul.f32.gmra.mxu2 %v4150_v25  ;;  %829 = vmatmul.f32.gmra.mxu3 %v4901_v10  ;;  %v5188_v0 = vpop.f32.mrf.mxu1  ;;  %v4289_v25 = vld [vmem:[%s6719_s1 + $0x3d8] sm:$0xff] }
  0xc8   : > { %1588 = vmatpush.msra.mxu3 %v4289_v25  ;;  %v4239_v25 = vld [vmem:[%s6719_s1 + $0x348] sm:$0xff] }
  0xca   : > { %v408_v56 = vpop.f32.mrf.mxu2  ;;  %v521_v61 = vpop.f32.mrf.mxu3  ;;  %1217 = vmatmul.f32.gmra.mxu1 %v4152_v3  ;;  %1589 = vmatpush.msra.mxu3 %v4288_v52 }
  0xcb   : > { %v5197_v7 = vadd.f32 %v521_v61, %v408_v56  ;;  %v5199_v10 = vpop.f32.mrf.mxu0 }
  0xce   : > { %1026 = vmatmul.f32.gmra.mxu0 %v4914_v14 }
  0xcf   : > { %637 = vmatmul.f32.gmra.mxu2 %v4151_v39  ;;  %832 = vmatmul.f32.gmra.mxu3 %v4920_v17  ;;  %v5203_v63 = vpop.f32.mrf.mxu1  ;;  %v4154_v17 = vld [vmem:[%s4759_s10 + $0x4a] sm:$0xff] }
  0xd2   : > { %v411_v8 = vpop.f32.mrf.mxu2  ;;  %v524_v13 = vpop.f32.mrf.mxu3  ;;  %1220 = vmatmul.f32.gmra.mxu1 %v4153_v5 }
  0xd3   : > { %v5209_v15 = vadd.f32 %v524_v13, %v411_v8  ;;  %v5211_v19 = vpop.f32.mrf.mxu0 }
  0xd6   : > { %1029 = vmatmul.f32.gmra.mxu0 %v4933_v21 }
  0xd7   : > { %640 = vmatmul.f32.gmra.mxu2 %v4152_v3  ;;  %835 = vmatmul.f32.gmra.mxu3 %v4939_v24  ;;  %v5215_v14 = vpop.f32.mrf.mxu1  ;;  %v4240_v3 = vld [vmem:[%s6719_s1 + $0x350] sm:$0xff] }
  0xd8   : > { %1395 = vmatpush.msra.mxu2 %v4240_v3 }
  0xda   : > { %v414_v27 = vpop.f32.mrf.mxu2  ;;  %v527_v29 = vpop.f32.mrf.mxu3  ;;  %1223 = vmatmul.f32.gmra.mxu1 %v4154_v17  ;;  %1396 = vmatpush.msra.mxu2 %v4239_v25  ;;  %v4334_v25 = vld [vmem:[%s6719_s1 + $0x440] sm:$0xff] }
  0xdb   : > { %v5224_v21 = vadd.f32 %v527_v29, %v414_v27  ;;  %v5226_v24 = vpop.f32.mrf.mxu0  ;;  %v4287_v27 = vld [vmem:[%s6719_s1 + $0x3c8] sm:$0xff] }
  0xdc   : > { %1590 = vmatpush.msra.mxu3 %v4287_v27 }
  0xde   : > { %1032 = vmatmul.f32.gmra.mxu0 %v4952_v28 }
  0xdf   : > { %643 = vmatmul.f32.gmra.mxu2 %v4153_v5  ;;  %838 = vmatmul.f32.gmra.mxu3 %v4958_v31  ;;  %v5230_v30 = vpop.f32.mrf.mxu1  ;;  %v4156_v31 = vld [vmem:[%s4759_s10 + $0x62] sm:$0xff]  ;;  %v4157_v5 = vld [vmem:[%s4759_s10 + $0x6a] sm:$0xff] }
  0xe2   : > { %v417_v39 = vpop.f32.mrf.mxu2  ;;  %v530_v41 = vpop.f32.mrf.mxu3  ;;  %1226 = vmatmul.f32.gmra.mxu1 %v4155_v32 }
  0xe3   : > { %v5236_v43 = vadd.f32 %v530_v41, %v417_v39  ;;  %v5238_v45 = vpop.f32.mrf.mxu0  ;;  %v4159_v39 = vld [vmem:[%s4759_s10 + $0x82] sm:$0xff] }
  0xe4   : > { %v4335_v41 = vld [vmem:[%s6719_s1 + $0x448] sm:$0xff] }
  0xe5   : > { %1784 = vmatpush.msra.mxu0 %v4335_v41 }
  0xe6   : > { %1035 = vmatmul.f32.gmra.mxu0 %v4971_v37 }
  0xe7   : > { %646 = vmatmul.f32.gmra.mxu2 %v4154_v17  ;;  %841 = vmatmul.f32.gmra.mxu3 %v4977_v40  ;;  %v5242_v28 = vpop.f32.mrf.mxu1 }
  0xe8   : > { %1785 = vmatpush.msra.mxu0 %v4334_v25 }
  0xea   : > { %v420_v53 = vpop.f32.mrf.mxu2  ;;  %v533_v56 = vpop.f32.mrf.mxu3  ;;  %1229 = vmatmul.f32.gmra.mxu1 %v4156_v31 }
  0xeb   : > { %v5251_v37 = vadd.f32 %v533_v56, %v420_v53  ;;  %v5253_v40 = vpop.f32.mrf.mxu0  ;;  %v4238_v56 = vld [vmem:[%s6719_s1 + $0x340] sm:$0xff] }
  0xec   : > { %1397 = vmatpush.msra.mxu2 %v4238_v56  ;;  %v2174_v56 = vld [vmem:[#allocation3 + $0xf8] sm:$0xff] }
  0xed   : > { %2175 = vmatpush.msra.mxu1 %v2174_v56  ;;  %v2173_v56 = vld [vmem:[#allocation3 + $0xf0] sm:$0xff] }
  0xee   : > { %1038 = vmatmul.f32.gmra.mxu0 %v4990_v44 }
  0xef   : > { %649 = vmatmul.f32.gmra.mxu2 %v4155_v32  ;;  %844 = vmatmul.f32.gmra.mxu3 %v4996_v49  ;;  %v5257_v61 = vpop.f32.mrf.mxu1  ;;  %v4158_v49 = vld [vmem:[%s4759_s10 + $0x7a] sm:$0xff] }
  0xf0   : > { %2176 = vmatpush.msra.mxu1 %v2173_v56  ;;  %v4235_v56 = vld [vmem:[%s6719_s1 + $0x328] sm:$0xff] }
  0xf2   : > { %v423_v8 = vpop.f32.mrf.mxu2  ;;  %v536_v13 = vpop.f32.mrf.mxu3  ;;  %1232 = vmatmul.f32.gmra.mxu1 %v4157_v5 }
  0xf3   : > { %v5263_v17 = vadd.f32 %v536_v13, %v423_v8  ;;  %v5265_v22 = vpop.f32.mrf.mxu0 }
  0xf6   : > { %1041 = vmatmul.f32.gmra.mxu0 %v5015_v55 }
  0xf7   : > { %652 = vmatmul.f32.gmra.mxu2 %v4156_v31  ;;  %847 = vmatmul.f32.gmra.mxu3 %v5021_v62  ;;  %v5269_v44 = vpop.f32.mrf.mxu1 }
  0xfa   : > { %v426_v29 = vpop.f32.mrf.mxu2  ;;  %v539_v32 = vpop.f32.mrf.mxu3  ;;  %1235 = vmatmul.f32.gmra.mxu1 %v4158_v49 }
  0xfb   : > { %v5278_v55 = vadd.f32 %v539_v32, %v426_v29  ;;  %v5280_v62 = vpop.f32.mrf.mxu0 }
  0xfe   : > { %1044 = vmatmul.f32.gmra.mxu0 %v5043_v12 }
  0xff   : > { %655 = vmatmul.f32.gmra.mxu2 %v4157_v5  ;;  %850 = vmatmul.f32.gmra.mxu3 %v5052_v18  ;;  %v5284_v36 = vpop.f32.mrf.mxu1  ;;  %v4160_v18 = vld [vmem:[%s4759_s10 + $0x92] sm:$0xff]  ;;  %v4286_v5 = vld [vmem:[%s6719_s1 + $0x3c0] sm:$0xff] }
 0x100   : > { %1591 = vmatpush.msra.mxu3 %v4286_v5 }
 0x102   : > { %v429_v31 = vpop.f32.mrf.mxu2  ;;  %v542_v3 = vpop.f32.mrf.mxu3  ;;  %1238 = vmatmul.f32.gmra.mxu1 %v4159_v39 }
 0x103   : > { %v5290_v52 = vadd.f32 %v542_v3, %v429_v31  ;;  %v5292_v53 = vpop.f32.mrf.mxu0  ;;  %v4285_v31 = vld [vmem:[%s6719_s1 + $0x3b8] sm:$0xff] }
 0x104   : > { %1592 = vmatpush.msra.mxu3 %v4285_v31  ;;  %v4284_v31 = vld [vmem:[%s6719_s1 + $0x3b0] sm:$0xff] }
 0x106   : > { %1047 = vmatmul.f32.gmra.mxu0 %v5071_v26  ;;  %1593 = vmatpush.msra.mxu3 %v4284_v31 }
 0x107   : > { %658 = vmatmul.f32.gmra.mxu2 %v4158_v49  ;;  %853 = vmatmul.f32.gmra.mxu3 %v5083_v35  ;;  %v5296_v12 = vpop.f32.mrf.mxu1  ;;  %v4161_v49 = vld [vmem:[%s4759_s10 + $0x9a] sm:$0xff] }
 0x10a   : > { %v432_v6 = vpop.f32.mrf.mxu2  ;;  %v545_v8 = vpop.f32.mrf.mxu3  ;;  %1241 = vmatmul.f32.gmra.mxu1 %v4160_v18 }
 0x10b   : > { %v5305_v26 = vadd.f32 %v545_v8, %v432_v6  ;;  %v5307_v35 = vpop.f32.mrf.mxu0  ;;  %v5344_v6 = vld [vmem:[%s4759_s10 + $0xb2] sm:$0xff] }
 0x10c   : > { %v4333_v8 = vld [vmem:[%s6719_s1 + $0x438] sm:$0xff] }
 0x10d   : > { %1786 = vmatpush.msra.mxu0 %v4333_v8 }
 0x10e   : > { %1050 = vmatmul.f32.gmra.mxu0 %v5099_v42 }
 0x10f   : > { %661 = vmatmul.f32.gmra.mxu2 %v4159_v39  ;;  %856 = vmatmul.f32.gmra.mxu3 %v5108_v50  ;;  %v5311_v13 = vpop.f32.mrf.mxu1  ;;  %v5326_v50 = vld [vmem:[%s4759_s10 + $0xaa] sm:$0xff]  ;;  %v4237_v39 = vld [vmem:[%s6719_s1 + $0x338] sm:$0xff] }
 0x110   : > { %1398 = vmatpush.msra.mxu2 %v4237_v39  ;;  %v4236_v39 = vld [vmem:[%s6719_s1 + $0x330] sm:$0xff] }
 0x112   : > { %v435_v27 = vpop.f32.mrf.mxu2  ;;  %v548_v29 = vpop.f32.mrf.mxu3  ;;  %1244 = vmatmul.f32.gmra.mxu1 %v4161_v49  ;;  %1399 = vmatpush.msra.mxu2 %v4236_v39 }
 0x113   : > { %v5317_v32 = vadd.f32 %v548_v29, %v435_v27  ;;  %v5319_v41 = vpop.f32.mrf.mxu0 }
 0x114   : > { %1400 = vmatpush.msra.mxu2 %v4235_v56  ;;  %v4167_v56 = vld [vmem:[%s4759_s10 + $0xe2] sm:$0xff] }
 0x116   : > { %1053 = vmatmul.f32.gmra.mxu0 %v5121_v54 }
 0x117   : > { %664 = vmatmul.f32.gmra.mxu2 %v4160_v18  ;;  %859 = vmatmul.f32.gmra.mxu3 %v5130_v4  ;;  %v5323_v42 = vpop.f32.mrf.mxu1 }
 0x11a   : > { %v438_v3 = vpop.f32.mrf.mxu2  ;;  %v551_v54 = vpop.f32.mrf.mxu3  ;;  %1247 = vmatmul.f32.gmra.mxu1 %v5326_v50 }
 0x11b   : > { %v5335_v4 = vadd.f32 %v551_v54, %v438_v3  ;;  %v5337_v18 = vpop.f32.mrf.mxu0 }
 0x11d   : > { %6729 = vst [vmem:[#allocation9_spill] sm:$0xff] %v5335_v4  ;;  %v471_v4 = vadd.f32 %v5176_v38, %v5171_v60 }
 0x11e   : > { %1056 = vmatmul.f32.gmra.mxu0 %v5143_v11 }
 0x11f   : > { %667 = vmatmul.f32.gmra.mxu2 %v4161_v49  ;;  %862 = vmatmul.f32.gmra.mxu3 %v5149_v16  ;;  %v5341_v5 = vpop.f32.mrf.mxu1  ;;  %v5360_v49 = vld [vmem:[%s4759_s10 + $0xc2] sm:$0xff] }
 0x122   : > { %v441_v25 = vpop.f32.mrf.mxu2  ;;  %v554_v27 = vpop.f32.mrf.mxu3  ;;  %1250 = vmatmul.f32.gmra.mxu1 %v5344_v6 }
 0x123   : > { %v5350_v29 = vadd.f32 %v554_v27, %v441_v25  ;;  %v5352_v11 = vpop.f32.mrf.mxu0  ;;  %v5379_v25 = vld [vmem:[%s4759_s10 + $0xca] sm:$0xff] }
 0x124   : > { %v4332_v27 = vld [vmem:[%s6719_s1 + $0x430] sm:$0xff] }
 0x125   : > { %6730 = vst [vmem:[#allocation10_spill] sm:$0xff] %v5350_v29  ;;  %1787 = vmatpush.msra.mxu0 %v4332_v27  ;;  %v468_v27 = vadd.f32 %v5160_v23, %v5155_v20  ;;  %v2172_v29 = vld [vmem:[#allocation3 + $0xe8] sm:$0xff] }
 0x126   : > { %1059 = vmatmul.f32.gmra.mxu0 %v4772_v33  ;;  %2177 = vmatpush.msra.mxu1 %v2172_v29 }
 0x127   : > { %670 = vmatmul.f32.gmra.mxu2 %v5326_v50  ;;  %865 = vmatmul.f32.gmra.mxu3 %v4775_v34  ;;  %v5357_v16 = vpop.f32.mrf.mxu1 }
 0x12a   : > { %v444_v3 = vpop.f32.mrf.mxu2  ;;  %v557_v33 = vpop.f32.mrf.mxu3  ;;  %1253 = vmatmul.f32.gmra.mxu1 %v5360_v49 }
 0x12b   : > { %v5369_v34 = vadd.f32 %v557_v33, %v444_v3  ;;  %v5371_v54 = vpop.f32.mrf.mxu0  ;;  %v5391_v33 = vld [vmem:[%s4759_s10 + $0xda] sm:$0xff] }
 0x12d   : > { %6731 = vst [vmem:[#allocation11_spill] sm:$0xff] %v5369_v34 }
 0x12e   : > { %1062 = vmatmul.f32.gmra.mxu0 %v4812_v47 }
 0x12f   : > { %673 = vmatmul.f32.gmra.mxu2 %v5344_v6  ;;  %868 = vmatmul.f32.gmra.mxu3 %v4815_v48  ;;  %v5376_v8 = vpop.f32.mrf.mxu1 }
 0x132   : > { %v447_v39 = vpop.f32.mrf.mxu2  ;;  %v560_v31 = vpop.f32.mrf.mxu3  ;;  %1256 = vmatmul.f32.gmra.mxu1 %v5379_v25 }
 0x133   : > { %v5385_v47 = vadd.f32 %v560_v31, %v447_v39  ;;  %v1018_v3 = vpop.f32.mrf.mxu0 }
 0x135   : > { %6732 = vst [vmem:[#allocation12_spill] sm:$0xff] %v5385_v47 }
 0x136   : > { %1065 = vmatmul.f32.gmra.mxu0 %v4845_v58  ;;  %v4283_v58 = vld [vmem:[%s6719_s1 + $0x3a8] sm:$0xff] }
 0x137   : > { %676 = vmatmul.f32.gmra.mxu2 %v5360_v49  ;;  %871 = vmatmul.f32.gmra.mxu3 %v4848_v59  ;;  %v1212_v48 = vpop.f32.mrf.mxu1 }
 0x138   : > { %1594 = vmatpush.msra.mxu3 %v4283_v58 }
 0x13a   : > { %v629_v39 = vpop.f32.mrf.mxu2  ;;  %v824_v31 = vpop.f32.mrf.mxu3  ;;  %1259 = vmatmul.f32.gmra.mxu1 %v5391_v33 }
 0x13b   : > { %v725_v59 = vadd.f32 %v629_v39, %v468_v27  ;;  %v1021_v47 = vpop.f32.mrf.mxu0  ;;  %v4331_v27 = vld [vmem:[%s6719_s1 + $0x428] sm:$0xff] }
 0x13c   : > { %1788 = vmatpush.msra.mxu0 %v4331_v27 }
 0x13d   : > { %v920_v34 = vadd.f32 %v824_v31, %v725_v59 }
 0x13e   : > { %1068 = vmatmul.f32.gmra.mxu0 %v4870_v1 }
 0x13f   : > { %679 = vmatmul.f32.gmra.mxu2 %v5379_v25  ;;  %874 = vmatmul.f32.gmra.mxu3 %v4873_v2  ;;  %v1114_v20 = vadd.f32 %v1018_v3, %v920_v34  ;;  %v1215_v23 = vpop.f32.mrf.mxu1  ;;  %v4120_v2 = vld [vmem:[%s4759_s10 + $0xf1] sm:$0xff] }
 0x140   : > { %v4168_v3 = vld [vmem:[%s4759_s10 + $0xf2] sm:$0xff] }
 0x141   : > { %v5408_v58 = vadd.f32 %v1212_v48, %v1114_v20  ;;  %v4234_v48 = vld [vmem:[%s6719_s1 + $0x320] sm:$0xff] }
 0x142   : > { %v632_v1 = vpop.f32.mrf.mxu2  ;;  %v827_v39 = vpop.f32.mrf.mxu3  ;;  %1262 = vmatmul.f32.gmra.mxu1 %v4167_v56  ;;  %1401 = vmatpush.msra.mxu2 %v4234_v48  ;;  %v4282_v20 = vld [vmem:[%s6719_s1 + $0x3a0] sm:$0xff] }
 0x143   : > { %v726_v29 = vadd.f32 %v632_v1, %v471_v4  ;;  %v1024_v31 = vpop.f32.mrf.mxu0  ;;  %v474_v4 = vadd.f32 %v5188_v0, %v5184_v51  ;;  %1595 = vmatpush.msra.mxu3 %v4282_v20 }
 0x145   : > { %v921_v34 = vadd.f32 %v827_v39, %v726_v29  ;;  %v4121_v39 = vld [vmem:[%s4759_s10 + $0xf9] sm:$0xff] }
 0x146   : > { %1071 = vmatmul.f32.gmra.mxu0 %v4120_v2  ;;  %v4073_v29 = vld [vmem:[%s4759_s10 + $0xf8] sm:$0xff] }
 0x147   : > { %682 = vmatmul.f32.gmra.mxu2 %v5391_v33  ;;  %877 = vmatmul.f32.gmra.mxu3 %v4896_v9  ;;  %v1115_v60 = vadd.f32 %v1021_v47, %v921_v34  ;;  %v1218_v38 = vpop.f32.mrf.mxu1  ;;  %v2171_v34 = vld [vmem:[#allocation3 + $0xe0] sm:$0xff] }
 0x148   : > { %2178 = vmatpush.msra.mxu1 %v2171_v34 }
 0x149   : > { %v5422_v59 = vadd.f32 %v1215_v23, %v1115_v60  ;;  %v4169_v23 = vld [vmem:[%s4759_s10 + $0xfa] sm:$0xff]  ;;  %v477_v60 = vadd.f32 %v5203_v63, %v5199_v10 }
 0x14a   : > { %v635_v27 = vpop.f32.mrf.mxu2  ;;  %v830_v9 = vpop.f32.mrf.mxu3  ;;  %1265 = vmatmul.f32.gmra.mxu1 %v4168_v3 }
 0x14b   : > { %v727_v47 = vadd.f32 %v635_v27, %v474_v4  ;;  %v1027_v1 = vpop.f32.mrf.mxu0  ;;  %v4330_v4 = vld [vmem:[%s6719_s1 + $0x420] sm:$0xff] }
 0x14c   : > { %1789 = vmatpush.msra.mxu0 %v4330_v4 }
 0x14d   : > { %v922_v2 = vadd.f32 %v830_v9, %v727_v47  ;;  %v4122_v47 = vld [vmem:[%s4759_s10 + $0x109] sm:$0xff] }
 0x14e   : > { %1074 = vmatmul.f32.gmra.mxu0 %v4121_v39 }
 0x14f   : > { %685 = vmatmul.f32.gmra.mxu2 %v4167_v56  ;;  %880 = vmatmul.f32.gmra.mxu3 %v4073_v29  ;;  %v1116_v51 = vadd.f32 %v1024_v31, %v922_v2  ;;  %v1221_v0 = vpop.f32.mrf.mxu1  ;;  %v4074_v31 = vld [vmem:[%s4759_s10 + $0x108] sm:$0xff]  ;;  %v4233_v29 = vld [vmem:[%s6719_s1 + $0x318] sm:$0xff]  ;;  %v480_v2 = vadd.f32 %v5215_v14, %v5211_v19 }
 0x150   : > { %1402 = vmatpush.msra.mxu2 %v4233_v29  ;;  %v4171_v14 = vld [vmem:[%s4759_s10 + $0x112] sm:$0xff] }
 0x151   : > { %v5432_v48 = vadd.f32 %v1218_v38, %v1116_v51  ;;  %v4170_v38 = vld [vmem:[%s4759_s10 + $0x10a] sm:$0xff] }
 0x152   : > { %v638_v20 = vpop.f32.mrf.mxu2  ;;  %v833_v27 = vpop.f32.mrf.mxu3  ;;  %1268 = vmatmul.f32.gmra.mxu1 %v4169_v23 }
 0x153   : > { %v728_v9 = vadd.f32 %v638_v20, %v477_v60  ;;  %v1030_v56 = vpop.f32.mrf.mxu0  ;;  %v4123_v20 = vld [vmem:[%s4759_s10 + $0x111] sm:$0xff] }
 0x155   : > { %v923_v39 = vadd.f32 %v833_v27, %v728_v9  ;;  %v4075_v27 = vld [vmem:[%s4759_s10 + $0x110] sm:$0xff] }
 0x156   : > { %1077 = vmatmul.f32.gmra.mxu0 %v4122_v47  ;;  %v2170_v47 = vld [vmem:[#allocation3 + $0xd8] sm:$0xff] }
 0x157   : > { %688 = vmatmul.f32.gmra.mxu2 %v4168_v3  ;;  %883 = vmatmul.f32.gmra.mxu3 %v4074_v31  ;;  %v1117_v10 = vadd.f32 %v1027_v1, %v923_v39  ;;  %v1224_v63 = vpop.f32.mrf.mxu1  ;;  %v4281_v3 = vld [vmem:[%s6719_s1 + $0x398] sm:$0xff] }
 0x158   : > { %1596 = vmatpush.msra.mxu3 %v4281_v3  ;;  %2179 = vmatpush.msra.mxu1 %v2170_v47 }
 0x159   : > { %v5445_v34 = vadd.f32 %v1221_v0, %v1117_v10  ;;  %v483_v0 = vadd.f32 %v5230_v30, %v5226_v24  ;;  %v4329_v10 = vld [vmem:[%s6719_s1 + $0x418] sm:$0xff]  ;;  %v4172_v30 = vld [vmem:[%s4759_s10 + $0x122] sm:$0xff] }
 0x15a   : > { %v641_v51 = vpop.f32.mrf.mxu2  ;;  %v836_v60 = vpop.f32.mrf.mxu3  ;;  %1271 = vmatmul.f32.gmra.mxu1 %v4170_v38  ;;  %1790 = vmatpush.msra.mxu0 %v4329_v10 }
 0x15b   : > { %v729_v1 = vadd.f32 %v641_v51, %v480_v2  ;;  %v1033_v4 = vpop.f32.mrf.mxu0  ;;  %v4124_v51 = vld [vmem:[%s4759_s10 + $0x121] sm:$0xff] }
 0x15d   : > { %v924_v9 = vadd.f32 %v836_v60, %v729_v1  ;;  %v486_v1 = vadd.f32 %v5242_v28, %v5238_v45  ;;  %v4173_v28 = vld [vmem:[%s4759_s10 + $0x12a] sm:$0xff] }
 0x15e   : > { %1080 = vmatmul.f32.gmra.mxu0 %v4123_v20 }
 0x15f   : > { %691 = vmatmul.f32.gmra.mxu2 %v4169_v23  ;;  %886 = vmatmul.f32.gmra.mxu3 %v4075_v27  ;;  %v1118_v19 = vadd.f32 %v1030_v56, %v924_v9  ;;  %v1227_v39 = vpop.f32.mrf.mxu1  ;;  %v4076_v56 = vld [vmem:[%s4759_s10 + $0x120] sm:$0xff]  ;;  %v4280_v27 = vld [vmem:[%s6719_s1 + $0x390] sm:$0xff] }
 0x160   : > { %1597 = vmatpush.msra.mxu3 %v4280_v27 }
 0x161   : > { %v5455_v31 = vadd.f32 %v1224_v63, %v1118_v19  ;;  %v4232_v63 = vld [vmem:[%s6719_s1 + $0x310] sm:$0xff] }
 0x162   : > { %v644_v29 = vpop.f32.mrf.mxu2  ;;  %v839_v2 = vpop.f32.mrf.mxu3  ;;  %1274 = vmatmul.f32.gmra.mxu1 %v4171_v14  ;;  %1403 = vmatpush.msra.mxu2 %v4232_v63  ;;  %v4125_v19 = vld [vmem:[%s4759_s10 + $0x129] sm:$0xff] }
 0x163   : > { %v730_v3 = vadd.f32 %v644_v29, %v483_v0  ;;  %v1036_v23 = vpop.f32.mrf.mxu0  ;;  %v4077_v0 = vld [vmem:[%s4759_s10 + $0x128] sm:$0xff] }
 0x165   : > { %v925_v60 = vadd.f32 %v839_v2, %v730_v3  ;;  %v2169_v2 = vld [vmem:[#allocation3 + $0xd0] sm:$0xff] }
 0x166   : > { %1083 = vmatmul.f32.gmra.mxu0 %v4124_v51  ;;  %2180 = vmatpush.msra.mxu1 %v2169_v2  ;;  %v4328_v51 = vld [vmem:[%s6719_s1 + $0x410] sm:$0xff]  ;;  %v4079_v2 = vld [vmem:[%s4759_s10 + $0x140] sm:$0xff] }
 0x167   : > { %694 = vmatmul.f32.gmra.mxu2 %v4170_v38  ;;  %889 = vmatmul.f32.gmra.mxu3 %v4076_v56  ;;  %v1119_v24 = vadd.f32 %v1033_v4, %v925_v60  ;;  %v1230_v10 = vpop.f32.mrf.mxu1 }
 0x168   : > { %1791 = vmatpush.msra.mxu0 %v4328_v51  ;;  %v495_v51 = vadd.f32 %v5284_v36, %v5280_v62  ;;  %v4176_v62 = vld [vmem:[%s4759_s10 + $0x152] sm:$0xff]  ;;  %v4230_v36 = vld [vmem:[%s6719_s1 + $0x300] sm:$0xff] }
 0x169   : > { %v5468_v20 = vadd.f32 %v1227_v39, %v1119_v24  ;;  %v489_v39 = vadd.f32 %v5257_v61, %v5253_v40  ;;  %v4174_v61 = vld [vmem:[%s4759_s10 + $0x13a] sm:$0xff] }
 0x16a   : > { %v647_v9 = vpop.f32.mrf.mxu2  ;;  %v842_v38 = vpop.f32.mrf.mxu3  ;;  %1277 = vmatmul.f32.gmra.mxu1 %v4172_v30 }
 0x16b   : > { %v731_v4 = vadd.f32 %v647_v9, %v486_v1  ;;  %v1039_v47 = vpop.f32.mrf.mxu0  ;;  %v4078_v1 = vld [vmem:[%s4759_s10 + $0x138] sm:$0xff]  ;;  %v4231_v9 = vld [vmem:[%s6719_s1 + $0x308] sm:$0xff] }
 0x16c   : > { %1404 = vmatpush.msra.mxu2 %v4231_v9  ;;  %v4278_v9 = vld [vmem:[%s6719_s1 + $0x380] sm:$0xff] }
 0x16d   : > { %v926_v29 = vadd.f32 %v842_v38, %v731_v4  ;;  %v492_v38 = vadd.f32 %v5269_v44, %v5265_v22  ;;  %v4175_v44 = vld [vmem:[%s4759_s10 + $0x142] sm:$0xff] }
 0x16e   : > { %1086 = vmatmul.f32.gmra.mxu0 %v4125_v19  ;;  %v4279_v19 = vld [vmem:[%s6719_s1 + $0x388] sm:$0xff]  ;;  %1405 = vmatpush.msra.mxu2 %v4230_v36 }
 0x16f   : > { %697 = vmatmul.f32.gmra.mxu2 %v4171_v14  ;;  %892 = vmatmul.f32.gmra.mxu3 %v4077_v0  ;;  %v1120_v45 = vadd.f32 %v1036_v23, %v926_v29  ;;  %v4126_v14 = vld [vmem:[%s4759_s10 + $0x139] sm:$0xff]  ;;  %v1233_v27 = vpop.f32.mrf.mxu1  ;;  %v4127_v29 = vld [vmem:[%s4759_s10 + $0x141] sm:$0xff] }
 0x170   : > { %1598 = vmatpush.msra.mxu3 %v4279_v19 }
 0x171   : > { %v5478_v3 = vadd.f32 %v1230_v10, %v1120_v45 }
 0x172   : > { %v650_v56 = vpop.f32.mrf.mxu2  ;;  %v845_v60 = vpop.f32.mrf.mxu3  ;;  %1280 = vmatmul.f32.gmra.mxu1 %v4173_v28  ;;  %1599 = vmatpush.msra.mxu3 %v4278_v9  ;;  %v4083_v9 = vld [vmem:[%s4759_s10 + $0x170] sm:$0xff] }
 0x173   : > { %v732_v24 = vadd.f32 %v650_v56, %v489_v39  ;;  %v1042_v63 = vpop.f32.mrf.mxu0  ;;  %v2168_v39 = vld [vmem:[#allocation3 + $0xc8] sm:$0xff]  ;;  %v4327_v56 = vld [vmem:[%s6719_s1 + $0x408] sm:$0xff] }
 0x174   : > { %2181 = vmatpush.msra.mxu1 %v2168_v39  ;;  %1792 = vmatpush.msra.mxu0 %v4327_v56 }
 0x175   : > { %v927_v23 = vadd.f32 %v845_v60, %v732_v24 }
 0x176   : > { %1089 = vmatmul.f32.gmra.mxu0 %v4126_v14 }
 0x177   : > { %700 = vmatmul.f32.gmra.mxu2 %v4172_v30  ;;  %895 = vmatmul.f32.gmra.mxu3 %v4078_v1  ;;  %v1121_v40 = vadd.f32 %v1039_v47, %v927_v23  ;;  %v4128_v23 = vld [vmem:[%s4759_s10 + $0x151] sm:$0xff] }
 0x179   : > { %v5491_v4 = vadd.f32 %v1233_v27, %v1121_v40  ;;  %v498_v40 = vadd.f32 %v5296_v12, %v5292_v53  ;;  %v4177_v12 = vld [vmem:[%s4759_s10 + $0x15a] sm:$0xff] }
 0x17a   : > { %v653_v30 = vpop.f32.mrf.mxu2  ;;  %v848_v0 = vpop.f32.mrf.mxu3  ;;  %1283 = vmatmul.f32.gmra.mxu1 %v4174_v61 }
 0x17b   : > { %v733_v47 = vadd.f32 %v653_v30, %v492_v38  ;;  %v1045_v10 = vpop.f32.mrf.mxu0 }
 0x17d   : > { %v928_v45 = vadd.f32 %v848_v0, %v733_v47  ;;  %v4129_v0 = vld [vmem:[%s4759_s10 + $0x159] sm:$0xff] }
 0x17e   : > { %1092 = vmatmul.f32.gmra.mxu0 %v4127_v29  ;;  %v4081_v47 = vld [vmem:[%s4759_s10 + $0x158] sm:$0xff]  ;;  %v2167_v29 = vld [vmem:[#allocation3 + $0xc0] sm:$0xff] }
 0x17f   : > { %703 = vmatmul.f32.gmra.mxu2 %v4173_v28  ;;  %898 = vmatmul.f32.gmra.mxu3 %v4079_v2  ;;  %v5498_v22 = vadd.f32 %v1042_v63, %v928_v45  ;;  %v4080_v28 = vld [vmem:[%s4759_s10 + $0x150] sm:$0xff]  ;;  %v501_v2 = vadd.f32 %v5311_v13, %v5307_v35  ;;  %v4326_v45 = vld [vmem:[%s6719_s1 + $0x400] sm:$0xff]  ;;  %v504_v13 = vadd.f32 %v5323_v42, %v5319_v41 }
 0x180   : > { %2182 = vmatpush.msra.mxu1 %v2167_v29  ;;  %1793 = vmatpush.msra.mxu0 %v4326_v45  ;;  %v4178_v35 = vld [vmem:[%s4759_s10 + $0x16a] sm:$0xff]  ;;  %v507_v41 = vadd.f32 %v5341_v5, %v5337_v18  ;;  %v4084_v29 = vld [vmem:[%s4759_s10 + $0x180] sm:$0xff]  ;;  %v510_v18 = vadd.f32 %v5357_v16, %v5352_v11  ;;  %v513_v11 = vadd.f32 %v5376_v8, %v5371_v54 }
 0x181   : > { %v4180_v45 = vld [vmem:[%s4759_s10 + $0x182] sm:$0xff] }
 0x182   : > { %v656_v60 = vpop.f32.mrf.mxu2  ;;  %v851_v24 = vpop.f32.mrf.mxu3  ;;  %1286 = vmatmul.f32.gmra.mxu1 %v4175_v44 }
 0x183   : > { %v734_v14 = vadd.f32 %v656_v60, %v495_v51  ;;  %v1048_v1 = vpop.f32.mrf.mxu0 }
 0x185   : > { %v929_v27 = vadd.f32 %v851_v24, %v734_v14  ;;  %v4082_v24 = vld [vmem:[%s4759_s10 + $0x168] sm:$0xff] }
 0x186   : > { %1095 = vmatmul.f32.gmra.mxu0 %v4128_v23 }
 0x187   : > { %706 = vmatmul.f32.gmra.mxu2 %v4174_v61  ;;  %901 = vmatmul.f32.gmra.mxu3 %v4080_v28  ;;  %v5508_v63 = vadd.f32 %v1045_v10, %v929_v27 }
 0x18a   : > { %v659_v38 = vpop.f32.mrf.mxu2  ;;  %v854_v19 = vpop.f32.mrf.mxu3  ;;  %1289 = vmatmul.f32.gmra.mxu1 %v4176_v62 }
 0x18b   : > { %v735_v61 = vadd.f32 %v659_v38, %v498_v40  ;;  %v1051_v30 = vpop.f32.mrf.mxu0  ;;  %v4131_v40 = vld [vmem:[%s4759_s10 + $0x171] sm:$0xff] }
 0x18d   : > { %v930_v10 = vadd.f32 %v854_v19, %v735_v61  ;;  %v2166_v19 = vld [vmem:[#allocation3 + $0xb8] sm:$0xff]  ;;  %v4179_v61 = vld [vmem:[%s4759_s10 + $0x172] sm:$0xff] }
 0x18e   : > { %1098 = vmatmul.f32.gmra.mxu0 %v4129_v0  ;;  %2183 = vmatpush.msra.mxu1 %v2166_v19 }
 0x18f   : > { %709 = vmatmul.f32.gmra.mxu2 %v4175_v44  ;;  %904 = vmatmul.f32.gmra.mxu3 %v4081_v47  ;;  %v5521_v53 = vadd.f32 %v1048_v1, %v930_v10  ;;  %v4130_v44 = vld [vmem:[%s4759_s10 + $0x169] sm:$0xff]  ;;  %v4132_v10 = vld [vmem:[%s4759_s10 + $0x181] sm:$0xff] }
 0x192   : > { %v662_v39 = vpop.f32.mrf.mxu2  ;;  %v857_v51 = vpop.f32.mrf.mxu3  ;;  %1292 = vmatmul.f32.gmra.mxu1 %v4177_v12 }
 0x193   : > { %v736_v56 = vadd.f32 %v662_v39, %v501_v2  ;;  %v1054_v60 = vpop.f32.mrf.mxu0 }
 0x195   : > { %v931_v14 = vadd.f32 %v857_v51, %v736_v56 }
 0x196   : > { %1101 = vmatmul.f32.gmra.mxu0 %v4130_v44  ;;  %v4085_v44 = vld [vmem:[%s4759_s10 + $0x188] sm:$0xff] }
 0x197   : > { %712 = vmatmul.f32.gmra.mxu2 %v4176_v62  ;;  %907 = vmatmul.f32.gmra.mxu3 %v4082_v24  ;;  %v5531_v1 = vadd.f32 %v1051_v30, %v931_v14  ;;  %v2165_v14 = vld [vmem:[#allocation3 + $0xb0] sm:$0xff] }
 0x198   : > { %2184 = vmatpush.msra.mxu1 %v2165_v14 }
 0x19a   : > { %v665_v23 = vpop.f32.mrf.mxu2  ;;  %v860_v28 = vpop.f32.mrf.mxu3  ;;  %1295 = vmatmul.f32.gmra.mxu1 %v4178_v35 }
 0x19b   : > { %v737_v27 = vadd.f32 %v665_v23, %v504_v13  ;;  %v1057_v36 = vpop.f32.mrf.mxu0  ;;  %v4181_v13 = vld [vmem:[%s4759_s10 + $0x18a] sm:$0xff] }
 0x19d   : > { %v932_v38 = vadd.f32 %v860_v28, %v737_v27 }
 0x19e   : > { %1104 = vmatmul.f32.gmra.mxu0 %v4131_v40  ;;  %v4198_v40 = vld [vmem:[%s4759_s10 + $0x30] sm:$0xff] }
 0x19f   : > { %715 = vmatmul.f32.gmra.mxu2 %v4177_v12  ;;  %910 = vmatmul.f32.gmra.mxu3 %v4083_v9  ;;  %v5538_v62 = vadd.f32 %v1054_v60, %v932_v38  ;;  %v4133_v60 = vld [vmem:[%s4759_s10 + $0x189] sm:$0xff]  ;;  %v4246_v9 = vld [vmem:[%s4759_s10 + $0x31] sm:$0xff] }
 0x1a2   : > { %v668_v42 = vpop.f32.mrf.mxu2  ;;  %v863_v30 = vpop.f32.mrf.mxu3  ;;  %1298 = vmatmul.f32.gmra.mxu1 %v4179_v61 }
 0x1a3   : > { %v738_v0 = vadd.f32 %v668_v42, %v507_v41  ;;  %v1060_v47 = vpop.f32.mrf.mxu0  ;;  %v4295_v42 = vld [vmem:[%s4759_s10 + $0x3a] sm:$0xff] }
 0x1a5   : > { %v933_v2 = vadd.f32 %v863_v30, %v738_v0  ;;  %v4199_v30 = vld [vmem:[%s4759_s10 + $0x38] sm:$0xff] }
 0x1a6   : > { %1107 = vmatmul.f32.gmra.mxu0 %v4132_v10  ;;  %v4247_v0 = vld [vmem:[%s4759_s10 + $0x39] sm:$0xff] }
 0x1a7   : > { %718 = vmatmul.f32.gmra.mxu2 %v4178_v35  ;;  %913 = vmatmul.f32.gmra.mxu3 %v4084_v29  ;;  %v5545_v12 = vadd.f32 %v1057_v36, %v933_v2  ;;  %v4294_v36 = vld [vmem:[%s4759_s10 + $0x32] sm:$0xff]  ;;  %v5568_v2 = vpop.f32.mrf.mxu1 }
 0x1a8   : > { %v2164_v10 = vld [vmem:[#allocation3 + $0xa8] sm:$0xff] }
 0x1a9   : > { %2185 = vmatpush.msra.mxu1 %v2164_v10 }
 0x1aa   : > { %v671_v5 = vpop.f32.mrf.mxu2  ;;  %v866_v39 = vpop.f32.mrf.mxu3  ;;  %1301 = vmatmul.f32.gmra.mxu1 %v4180_v45 }
 0x1ab   : > { %v739_v51 = vadd.f32 %v671_v5, %v510_v18  ;;  %v1063_v56 = vpop.f32.mrf.mxu0 }
 0x1ad   : > { %v934_v24 = vadd.f32 %v866_v39, %v739_v51  ;;  %v4296_v39 = vld [vmem:[%s4759_s10 + $0x4a] sm:$0xff] }
 0x1ae   : > { %1110 = vmatmul.f32.gmra.mxu0 %v4133_v60  ;;  %v4200_v51 = vld [vmem:[%s4759_s10 + $0x48] sm:$0xff] }
 0x1af   : > { %721 = vmatmul.f32.gmra.mxu2 %v4179_v61  ;;  %916 = vmatmul.f32.gmra.mxu3 %v4085_v44  ;;  %v5552_v35 = vadd.f32 %v1060_v47, %v934_v24 }
 0x1b2   : > { %v674_v16 = vpop.f32.mrf.mxu2  ;;  %v869_v23 = vpop.f32.mrf.mxu3  ;;  %1304 = vmatmul.f32.gmra.mxu1 %v4181_v13 }
 0x1b3   : > { %v740_v28 = vadd.f32 %v674_v16, %v513_v11  ;;  %v1066_v27 = vpop.f32.mrf.mxu0  ;;  %v5576_v13 = vpop.f32.mrf.mxu1  ;;  %v4297_v16 = vld [vmem:[%s4759_s10 + $0x52] sm:$0xff] }
 0x1b5   : > { %v935_v38 = vadd.f32 %v869_v23, %v740_v28  ;;  %v4201_v23 = vld [vmem:[%s4759_s10 + $0x50] sm:$0xff] }
 0x1b6   : > { %1794 = vmatmul.f32.vlgmr.msra.gmra.mxu0 %v4294_v36  ;;  %v4249_v28 = vld [vmem:[%s4759_s10 + $0x51] sm:$0xff] }
 0x1b7   : > { %1406 = vmatmul.f32.vlgmr.msra.gmra.mxu2 %v4198_v40  ;;  %1600 = vmatmul.f32.vlgmr.msra.gmra.mxu3 %v4246_v9  ;;  %v5560_v19 = vadd.f32 %v1063_v56, %v935_v38  ;;  %v4248_v56 = vld [vmem:[%s4759_s10 + $0x49] sm:$0xff] }
 0x1b8   : > { %v2163_v36 = vld [vmem:[#allocation3 + $0xa0] sm:$0xff] }
 0x1b9   : > { %2186 = vmatpush.msra.mxu1 %v2163_v36 }
 0x1ba   : > { %v677_v61 = vpop.f32.mrf.mxu2  ;;  %v872_v41 = vpop.f32.mrf.mxu3 }
 0x1bb   : > { %v741_v54 = vadd.f32 %v677_v61, %v5169_v57  ;;  %v1069_v8 = vpop.f32.mrf.mxu0 }
 0x1bd   : > { %v936_v47 = vadd.f32 %v872_v41, %v741_v54  ;;  %v4298_v41 = vld [vmem:[%s4759_s10 + $0x62] sm:$0xff] }
 0x1be   : > { %1797 = vmatmul.f32.gmra.mxu0 %v4295_v42  ;;  %v4202_v54 = vld [vmem:[%s4759_s10 + $0x60] sm:$0xff]  ;;  %v5588_v42 = vpop.f32.mrf.mxu1 }
 0x1bf   : > { %1409 = vmatmul.f32.gmra.mxu2 %v4199_v30  ;;  %1603 = vmatmul.f32.gmra.mxu3 %v4247_v0  ;;  %v5566_v29 = vadd.f32 %v1066_v27, %v936_v47 }
 0x1c2   : > { %v680_v45 = vpop.f32.mrf.mxu2  ;;  %v875_v18 = vpop.f32.mrf.mxu3 }
 0x1c3   : > { %v742_v57 = vadd.f32 %v680_v45, %v5182_v46  ;;  %v1072_v5 = vpop.f32.mrf.mxu0 }
 0x1c5   : > { %v937_v60 = vadd.f32 %v875_v18, %v742_v57  ;;  %v4203_v57 = vld [vmem:[%s4759_s10 + $0x68] sm:$0xff] }
 0x1c6   : > { %1800 = vmatmul.f32.gmra.mxu0 %v4296_v39 }
 0x1c7   : > { %1412 = vmatmul.f32.gmra.mxu2 %v4200_v51  ;;  %1606 = vmatmul.f32.gmra.mxu3 %v4248_v56  ;;  %v5574_v44 = vadd.f32 %v1069_v8, %v937_v60  ;;  %v4250_v8 = vld [vmem:[%s4759_s10 + $0x61] sm:$0xff]  ;;  %v5596_v56 = vpop.f32.mrf.mxu1 }
 0x1c8   : > { %v2162_v51 = vld [vmem:[#allocation3 + $0x98] sm:$0xff] }
 0x1c9   : > { %2187 = vmatpush.msra.mxu1 %v2162_v51 }
 0x1ca   : > { %v683_v24 = vpop.f32.mrf.mxu2  ;;  %v878_v14 = vpop.f32.mrf.mxu3 }
 0x1cb   : > { %v743_v11 = vadd.f32 %v683_v24, %v5197_v7  ;;  %v1075_v46 = vpop.f32.mrf.mxu0 }
 0x1cd   : > { %v938_v27 = vadd.f32 %v878_v14, %v743_v11 }
 0x1ce   : > { %1803 = vmatmul.f32.gmra.mxu0 %v4297_v16  ;;  %v4204_v16 = vld [vmem:[%s4759_s10 + $0x78] sm:$0xff] }
 0x1cf   : > { %1415 = vmatmul.f32.gmra.mxu2 %v4201_v23  ;;  %1609 = vmatmul.f32.gmra.mxu3 %v4249_v28  ;;  %v5582_v40 = vadd.f32 %v1072_v5, %v938_v27  ;;  %v4251_v5 = vld [vmem:[%s4759_s10 + $0x69] sm:$0xff]  ;;  %v4252_v23 = vld [vmem:[%s4759_s10 + $0x79] sm:$0xff]  ;;  %v5606_v36 = vpop.f32.mrf.mxu1 }
 0x1d2   : > { %v686_v9 = vpop.f32.mrf.mxu2  ;;  %v881_v38 = vpop.f32.mrf.mxu3 }
 0x1d3   : > { %v744_v7 = vadd.f32 %v686_v9, %v5209_v15  ;;  %v1078_v61 = vpop.f32.mrf.mxu0  ;;  %v4299_v15 = vld [vmem:[%s4759_s10 + $0x6a] sm:$0xff] }
 0x1d5   : > { %v939_v30 = vadd.f32 %v881_v38, %v744_v7 }
 0x1d6   : > { %1806 = vmatmul.f32.gmra.mxu0 %v4298_v41  ;;  %v4205_v41 = vld [vmem:[%s4759_s10 + $0x80] sm:$0xff] }
 0x1d7   : > { %1418 = vmatmul.f32.gmra.mxu2 %v4202_v54  ;;  %1612 = vmatmul.f32.gmra.mxu3 %v4250_v8  ;;  %v5590_v0 = vadd.f32 %v1075_v46, %v939_v30  ;;  %v4300_v46 = vld [vmem:[%s4759_s10 + $0x7a] sm:$0xff] }
 0x1d8   : > { %v4253_v54 = vld [vmem:[%s4759_s10 + $0x81] sm:$0xff] }
 0x1d9   : > { %v2161_v30 = vld [vmem:[#allocation3 + $0x90] sm:$0xff] }
 0x1da   : > { %v689_v47 = vpop.f32.mrf.mxu2  ;;  %v884_v10 = vpop.f32.mrf.mxu3  ;;  %2188 = vmatpush.msra.mxu1 %v2161_v30 }
 0x1db   : > { %v745_v45 = vadd.f32 %v689_v47, %v5224_v21  ;;  %v1081_v18 = vpop.f32.mrf.mxu0 }
 0x1dd   : > { %v940_v39 = vadd.f32 %v884_v10, %v745_v45 }
 0x1de   : > { %1809 = vmatmul.f32.gmra.mxu0 %v4299_v15 }
 0x1df   : > { %1421 = vmatmul.f32.gmra.mxu2 %v4203_v57  ;;  %1615 = vmatmul.f32.gmra.mxu3 %v4251_v5  ;;  %v5598_v60 = vadd.f32 %v1078_v61, %v940_v39  ;;  %v4302_v57 = vld [vmem:[%s4759_s10 + $0x92] sm:$0xff] }
 0x1e0   : > { %v4206_v5 = vld [vmem:[%s4759_s10 + $0x90] sm:$0xff] }
 0x1e1   : > { %v4254_v39 = vld [vmem:[%s4759_s10 + $0x91] sm:$0xff] }
 0x1e2   : > { %v692_v24 = vpop.f32.mrf.mxu2  ;;  %v887_v14 = vpop.f32.mrf.mxu3 }
 0x1e3   : > { %v746_v21 = vadd.f32 %v692_v24, %v5236_v43  ;;  %v1084_v11 = vpop.f32.mrf.mxu0  ;;  %v4301_v43 = vld [vmem:[%s4759_s10 + $0x82] sm:$0xff] }
 0x1e5   : > { %v941_v28 = vadd.f32 %v887_v14, %v746_v21 }
 0x1e6   : > { %1812 = vmatmul.f32.gmra.mxu0 %v4300_v46 }
 0x1e7   : > { %1424 = vmatmul.f32.gmra.mxu2 %v4204_v16  ;;  %1618 = vmatmul.f32.gmra.mxu3 %v4252_v23  ;;  %v5604_v27 = vadd.f32 %v1081_v18, %v941_v28  ;;  %v5614_v18 = vpop.f32.mrf.mxu1  ;;  %v4303_v16 = vld [vmem:[%s4759_s10 + $0x9a] sm:$0xff] }
 0x1e8   : > { %v4255_v23 = vld [vmem:[%s4759_s10 + $0x99] sm:$0xff] }
 0x1ea   : > { %v695_v9 = vpop.f32.mrf.mxu2  ;;  %v890_v38 = vpop.f32.mrf.mxu3 }
 0x1eb   : > { %v747_v7 = vadd.f32 %v695_v9, %v5251_v37  ;;  %v1087_v61 = vpop.f32.mrf.mxu0 }
 0x1ed   : > { %v942_v8 = vadd.f32 %v890_v38, %v747_v7  ;;  %v2160_v38 = vld [vmem:[#allocation3 + $0x88] sm:$0xff] }
 0x1ee   : > { %1815 = vmatmul.f32.gmra.mxu0 %v4301_v43  ;;  %2189 = vmatpush.msra.mxu1 %v2160_v38 }
 0x1ef   : > { %1427 = vmatmul.f32.gmra.mxu2 %v4205_v41  ;;  %1621 = vmatmul.f32.gmra.mxu3 %v4253_v54  ;;  %v5612_v47 = vadd.f32 %v1084_v11, %v942_v8  ;;  %v5626_v28 = vpop.f32.mrf.mxu1  ;;  %v4208_v54 = vld [vmem:[%s4759_s10 + $0xa8] sm:$0xff] }
 0x1f0   : > { %v4256_v8 = vld [vmem:[%s4759_s10 + $0xa9] sm:$0xff] }
 0x1f2   : > { %v698_v10 = vpop.f32.mrf.mxu2  ;;  %v893_v45 = vpop.f32.mrf.mxu3 }
 0x1f3   : > { %v748_v37 = vadd.f32 %v698_v10, %v5263_v17  ;;  %v1090_v15 = vpop.f32.mrf.mxu0  ;;  %v4207_v17 = vld [vmem:[%s4759_s10 + $0x98] sm:$0xff] }
 0x1f5   : > { %v943_v51 = vadd.f32 %v893_v45, %v748_v37 }
 0x1f6   : > { %1818 = vmatmul.f32.gmra.mxu0 %v4302_v57 }
 0x1f7   : > { %1430 = vmatmul.f32.gmra.mxu2 %v4206_v5  ;;  %1624 = vmatmul.f32.gmra.mxu3 %v4254_v39  ;;  %v5620_v24 = vadd.f32 %v1087_v61, %v943_v51  ;;  %v5634_v10 = vpop.f32.mrf.mxu1  ;;  %v4209_v39 = vld [vmem:[%s4759_s10 + $0xb0] sm:$0xff] }
 0x1f8   : > { %v4257_v51 = vld [vmem:[%s4759_s10 + $0xb1] sm:$0xff] }
 0x1fa   : > { %v701_v14 = vpop.f32.mrf.mxu2  ;;  %v896_v21 = vpop.f32.mrf.mxu3 }
 0x1fb   : > { %v749_v11 = vadd.f32 %v701_v14, %v5278_v55  ;;  %v1093_v46 = vpop.f32.mrf.mxu0  ;;  %v2159_v14 = vld [vmem:[#allocation3 + $0x80] sm:$0xff] }
 0x1fc   : > { %2190 = vmatpush.msra.mxu1 %v2159_v14  ;;  %v6734_v14 = vld [vmem:[#allocation10_spill] sm:$0xff] }
 0x1fd   : > { %v944_v9 = vadd.f32 %v896_v21, %v749_v11  ;;  %v6724_v21 = vmov 0.0   ;;  %v2125_v11 = vld [vmem:[#allocation3 + $0x78] sm:$0xff] }
 0x1fe   : > { %1821 = vmatmul.f32.gmra.mxu0 %v4303_v16  ;;  %1994 = vst [vmem:[#allocation2 + $0x18] sm:$0xff] %v6724_v21  ;;  %2288 = vmatpush.msrb.mxu2 %v2125_v11 }
 0x1ff   : > { %1433 = vmatmul.f32.gmra.mxu2 %v4207_v17  ;;  %1627 = vmatmul.f32.gmra.mxu3 %v4255_v23  ;;  %v5628_v7 = vadd.f32 %v1090_v15, %v944_v9  ;;  %1995 = vst [vmem:[#allocation2 + $0x20] sm:$0xff] %v6724_v21  ;;  %v4210_v23 = vld [vmem:[%s4759_s10 + $0xc0] sm:$0xff] }
 0x200   : > { %1991 = vst [vmem:[#allocation2] sm:$0xff] %v6724_v21  ;;  %v4258_v9 = vld [vmem:[%s4759_s10 + $0xc1] sm:$0xff] }
 0x201   : > { %1992 = vst [vmem:[#allocation2 + $0x8] sm:$0xff] %v6724_v21 }
 0x202   : > { %v704_v61 = vpop.f32.mrf.mxu2  ;;  %v899_v43 = vpop.f32.mrf.mxu3  ;;  %1993 = vst [vmem:[#allocation2 + $0x10] sm:$0x3] %v6724_v21 }
 0x203   : > { %v750_v55 = vadd.f32 %v704_v61, %v5290_v52  ;;  %v1096_v41 = vpop.f32.mrf.mxu0  ;;  %1996 = vst [vmem:[#allocation2 + $0x28] sm:$0x3] %v6724_v21  ;;  %v2449_v61 = vld [vmem:[#allocation3 + $0x178] sm:$0xff] }
 0x204   : > { %1997 = vst [vmem:[#allocation2 + $0x30] sm:$0xff] %v6724_v21  ;;  %2450 = vmatpush.msrb.mxu3 %v2449_v61 }
 0x205   : > { %v945_v30 = vadd.f32 %v899_v43, %v750_v55  ;;  %1998 = vst [vmem:[#allocation2 + $0x38] sm:$0xff] %v6724_v21 }
 0x206   : > { %1824 = vmatmul.f32.gmra.mxu0 %v5326_v50  ;;  %1999 = vst [vmem:[#allocation2 + $0x40] sm:$0x3] %v6724_v21 }
 0x207   : > { %1436 = vmatmul.f32.gmra.mxu2 %v4208_v54  ;;  %1630 = vmatmul.f32.gmra.mxu3 %v4256_v8  ;;  %v5636_v45 = vadd.f32 %v1093_v46, %v945_v30  ;;  %2000 = vst [vmem:[#allocation2 + $0x48] sm:$0xff] %v6724_v21  ;;  %v6733_v54 = vld [vmem:[#allocation9_spill] sm:$0xff] }
 0x208   : > { %2001 = vst [vmem:[#allocation2 + $0x50] sm:$0xff] %v6724_v21  ;;  %v2126_v43 = vld [vmem:[#allocation2 + $0x1] sm:$0xff] }
 0x209   : > { %2002 = vst [vmem:[#allocation2 + $0x58] sm:$0x3] %v6724_v21  ;;  %2191 = vmatmul.f32.vlgmr.msra.gmra.mxu1 %v2126_v43 }
 0x20a   : > { %v707_v37 = vpop.f32.mrf.mxu2  ;;  %v902_v15 = vpop.f32.mrf.mxu3  ;;  %2003 = vst [vmem:[#allocation2 + $0x60] sm:$0xff] %v6724_v21 }
 0x20b   : > { %v751_v57 = vadd.f32 %v707_v37, %v5305_v26  ;;  %v1099_v5 = vpop.f32.mrf.mxu0  ;;  %v5648_v26 = vpop.f32.mrf.mxu1  ;;  %2004 = vst [vmem:[#allocation2 + $0x68] sm:$0xff] %v6724_v21  ;;  %v4211_v37 = vld [vmem:[%s4759_s10 + $0xc8] sm:$0xff] }
 0x20c   : > { %2005 = vst [vmem:[#allocation2 + $0x70] sm:$0x3] %v6724_v21 }
 0x20d   : > { %v946_v52 = vadd.f32 %v902_v15, %v751_v57  ;;  %v4259_v15 = vld [vmem:[%s4759_s10 + $0xc9] sm:$0xff]  ;;  %2006 = vst [vmem:[#allocation2 + $0x78] sm:$0xff] %v6724_v21 }
 0x20e   : > { %1827 = vmatmul.f32.gmra.mxu0 %v5344_v6  ;;  %2007 = vst [vmem:[#allocation2 + $0x80] sm:$0xff] %v6724_v21 }
 0x20f   : > { %1439 = vmatmul.f32.gmra.mxu2 %v4209_v39  ;;  %1633 = vmatmul.f32.gmra.mxu3 %v4257_v51  ;;  %v5644_v50 = vadd.f32 %v1096_v41, %v946_v52  ;;  %2008 = vst [vmem:[#allocation2 + $0x88] sm:$0x3] %v6724_v21 }
 0x210   : > { %2009 = vst [vmem:[#allocation2 + $0x90] sm:$0xff] %v6724_v21 }
 0x211   : > { %2010 = vst [vmem:[#allocation2 + $0x98] sm:$0xff] %v6724_v21 }
 0x212   : > { %v710_v46 = vpop.f32.mrf.mxu2  ;;  %v905_v6 = vpop.f32.mrf.mxu3  ;;  %2011 = vst [vmem:[#allocation2 + $0xa0] sm:$0x3] %v6724_v21 }
 0x213   : > { %v752_v16 = vadd.f32 %v710_v46, %v5317_v32  ;;  %v1102_v17 = vpop.f32.mrf.mxu0  ;;  %2012 = vst [vmem:[#allocation2 + $0xa8] sm:$0xff] %v6724_v21  ;;  %v4212_v46 = vld [vmem:[%s4759_s10 + $0xd8] sm:$0xff] }
 0x214   : > { %2013 = vst [vmem:[#allocation2 + $0xb0] sm:$0xff] %v6724_v21 }
 0x215   : > { %v947_v38 = vadd.f32 %v905_v6, %v752_v16  ;;  %v4260_v6 = vld [vmem:[%s4759_s10 + $0xd9] sm:$0xff]  ;;  %2014 = vst [vmem:[#allocation2 + $0xb8] sm:$0x3] %v6724_v21 }
 0x216   : > { %1830 = vmatmul.f32.gmra.mxu0 %v5360_v49  ;;  %v5666_v49 = vpop.f32.mrf.mxu1  ;;  %2015 = vst [vmem:[#allocation2 + $0xc0] sm:$0xff] %v6724_v21 }
 0x217   : > { %1442 = vmatmul.f32.gmra.mxu2 %v4210_v23  ;;  %1636 = vmatmul.f32.gmra.mxu3 %v4258_v9  ;;  %v5660_v32 = vadd.f32 %v1099_v5, %v947_v38  ;;  %v2127_v5 = vld [vmem:[#allocation2 + $0x9] sm:$0xff]  ;;  %v2124_v38 = vld [vmem:[#allocation3 + $0x70] sm:$0xff]  ;;  %2016 = vst [vmem:[#allocation2 + $0xc8] sm:$0xff] %v6724_v21 }
 0x218   : > { %2194 = vmatmul.f32.gmra.mxu1 %v2127_v5  ;;  %v2643_v23 = vld [vmem:[#allocation3 + $0x1f8] sm:$0xff]  ;;  %2017 = vst [vmem:[#allocation2 + $0xd0] sm:$0x3] %v6724_v21  ;;  %2289 = vmatpush.msrb.mxu2 %v2124_v38  ;;  %v2836_v38 = vld [vmem:[#allocation3 + $0x270] sm:$0xff] }
 0x219   : > { %v2837_v9 = vld [vmem:[#allocation3 + $0x278] sm:$0xff]  ;;  %2018 = vst [vmem:[#allocation2 + $0xd8] sm:$0xff] %v6724_v21  ;;  %2644 = vmatpush.msrb.mxu0 %v2643_v23  ;;  %v4262_v23 = vld [vmem:[%s4759_s10 + $0xf1] sm:$0xff] }
 0x21a   : > { %v713_v55 = vpop.f32.mrf.mxu2  ;;  %v908_v41 = vpop.f32.mrf.mxu3  ;;  %2838 = vmatpush.msrb.mxu1 %v2837_v9  ;;  %2019 = vst [vmem:[#allocation2 + $0xe0] sm:$0xff] %v6724_v21  ;;  %v2642_v9 = vld [vmem:[#allocation3 + $0x1f0] sm:$0xff] }
 0x21b   : > { %v753_v8 = vadd.f32 %v713_v55, %v6733_v54  ;;  %v1105_v30 = vpop.f32.mrf.mxu0  ;;  %2020 = vst [vmem:[#allocation2 + $0xe8] sm:$0x3] %v6724_v21  ;;  %v6735_v55 = vld [vmem:[#allocation11_spill] sm:$0xff]  ;;  %2645 = vmatpush.msrb.mxu0 %v2642_v9 }
 0x21c   : > { %2021 = vst [vmem:[#allocation2 + $0xf0] sm:$0xff] %v6724_v21  ;;  %2839 = vmatpush.msrb.mxu1 %v2836_v38 }
 0x21d   : > { %v948_v57 = vadd.f32 %v908_v41, %v753_v8  ;;  %v4213_v8 = vld [vmem:[%s4759_s10 + $0xe0] sm:$0xff]  ;;  %2022 = vst [vmem:[#allocation2 + $0xf8] sm:$0xff] %v6724_v21 }
 0x21e   : > { %1833 = vmatmul.f32.gmra.mxu0 %v5379_v25  ;;  %v5687_v16 = vpop.f32.mrf.mxu1  ;;  %2023 = vst [vmem:[#allocation2 + $0x100] sm:$0x3] %v6724_v21 }
 0x21f   : > { %1445 = vmatmul.f32.gmra.mxu2 %v4211_v37  ;;  %1639 = vmatmul.f32.gmra.mxu3 %v4259_v15  ;;  %v5676_v39 = vadd.f32 %v1102_v17, %v948_v57  ;;  %v2448_v15 = vld [vmem:[#allocation3 + $0x170] sm:$0xff]  ;;  %2024 = vst [vmem:[#allocation2 + $0x108] sm:$0xff] %v6724_v21 }
 0x220   : > { %v4470_v57 = vld [vmem:[%s4759_s10 + $0xe2] sm:$0xff]  ;;  %2451 = vmatpush.msrb.mxu3 %v2448_v15  ;;  %2025 = vst [vmem:[#allocation2 + $0x110] sm:$0xff] %v6724_v21  ;;  %v4311_v15 = vld [vmem:[%s4759_s10 + $0xfa] sm:$0xff] }
 0x221   : > { %2026 = vst [vmem:[#allocation2 + $0x118] sm:$0x3] %v6724_v21 }
 0x222   : > { %v716_v51 = vpop.f32.mrf.mxu2  ;;  %v911_v52 = vpop.f32.mrf.mxu3  ;;  %2027 = vst [vmem:[#allocation2 + $0x120] sm:$0xff] %v6724_v21 }
 0x223   : > { %v754_v25 = vadd.f32 %v716_v51, %v6734_v14  ;;  %v1108_v11 = vpop.f32.mrf.mxu0  ;;  %2028 = vst [vmem:[#allocation2 + $0x128] sm:$0xff] %v6724_v21 }
 0x224   : > { %2029 = vst [vmem:[#allocation2 + $0x130] sm:$0x3] %v6724_v21 }
 0x225   : > { %v949_v17 = vadd.f32 %v911_v52, %v754_v25  ;;  %v6736_v25 = vld [vmem:[#allocation12_spill] sm:$0xff]  ;;  %2030 = vst [vmem:[#allocation2 + $0x138] sm:$0xff] %v6724_v21 }
 0x226   : > { %1836 = vmatmul.f32.gmra.mxu0 %v5391_v33  ;;  %v5706_v5 = vpop.f32.mrf.mxu1  ;;  %2031 = vst [vmem:[#allocation2 + $0x140] sm:$0xff] %v6724_v21 }
 0x227   : > { %1448 = vmatmul.f32.gmra.mxu2 %v4212_v46  ;;  %1642 = vmatmul.f32.gmra.mxu3 %v4260_v6  ;;  %v5692_v61 = vadd.f32 %v1105_v30, %v949_v17  ;;  %v4261_v30 = vld [vmem:[%s4759_s10 + $0xe1] sm:$0xff]  ;;  %v4214_v17 = vld [vmem:[%s4759_s10 + $0xf0] sm:$0xff]  ;;  %2032 = vst [vmem:[#allocation2 + $0x148] sm:$0x3] %v6724_v21 }
 0x228   : > { %2033 = vst [vmem:[#allocation2 + $0x150] sm:$0xff] %v6724_v21 }
 0x229   : > { %2034 = vst [vmem:[#allocation2 + $0x158] sm:$0xff] %v6724_v21 }
 0x22a   : > { %v719_v43 = vpop.f32.mrf.mxu2  ;;  %v914_v33 = vpop.f32.mrf.mxu3  ;;  %2035 = vst [vmem:[#allocation2 + $0x160] sm:$0x3] %v6724_v21 }
 0x22b   : > { %v755_v41 = vadd.f32 %v719_v43, %v6735_v55  ;;  %v1111_v54 = vpop.f32.mrf.mxu0  ;;  %v2123_v43 = vld [vmem:[#allocation3 + $0x68] sm:$0xff]  ;;  %2036 = vst [vmem:[#allocation2 + $0x168] sm:$0xff] %v6724_v21 }
 0x22c   : > { %2290 = vmatpush.msrb.mxu2 %v2123_v43  ;;  %2037 = vst [vmem:[#allocation2 + $0x170] sm:$0xff] %v6724_v21 }
 0x22d   : > { %v950_v37 = vadd.f32 %v914_v33, %v755_v41  ;;  %v4471_v33 = vld [vmem:[%s4759_s10 + $0xf2] sm:$0xff]  ;;  %2038 = vst [vmem:[#allocation2 + $0x178] sm:$0x3] %v6724_v21 }
 0x22e   : > { %1839 = vmatmul.f32.gmra.mxu0 %v4470_v57  ;;  %v5726_v41 = vpop.f32.mrf.mxu1  ;;  %v4215_v57 = vld [vmem:[%s4759_s10 + $0xf8] sm:$0xff]  ;;  %2039 = vst [vmem:[#allocation2 + $0x180] sm:$0xff] %v6724_v21 }
 0x22f   : > { %1451 = vmatmul.f32.gmra.mxu2 %v4213_v8  ;;  %1645 = vmatmul.f32.gmra.mxu3 %v4261_v30  ;;  %v5708_v51 = vadd.f32 %v1108_v11, %v950_v37  ;;  %2040 = vst [vmem:[#allocation2 + $0x188] sm:$0xff] %v6724_v21 }
 0x230   : > { %2041 = vst [vmem:[#allocation2 + $0x190] sm:$0x3] %v6724_v21 }
 0x231   : > { %2042 = vst [vmem:[#allocation2 + $0x198] sm:$0xff] %v6724_v21 }
 0x232   : > { %v722_v52 = vpop.f32.mrf.mxu2  ;;  %v917_v14 = vpop.f32.mrf.mxu3  ;;  %2043 = vst [vmem:[#allocation2 + $0x1a0] sm:$0xff] %v6724_v21 }
 0x233   : > { %v756_v46 = vadd.f32 %v722_v52, %v6736_v25  ;;  %v1795_v6 = vpop.f32.mrf.mxu0  ;;  %v4263_v52 = vld [vmem:[%s4759_s10 + $0xf9] sm:$0xff]  ;;  %2044 = vst [vmem:[#allocation2 + $0x1a8] sm:$0x3] %v6724_v21  ;;  %v4265_v21 = vld [vmem:[%s4759_s10 + $0x111] sm:$0xff] }
 0x234   : > { %v5739_v25 = vld [vmem:[%s6720_s2] ss:$0 sm:$0xff] }
 0x235   : > { %v951_v11 = vadd.f32 %v917_v14, %v756_v46  ;;  %v2447_v46 = vld [vmem:[#allocation3 + $0x168] sm:$0xff] }
 0x236   : > { %1842 = vmatmul.f32.gmra.mxu0 %v4471_v33  ;;  %2452 = vmatpush.msrb.mxu3 %v2447_v46  ;;  %v5748_v9 = vpop.f32.mrf.mxu1  ;;  %v4312_v33 = vld [vmem:[%s4759_s10 + $0x10a] sm:$0xff] }
 0x237   : > { %1454 = vmatmul.f32.gmra.mxu2 %v4214_v17  ;;  %1648 = vmatmul.f32.gmra.mxu3 %v4262_v23  ;;  %v5722_v55 = vadd.f32 %v1111_v54, %v951_v11 }
 0x239   : > { %6737 = vst [vmem:[#allocation9_spill] sm:$0xff] %v5722_v55 }
 0x23a   : > { %v1407_v8 = vpop.f32.mrf.mxu2  ;;  %v1601_v30 = vpop.f32.mrf.mxu3 }
 0x23b   : > { %v1503_v37 = vadd.f32 %v1407_v8, %v5408_v58  ;;  %v1798_v54 = vpop.f32.mrf.mxu0  ;;  %v4216_v8 = vld [vmem:[%s4759_s10 + $0x108] sm:$0xff] }
 0x23d   : > { %v1697_v14 = vadd.f32 %v1601_v30, %v1503_v37  ;;  %v4264_v30 = vld [vmem:[%s4759_s10 + $0x109] sm:$0xff] }
 0x23e   : > { %1845 = vmatmul.f32.gmra.mxu0 %v4311_v15  ;;  %v2641_v15 = vld [vmem:[#allocation3 + $0x1e8] sm:$0xff]  ;;  %v5759_v55 = vpop.f32.mrf.mxu1 }
 0x23f   : > { %v1891_v58 = vadd.f32 %v1795_v6, %v1697_v14  ;;  %1457 = vmatmul.f32.gmra.mxu2 %v4215_v57  ;;  %1651 = vmatmul.f32.gmra.mxu3 %v4263_v52  ;;  %v2835_v57 = vld [vmem:[#allocation3 + $0x268] sm:$0xff]  ;;  %v2122_v52 = vld [vmem:[#allocation3 + $0x60] sm:$0xff] }
 0x240   : > { %2840 = vmatpush.msrb.mxu1 %v2835_v57  ;;  %2646 = vmatpush.msrb.mxu0 %v2641_v15 }
 0x241   : > { %v1927_v17 = vadd.f32 %v5739_v25, %v1891_v58  ;;  %2291 = vmatpush.msrb.mxu2 %v2122_v52 }
 0x242   : > { %v1410_v23 = vpop.f32.mrf.mxu2  ;;  %v1604_v11 = vpop.f32.mrf.mxu3 }
 0x243   : > { %v1959_v38 = vmax.f32 %v1927_v17, 0.0  ;;  %v1504_v6 = vadd.f32 %v1410_v23, %v5422_v59  ;;  %v1801_v43 = vpop.f32.mrf.mxu0 }
 0x245   : > { %2046 = vst [vmem:[#allocation2 + $0x19] sm:$0xff] %v1959_v38  ;;  %v1698_v37 = vadd.f32 %v1604_v11, %v1504_v6  ;;  %2197 = vmatmul.f32.gmra.mxu1 %v1959_v38  ;;  %v4313_v38 = vld [vmem:[%s4759_s10 + $0x112] sm:$0xff] }
 0x246   : > { %1848 = vmatmul.f32.gmra.mxu0 %v4312_v33  ;;  %v4217_v6 = vld [vmem:[%s4759_s10 + $0x110] sm:$0xff] }
 0x247   : > { %v1892_v14 = vadd.f32 %v1798_v54, %v1698_v37  ;;  %1460 = vmatmul.f32.gmra.mxu2 %v4216_v8  ;;  %1654 = vmatmul.f32.gmra.mxu3 %v4264_v30  ;;  %v2446_v33 = vld [vmem:[#allocation3 + $0x160] sm:$0xff] }
 0x248   : > { %2453 = vmatpush.msrb.mxu3 %v2446_v33 }
 0x249   : > { %v1928_v59 = vadd.f32 %v5739_v25, %v1892_v14  ;;  %v4314_v14 = vld [vmem:[%s4759_s10 + $0x122] sm:$0xff] }
 0x24a   : > { %v1413_v46 = vpop.f32.mrf.mxu2  ;;  %v1607_v58 = vpop.f32.mrf.mxu3 }
 0x24b   : > { %v1960_v17 = vmax.f32 %v1928_v59, 0.0  ;;  %v1505_v23 = vadd.f32 %v1413_v46, %v5432_v48  ;;  %v1804_v11 = vpop.f32.mrf.mxu0  ;;  %v4218_v59 = vld [vmem:[%s4759_s10 + $0x120] sm:$0xff] }
 0x24c   : > { %v4266_v46 = vld [vmem:[%s4759_s10 + $0x121] sm:$0xff] }
 0x24d   : > { %2047 = vst [vmem:[#allocation2 + $0x21] sm:$0xff] %v1960_v17  ;;  %v1699_v54 = vadd.f32 %v1607_v58, %v1505_v23  ;;  %2200 = vmatmul.f32.gmra.mxu1 %v1960_v17  ;;  %v2640_v17 = vld [vmem:[#allocation3 + $0x1e0] sm:$0xff] }
 0x24e   : > { %1851 = vmatmul.f32.gmra.mxu0 %v4313_v38  ;;  %v2834_v23 = vld [vmem:[#allocation3 + $0x260] sm:$0xff] }
 0x24f   : > { %v1893_v8 = vadd.f32 %v1801_v43, %v1699_v54  ;;  %1463 = vmatmul.f32.gmra.mxu2 %v4217_v6  ;;  %1657 = vmatmul.f32.gmra.mxu3 %v4265_v21  ;;  %v2121_v43 = vld [vmem:[#allocation3 + $0x58] sm:$0xff]  ;;  %v5766_v21 = vpop.f32.mrf.mxu1 }
 0x250   : > { %2841 = vmatpush.msrb.mxu1 %v2834_v23  ;;  %2647 = vmatpush.msrb.mxu0 %v2640_v17 }
 0x251   : > { %v1929_v48 = vadd.f32 %v5739_v25, %v1893_v8  ;;  %2292 = vmatpush.msrb.mxu2 %v2121_v43 }
 0x252   : > { %v1416_v30 = vpop.f32.mrf.mxu2  ;;  %v1610_v37 = vpop.f32.mrf.mxu3 }
 0x253   : > { %v1961_v15 = vmax.f32 %v1929_v48, 0.0  ;;  %v1506_v57 = vadd.f32 %v1416_v30, %v5445_v34  ;;  %v1807_v52 = vpop.f32.mrf.mxu0  ;;  %v4315_v30 = vld [vmem:[%s4759_s10 + $0x12a] sm:$0xff] }
 0x255   : > { %2048 = vst [vmem:[#allocation2 + $0x31] sm:$0xff] %v1961_v15  ;;  %v1700_v58 = vadd.f32 %v1610_v37, %v1506_v57  ;;  %2203 = vmatmul.f32.gmra.mxu1 %v1961_v15  ;;  %v4219_v37 = vld [vmem:[%s4759_s10 + $0x128] sm:$0xff] }
 0x256   : > { %1854 = vmatmul.f32.gmra.mxu0 %v4314_v14  ;;  %v4267_v15 = vld [vmem:[%s4759_s10 + $0x129] sm:$0xff] }
 0x257   : > { %v1894_v38 = vadd.f32 %v1804_v11, %v1700_v58  ;;  %1466 = vmatmul.f32.gmra.mxu2 %v4218_v59  ;;  %1660 = vmatmul.f32.gmra.mxu3 %v4266_v46  ;;  %v2445_v11 = vld [vmem:[#allocation3 + $0x158] sm:$0xff]  ;;  %v5773_v59 = vpop.f32.mrf.mxu1 }
 0x258   : > { %2454 = vmatpush.msrb.mxu3 %v2445_v11 }
 0x259   : > { %v1930_v34 = vadd.f32 %v5739_v25, %v1894_v38  ;;  %v4316_v38 = vld [vmem:[%s4759_s10 + $0x13a] sm:$0xff] }
 0x25a   : > { %v1419_v6 = vpop.f32.mrf.mxu2  ;;  %v1613_v54 = vpop.f32.mrf.mxu3 }
 0x25b   : > { %v1962_v33 = vmax.f32 %v1930_v34, 0.0  ;;  %v1507_v8 = vadd.f32 %v1419_v6, %v5455_v31  ;;  %v1810_v48 = vpop.f32.mrf.mxu0  ;;  %v4220_v34 = vld [vmem:[%s4759_s10 + $0x138] sm:$0xff] }
 0x25c   : > { %v4268_v6 = vld [vmem:[%s4759_s10 + $0x139] sm:$0xff] }
 0x25d   : > { %2049 = vst [vmem:[#allocation2 + $0x39] sm:$0xff] %v1962_v33  ;;  %v1701_v57 = vadd.f32 %v1613_v54, %v1507_v8  ;;  %2206 = vmatmul.f32.gmra.mxu1 %v1962_v33  ;;  %v2639_v33 = vld [vmem:[#allocation3 + $0x1d8] sm:$0xff]  ;;  %v2120_v8 = vld [vmem:[#allocation3 + $0x50] sm:$0xff] }
 0x25e   : > { %1857 = vmatmul.f32.gmra.mxu0 %v4315_v30  ;;  %2293 = vmatpush.msrb.mxu2 %v2120_v8  ;;  %v4318_v8 = vld [vmem:[%s4759_s10 + $0x152] sm:$0xff] }
 0x25f   : > { %v1895_v14 = vadd.f32 %v1807_v52, %v1701_v57  ;;  %1469 = vmatmul.f32.gmra.mxu2 %v4219_v37  ;;  %1663 = vmatmul.f32.gmra.mxu3 %v4267_v15  ;;  %v2833_v52 = vld [vmem:[#allocation3 + $0x258] sm:$0xff]  ;;  %v5781_v57 = vpop.f32.mrf.mxu1 }
 0x260   : > { %2842 = vmatpush.msrb.mxu1 %v2833_v52  ;;  %2648 = vmatpush.msrb.mxu0 %v2639_v33 }
 0x261   : > { %v1931_v31 = vadd.f32 %v5739_v25, %v1895_v14 }
 0x262   : > { %v1422_v46 = vpop.f32.mrf.mxu2  ;;  %v1616_v58 = vpop.f32.mrf.mxu3 }
 0x263   : > { %v1963_v17 = vmax.f32 %v1931_v31, 0.0  ;;  %v1508_v23 = vadd.f32 %v1422_v46, %v5468_v20  ;;  %v1813_v43 = vpop.f32.mrf.mxu0  ;;  %v4317_v46 = vld [vmem:[%s4759_s10 + $0x142] sm:$0xff] }
 0x265   : > { %2050 = vst [vmem:[#allocation2 + $0x49] sm:$0xff] %v1963_v17  ;;  %v1702_v54 = vadd.f32 %v1616_v58, %v1508_v23  ;;  %2209 = vmatmul.f32.gmra.mxu1 %v1963_v17  ;;  %v4221_v58 = vld [vmem:[%s4759_s10 + $0x140] sm:$0xff] }
 0x266   : > { %1860 = vmatmul.f32.gmra.mxu0 %v4316_v38  ;;  %v4269_v17 = vld [vmem:[%s4759_s10 + $0x141] sm:$0xff] }
 0x267   : > { %v1896_v30 = vadd.f32 %v1810_v48, %v1702_v54  ;;  %1472 = vmatmul.f32.gmra.mxu2 %v4220_v34  ;;  %1666 = vmatmul.f32.gmra.mxu3 %v4268_v6  ;;  %v2444_v23 = vld [vmem:[#allocation3 + $0x150] sm:$0xff] }
 0x268   : > { %2455 = vmatpush.msrb.mxu3 %v2444_v23 }
 0x269   : > { %v1932_v20 = vadd.f32 %v5739_v25, %v1896_v30  ;;  %v4222_v30 = vld [vmem:[%s4759_s10 + $0x150] sm:$0xff] }
 0x26a   : > { %v1425_v37 = vpop.f32.mrf.mxu2  ;;  %v1619_v15 = vpop.f32.mrf.mxu3 }
 0x26b   : > { %v1964_v11 = vmax.f32 %v1932_v20, 0.0  ;;  %v1509_v14 = vadd.f32 %v1425_v37, %v5478_v3  ;;  %v1816_v31 = vpop.f32.mrf.mxu0  ;;  %v4270_v20 = vld [vmem:[%s4759_s10 + $0x151] sm:$0xff]  ;;  %v5792_v37 = vpop.f32.mrf.mxu1 }
 0x26d   : > { %2051 = vst [vmem:[#allocation2 + $0x51] sm:$0xff] %v1964_v11  ;;  %v1703_v48 = vadd.f32 %v1619_v15, %v1509_v14  ;;  %2212 = vmatmul.f32.gmra.mxu1 %v1964_v11  ;;  %v2638_v11 = vld [vmem:[#allocation3 + $0x1d0] sm:$0xff]  ;;  %v2119_v14 = vld [vmem:[#allocation3 + $0x48] sm:$0xff] }
 0x26e   : > { %1863 = vmatmul.f32.gmra.mxu0 %v4317_v46  ;;  %2294 = vmatpush.msrb.mxu2 %v2119_v14 }
 0x26f   : > { %v1897_v38 = vadd.f32 %v1813_v43, %v1703_v48  ;;  %1475 = vmatmul.f32.gmra.mxu2 %v4221_v58  ;;  %1669 = vmatmul.f32.gmra.mxu3 %v4269_v17  ;;  %v2832_v43 = vld [vmem:[#allocation3 + $0x250] sm:$0xff] }
 0x270   : > { %2843 = vmatpush.msrb.mxu1 %v2832_v43  ;;  %2649 = vmatpush.msrb.mxu0 %v2638_v11 }
 0x271   : > { %v1933_v34 = vadd.f32 %v5739_v25, %v1897_v38 }
 0x272   : > { %v1428_v6 = vpop.f32.mrf.mxu2  ;;  %v1622_v3 = vpop.f32.mrf.mxu3 }
 0x273   : > { %v1965_v54 = vmax.f32 %v1933_v34, 0.0  ;;  %v1510_v33 = vadd.f32 %v1428_v6, %v5491_v4  ;;  %v1819_v52 = vpop.f32.mrf.mxu0  ;;  %v1316_v4 = vadd.f32 %v5568_v2, %v5498_v22  ;;  %v4319_v6 = vld [vmem:[%s4759_s10 + $0x15a] sm:$0xff]  ;;  %v5800_v22 = vpop.f32.mrf.mxu1 }
 0x275   : > { %2052 = vst [vmem:[#allocation2 + $0x61] sm:$0xff] %v1965_v54  ;;  %v1704_v15 = vadd.f32 %v1622_v3, %v1510_v33  ;;  %2215 = vmatmul.f32.gmra.mxu1 %v1965_v54  ;;  %v4223_v3 = vld [vmem:[%s4759_s10 + $0x158] sm:$0xff] }
 0x276   : > { %1866 = vmatmul.f32.gmra.mxu0 %v4318_v8  ;;  %v4271_v54 = vld [vmem:[%s4759_s10 + $0x159] sm:$0xff]  ;;  %v1317_v8 = vadd.f32 %v5576_v13, %v5508_v63  ;;  %v2636_v63 = vld [vmem:[#allocation3 + $0x1c0] sm:$0xff] }
 0x277   : > { %v1898_v46 = vadd.f32 %v1816_v31, %v1704_v15  ;;  %1478 = vmatmul.f32.gmra.mxu2 %v4222_v30  ;;  %1672 = vmatmul.f32.gmra.mxu3 %v4270_v20  ;;  %v2443_v31 = vld [vmem:[#allocation3 + $0x148] sm:$0xff] }
 0x278   : > { %2456 = vmatpush.msrb.mxu3 %v2443_v31 }
 0x279   : > { %v1934_v58 = vadd.f32 %v5739_v25, %v1898_v46  ;;  %v4320_v46 = vld [vmem:[%s4759_s10 + $0x16a] sm:$0xff] }
 0x27a   : > { %v1431_v17 = vpop.f32.mrf.mxu2  ;;  %v1625_v48 = vpop.f32.mrf.mxu3 }
 0x27b   : > { %v1966_v23 = vmax.f32 %v1934_v58, 0.0  ;;  %v1511_v38 = vadd.f32 %v1431_v17, %v1316_v4  ;;  %v1822_v34 = vpop.f32.mrf.mxu0  ;;  %v2637_v4 = vld [vmem:[#allocation3 + $0x1c8] sm:$0xff]  ;;  %v4224_v58 = vld [vmem:[%s4759_s10 + $0x168] sm:$0xff]  ;;  %v5810_v31 = vpop.f32.mrf.mxu1 }
 0x27c   : > { %v4272_v17 = vld [vmem:[%s4759_s10 + $0x169] sm:$0xff]  ;;  %2650 = vmatpush.msrb.mxu0 %v2637_v4  ;;  %v4321_v4 = vld [vmem:[%s4759_s10 + $0x172] sm:$0xff] }
 0x27d   : > { %2053 = vst [vmem:[#allocation2 + $0x69] sm:$0xff] %v1966_v23  ;;  %v1705_v33 = vadd.f32 %v1625_v48, %v1511_v38  ;;  %2218 = vmatmul.f32.gmra.mxu1 %v1966_v23  ;;  %v2118_v23 = vld [vmem:[#allocation3 + $0x40] sm:$0xff] }
 0x27e   : > { %1869 = vmatmul.f32.gmra.mxu0 %v4319_v6  ;;  %v2442_v38 = vld [vmem:[#allocation3 + $0x140] sm:$0xff]  ;;  %v2117_v6 = vld [vmem:[#allocation3 + $0x38] sm:$0xff]  ;;  %2295 = vmatpush.msrb.mxu2 %v2118_v23 }
 0x27f   : > { %v1899_v2 = vadd.f32 %v1819_v52, %v1705_v33  ;;  %1481 = vmatmul.f32.gmra.mxu2 %v4223_v3  ;;  %1675 = vmatmul.f32.gmra.mxu3 %v4271_v54  ;;  %v2831_v52 = vld [vmem:[#allocation3 + $0x248] sm:$0xff]  ;;  %v2441_v3 = vld [vmem:[#allocation3 + $0x138] sm:$0xff]  ;;  %v1318_v33 = vadd.f32 %v5588_v42, %v5521_v53  ;;  %v4225_v42 = vld [vmem:[%s4759_s10 + $0x170] sm:$0xff] }
 0x280   : > { %2844 = vmatpush.msrb.mxu1 %v2831_v52  ;;  %2457 = vmatpush.msrb.mxu3 %v2442_v38  ;;  %v2635_v54 = vld [vmem:[#allocation3 + $0x1b8] sm:$0xff]  ;;  %v2115_v53 = vld [vmem:[#allocation3 + $0x28] sm:$0xff]  ;;  %v2114_v23 = vld [vmem:[#allocation3 + $0x20] sm:$0xff] }
 0x281   : > { %v1935_v30 = vadd.f32 %v5739_v25, %v1899_v2  ;;  %2651 = vmatpush.msrb.mxu0 %v2636_v63  ;;  %2296 = vmatpush.msrb.mxu2 %v2117_v6  ;;  %v2633_v52 = vld [vmem:[#allocation3 + $0x1a8] sm:$0xff]  ;;  %v2438_v63 = vld [vmem:[#allocation3 + $0x120] sm:$0xff]  ;;  %v2113_v6 = vld [vmem:[#allocation3 + $0x18] sm:$0xff] }
 0x282   : > { %v1434_v20 = vpop.f32.mrf.mxu2  ;;  %v1628_v15 = vpop.f32.mrf.mxu3  ;;  %2458 = vmatpush.msrb.mxu3 %v2441_v3  ;;  %v1319_v3 = vadd.f32 %v5596_v56, %v5531_v1  ;;  %v4226_v1 = vld [vmem:[%s4759_s10 + $0x180] sm:$0xff] }
 0x283   : > { %v1967_v11 = vmax.f32 %v1935_v30, 0.0  ;;  %v1512_v43 = vadd.f32 %v1434_v20, %v1317_v8  ;;  %v1825_v14 = vpop.f32.mrf.mxu0  ;;  %v2116_v8 = vld [vmem:[#allocation3 + $0x30] sm:$0xff]  ;;  %2652 = vmatpush.msrb.mxu0 %v2635_v54 }
 0x284   : > { %2297 = vmatpush.msrb.mxu2 %v2116_v8  ;;  %v4274_v56 = vld [vmem:[%s4759_s10 + $0x181] sm:$0xff] }
 0x285   : > { %2054 = vst [vmem:[#allocation2 + $0x79] sm:$0xff] %v1967_v11  ;;  %v1706_v48 = vadd.f32 %v1628_v15, %v1512_v43  ;;  %2221 = vmatmul.f32.gmra.mxu1 %v1967_v11  ;;  %v2634_v15 = vld [vmem:[#allocation3 + $0x1b0] sm:$0xff] }
 0x286   : > { %1872 = vmatmul.f32.gmra.mxu0 %v4320_v46  ;;  %2298 = vmatpush.msrb.mxu2 %v2115_v53  ;;  %v2830_v53 = vld [vmem:[#allocation3 + $0x240] sm:$0xff] }
 0x287   : > { %v1900_v13 = vadd.f32 %v1822_v34, %v1706_v48  ;;  %1484 = vmatmul.f32.gmra.mxu2 %v4224_v58  ;;  %1678 = vmatmul.f32.gmra.mxu3 %v4272_v17  ;;  %v2440_v34 = vld [vmem:[#allocation3 + $0x130] sm:$0xff]  ;;  %v4273_v58 = vld [vmem:[%s4759_s10 + $0x171] sm:$0xff] }
 0x288   : > { %2459 = vmatpush.msrb.mxu3 %v2440_v34  ;;  %2653 = vmatpush.msrb.mxu0 %v2634_v15  ;;  %v2439_v48 = vld [vmem:[#allocation3 + $0x128] sm:$0xff]  ;;  %v2112_v34 = vld [vmem:[#allocation3 + $0x10] sm:$0xff] }
 0x289   : > { %v1936_v2 = vadd.f32 %v5739_v25, %v1900_v13  ;;  %v2632_v13 = vld [vmem:[#allocation3 + $0x1a0] sm:$0xff]  ;;  %2299 = vmatpush.msrb.mxu2 %v2114_v23  ;;  %2845 = vmatpush.msrb.mxu1 %v2830_v53  ;;  %v2629_v23 = vld [vmem:[#allocation3 + $0x188] sm:$0xff] }
 0x28a   : > { %v1437_v30 = vpop.f32.mrf.mxu2  ;;  %v1631_v20 = vpop.f32.mrf.mxu3  ;;  %2460 = vmatpush.msrb.mxu3 %v2439_v48  ;;  %2654 = vmatpush.msrb.mxu0 %v2633_v52  ;;  %v2435_v52 = vld [vmem:[#allocation3 + $0x108] sm:$0xff] }
 0x28b   : > { %v1968_v11 = vmax.f32 %v1936_v2, 0.0  ;;  %v1513_v43 = vadd.f32 %v1437_v30, %v1318_v33  ;;  %v1828_v46 = vpop.f32.mrf.mxu0  ;;  %v2437_v33 = vld [vmem:[#allocation3 + $0x118] sm:$0xff]  ;;  %v5819_v30 = vpop.f32.mrf.mxu1  ;;  %2300 = vmatpush.msrb.mxu2 %v2113_v6  ;;  %v2434_v6 = vld [vmem:[#allocation3 + $0x100] sm:$0xff] }
 0x28c   : > { %v2631_v2 = vld [vmem:[#allocation3 + $0x198] sm:$0xff]  ;;  %2461 = vmatpush.msrb.mxu3 %v2438_v63  ;;  %2655 = vmatpush.msrb.mxu0 %v2632_v13  ;;  %v1320_v63 = vadd.f32 %v5606_v36, %v5538_v62 }
 0x28d   : > { %2055 = vst [vmem:[#allocation2 + $0x81] sm:$0xff] %v1968_v11  ;;  %v1707_v17 = vadd.f32 %v1631_v20, %v1513_v43  ;;  %2224 = vmatmul.f32.gmra.mxu1 %v1968_v11  ;;  %v4322_v43 = vld [vmem:[%s4759_s10 + $0x182] sm:$0xff]  ;;  %2301 = vmatpush.msrb.mxu2 %v2112_v34 }
 0x28e   : > { %1875 = vmatmul.f32.gmra.mxu0 %v4321_v4  ;;  %2462 = vmatpush.msrb.mxu3 %v2437_v33  ;;  %v4227_v34 = vld [vmem:[%s4759_s10 + $0x188] sm:$0xff] }
 0x28f   : > { %v1901_v38 = vadd.f32 %v1825_v14, %v1707_v17  ;;  %1487 = vmatmul.f32.gmra.mxu2 %v4225_v42  ;;  %1681 = vmatmul.f32.gmra.mxu3 %v4273_v58  ;;  %v2436_v42 = vld [vmem:[#allocation3 + $0x110] sm:$0xff]  ;;  %v2111_v17 = vld [vmem:[#allocation3 + $0x8] sm:$0xff] }
 0x290   : > { %2656 = vmatpush.msrb.mxu0 %v2631_v2  ;;  %v2630_v58 = vld [vmem:[#allocation3 + $0x190] sm:$0xff]  ;;  %2463 = vmatpush.msrb.mxu3 %v2436_v42 }
 0x291   : > { %v1937_v54 = vadd.f32 %v5739_v25, %v1901_v38  ;;  %v2110_v38 = vld [vmem:[#allocation3] sm:$0xff]  ;;  %2302 = vmatpush.msrb.mxu2 %v2111_v17  ;;  %v4324_v17 = vld [vmem:[%s4759_s10 + $0x19a] sm:$0xff] }
 0x292   : > { %v1440_v8 = vpop.f32.mrf.mxu2  ;;  %v1634_v14 = vpop.f32.mrf.mxu3  ;;  %2657 = vmatpush.msrb.mxu0 %v2630_v58  ;;  %2464 = vmatpush.msrb.mxu3 %v2435_v52  ;;  %v4276_v52 = vld [vmem:[%s4759_s10 + $0x199] sm:$0xff] }
 0x293   : > { %v1969_v20 = vmax.f32 %v1937_v54, 0.0  ;;  %v1514_v15 = vadd.f32 %v1440_v8, %v1319_v3  ;;  %v1831_v11 = vpop.f32.mrf.mxu0  ;;  %v2628_v3 = vld [vmem:[#allocation3 + $0x180] sm:$0xff]  ;;  %2303 = vmatpush.msrb.mxu2 %v2110_v38  ;;  %v5830_v62 = vpop.f32.mrf.mxu1  ;;  %v1322_v38 = vadd.f32 %v5626_v28, %v5552_v35  ;;  %v1323_v35 = vadd.f32 %v5634_v10, %v5560_v19 }
 0x294   : > { %2658 = vmatpush.msrb.mxu0 %v2629_v23  ;;  %2465 = vmatpush.msrb.mxu3 %v2434_v6  ;;  %v1324_v19 = vadd.f32 %v5648_v26, %v5566_v29  ;;  %v1325_v29 = vadd.f32 %v5666_v49, %v5574_v44  ;;  %v1326_v44 = vadd.f32 %v5687_v16, %v5582_v40 }
 0x295   : > { %2056 = vst [vmem:[#allocation2 + $0x91] sm:$0xff] %v1969_v20  ;;  %v1708_v4 = vadd.f32 %v1634_v14, %v1514_v15  ;;  %2227 = vmatmul.f32.gmra.mxu1 %v1969_v20  ;;  %v4323_v14 = vld [vmem:[%s4759_s10 + $0x18a] sm:$0xff]  ;;  %v1327_v40 = vadd.f32 %v5706_v5, %v5590_v0  ;;  %v1328_v0 = vadd.f32 %v5726_v41, %v5598_v60 }
 0x296   : > { %1878 = vmatmul.f32.gmra.mxu0 %v4322_v43  ;;  %v4275_v20 = vld [vmem:[%s4759_s10 + $0x189] sm:$0xff]  ;;  %v1321_v43 = vadd.f32 %v5614_v18, %v5545_v12  ;;  %v1329_v60 = vadd.f32 %v5748_v9, %v5604_v27  ;;  %v1330_v27 = vadd.f32 %v5759_v55, %v5612_v47  ;;  %v1331_v47 = vadd.f32 %v5766_v21, %v5620_v24 }
 0x297   : > { %v1902_v48 = vadd.f32 %v1828_v46, %v1708_v4  ;;  %1490 = vmatmul.f32.gmra.mxu2 %v4226_v1  ;;  %1684 = vmatmul.f32.gmra.mxu3 %v4274_v56  ;;  %v1332_v24 = vadd.f32 %v5773_v59, %v5628_v7  ;;  %v1333_v59 = vadd.f32 %v5781_v57, %v5636_v45 }
 0x298   : > { %2659 = vmatpush.msrb.mxu0 %v2628_v3  ;;  %v1334_v45 = vadd.f32 %v5792_v37, %v5644_v50  ;;  %v1335_v50 = vadd.f32 %v5800_v22, %v5660_v32  ;;  %v1336_v32 = vadd.f32 %v5810_v31, %v5676_v39  ;;  %v3030_v31 = vld [vmem:[#allocation3 + $0x2f0] sm:$0xff] }
 0x299   : > { %v1938_v13 = vadd.f32 %v5739_v25, %v1902_v48  ;;  %v4228_v48 = vld [vmem:[%s4759_s10 + $0x198] sm:$0xff] }
 0x29a   : > { %v1443_v54 = vpop.f32.mrf.mxu2  ;;  %v1637_v46 = vpop.f32.mrf.mxu3 }
 0x29b   : > { %v1970_v33 = vmax.f32 %v1938_v13, 0.0  ;;  %v1515_v2 = vadd.f32 %v1443_v54, %v1320_v63  ;;  %v1834_v8 = vpop.f32.mrf.mxu0  ;;  %v5838_v12 = vpop.f32.mrf.mxu1 }
 0x29d   : > { %2057 = vst [vmem:[#allocation2 + $0x99] sm:$0xff] %v1970_v33  ;;  %v1709_v36 = vadd.f32 %v1637_v46, %v1515_v2  ;;  %2230 = vmatmul.f32.gmra.mxu1 %v1970_v33  ;;  %v4325_v33 = vld [vmem:[%s4759_s10 + $0x1a2] sm:$0xff] }
 0x29e   : > { %1881 = vmatmul.f32.gmra.mxu0 %v4323_v14  ;;  %v4229_v2 = vld [vmem:[%s4759_s10 + $0x1a0] sm:$0xff] }
 0x29f   : > { %v1903_v15 = vadd.f32 %v1831_v11, %v1709_v36  ;;  %1493 = vmatmul.f32.gmra.mxu2 %v4227_v34  ;;  %1687 = vmatmul.f32.gmra.mxu3 %v4275_v20  ;;  %v2829_v11 = vld [vmem:[#allocation3 + $0x238] sm:$0xff] }
 0x2a0   : > { %2846 = vmatpush.msrb.mxu1 %v2829_v11  ;;  %v4277_v14 = vld [vmem:[%s4759_s10 + $0x1a1] sm:$0xff] }
 0x2a1   : > { %v1939_v1 = vadd.f32 %v5739_v25, %v1903_v15 }
 0x2a2   : > { %v1446_v56 = vpop.f32.mrf.mxu2  ;;  %v1640_v4 = vpop.f32.mrf.mxu3 }
 0x2a3   : > { %v1971_v53 = vmax.f32 %v1939_v1, 0.0  ;;  %v1516_v42 = vadd.f32 %v1446_v56, %v1321_v43  ;;  %v1837_v58 = vpop.f32.mrf.mxu0  ;;  %v5846_v20 = vpop.f32.mrf.mxu1 }
 0x2a5   : > { %2058 = vst [vmem:[#allocation2 + $0xa9] sm:$0xff] %v1971_v53  ;;  %v1710_v23 = vadd.f32 %v1640_v4, %v1516_v42  ;;  %2233 = vmatmul.f32.gmra.mxu1 %v1971_v53  ;;  %v2401_v4 = vld [vmem:[#allocation2 + $0x2] sm:$0xff]  ;;  %v2595_v42 = vld [vmem:[#allocation2 + $0x18] sm:$0xff] }
 0x2a6   : > { %1884 = vmatmul.f32.gmra.mxu0 %v4324_v17 }
 0x2a7   : > { %v1904_v18 = vadd.f32 %v1834_v8, %v1710_v23  ;;  %1496 = vmatmul.f32.gmra.mxu2 %v4228_v48  ;;  %1690 = vmatmul.f32.gmra.mxu3 %v4276_v52  ;;  %v6738_v48 = vmov 0.0  }
 0x2a9   : > { %v1940_v63 = vadd.f32 %v5739_v25, %v1904_v18 }
 0x2aa   : > { %v1449_v13 = vpop.f32.mrf.mxu2  ;;  %v1643_v6 = vpop.f32.mrf.mxu3 }
 0x2ab   : > { %v1972_v3 = vmax.f32 %v1940_v63, 0.0  ;;  %v1517_v54 = vadd.f32 %v1449_v13, %v1322_v38  ;;  %v1840_v46 = vpop.f32.mrf.mxu0  ;;  %v5855_v52 = vpop.f32.mrf.mxu1  ;;  %v2402_v13 = vld [vmem:[#allocation2 + $0xa] sm:$0xff] }
 0x2ad   : > { %2059 = vst [vmem:[#allocation2 + $0xb1] sm:$0xff] %v1972_v3  ;;  %v1711_v34 = vadd.f32 %v1643_v6, %v1517_v54  ;;  %2236 = vmatmul.f32.gmra.mxu1 %v1972_v3  ;;  %v2596_v3 = vld [vmem:[#allocation2 + $0x20] sm:$0xff] }
 0x2ae   : > { %1887 = vmatmul.f32.gmra.mxu0 %v4325_v33 }
 0x2af   : > { %v1905_v8 = vadd.f32 %v1837_v58, %v1711_v34  ;;  %1499 = vmatmul.f32.gmra.mxu2 %v4229_v2  ;;  %1693 = vmatmul.f32.gmra.mxu3 %v4277_v14  ;;  %v2828_v58 = vld [vmem:[#allocation3 + $0x230] sm:$0xff] }
 0x2b0   : > { %2847 = vmatpush.msrb.mxu1 %v2828_v58 }
 0x2b1   : > { %v1941_v28 = vadd.f32 %v5739_v25, %v1905_v8 }
 0x2b2   : > { %v1452_v36 = vpop.f32.mrf.mxu2  ;;  %v1646_v15 = vpop.f32.mrf.mxu3 }
 0x2b3   : > { %v1973_v43 = vmax.f32 %v1941_v28, 0.0  ;;  %v1518_v1 = vadd.f32 %v1452_v36, %v1323_v35  ;;  %v1843_v56 = vpop.f32.mrf.mxu0  ;;  %v2597_v36 = vld [vmem:[#allocation2 + $0x30] sm:$0xff] }
 0x2b5   : > { %2060 = vst [vmem:[#allocation2 + $0xc1] sm:$0xff] %v1973_v43  ;;  %v1712_v53 = vadd.f32 %v1646_v15, %v1518_v1  ;;  %2239 = vmatmul.f32.gmra.mxu1 %v1973_v43  ;;  %v2827_v15 = vld [vmem:[#allocation3 + $0x228] sm:$0xff] }
 0x2b6   : > { %2660 = vmatmul.f32.vlgmr.msrb.gmra.mxu0 %v2595_v42  ;;  %v2403_v43 = vld [vmem:[#allocation2 + $0x1a] sm:$0xff]  ;;  %2848 = vmatpush.msrb.mxu1 %v2827_v15 }
 0x2b7   : > { %v1906_v17 = vadd.f32 %v1840_v46, %v1712_v53  ;;  %2304 = vmatmul.f32.vlgmr.msrb.gmra.mxu2 %v6738_v48  ;;  %2466 = vmatmul.f32.vlgmr.msrb.gmra.mxu3 %v2401_v4  ;;  %v4472_v46 = vld [vmem:[#allocation2] sm:$0xff] }
 0x2b9   : > { %v1942_v10 = vadd.f32 %v5739_v25, %v1906_v17 }
 0x2ba   : > { %v1455_v23 = vpop.f32.mrf.mxu2  ;;  %v1649_v11 = vpop.f32.mrf.mxu3 }
 0x2bb   : > { %v1974_v18 = vmax.f32 %v1942_v10, 0.0  ;;  %v1519_v38 = vadd.f32 %v1455_v23, %v1324_v19  ;;  %v1846_v63 = vpop.f32.mrf.mxu0  ;;  %v2598_v10 = vld [vmem:[#allocation2 + $0x38] sm:$0xff]  ;;  %v2404_v23 = vld [vmem:[#allocation2 + $0x22] sm:$0xff] }
 0x2bd   : > { %2061 = vst [vmem:[#allocation2 + $0xc9] sm:$0xff] %v1974_v18  ;;  %v1713_v6 = vadd.f32 %v1649_v11, %v1519_v38  ;;  %2242 = vmatmul.f32.gmra.mxu1 %v1974_v18 }
 0x2be   : > { %2663 = vmatmul.f32.gmra.mxu0 %v2596_v3 }
 0x2bf   : > { %v1907_v54 = vadd.f32 %v1843_v56, %v1713_v6  ;;  %2307 = vmatmul.f32.gmra.mxu2 %v4472_v46  ;;  %2469 = vmatmul.f32.gmra.mxu3 %v2402_v13  ;;  %v2599_v46 = vld [vmem:[#allocation2 + $0x48] sm:$0xff] }
 0x2c1   : > { %v1943_v26 = vadd.f32 %v5739_v25, %v1907_v54 }
 0x2c2   : > { %v1458_v33 = vpop.f32.mrf.mxu2  ;;  %v1652_v2 = vpop.f32.mrf.mxu3 }
 0x2c3   : > { %v1975_v14 = vmax.f32 %v1943_v26, 0.0  ;;  %v1520_v34 = vadd.f32 %v1458_v33, %v1325_v29  ;;  %v1849_v8 = vpop.f32.mrf.mxu0  ;;  %v5860_v35 = vpop.f32.mrf.mxu1  ;;  %v2826_v29 = vld [vmem:[#allocation3 + $0x220] sm:$0xff] }
 0x2c4   : > { %v2405_v26 = vld [vmem:[#allocation2 + $0x32] sm:$0xff]  ;;  %2849 = vmatpush.msrb.mxu1 %v2826_v29 }
 0x2c5   : > { %2062 = vst [vmem:[#allocation2 + $0xd9] sm:$0xff] %v1975_v14  ;;  %v1714_v28 = vadd.f32 %v1652_v2, %v1520_v34  ;;  %2245 = vmatmul.f32.gmra.mxu1 %v1975_v14  ;;  %v2408_v29 = vld [vmem:[#allocation2 + $0x52] sm:$0xff] }
 0x2c6   : > { %2666 = vmatmul.f32.gmra.mxu0 %v2597_v36 }
 0x2c7   : > { %v1908_v1 = vadd.f32 %v1846_v63, %v1714_v28  ;;  %2310 = vmatmul.f32.gmra.mxu2 %v2595_v42  ;;  %2472 = vmatmul.f32.gmra.mxu3 %v2403_v43  ;;  %v2600_v43 = vld [vmem:[#allocation2 + $0x50] sm:$0xff] }
 0x2c9   : > { %v1944_v49 = vadd.f32 %v5739_v25, %v1908_v1  ;;  %v2406_v1 = vld [vmem:[#allocation2 + $0x3a] sm:$0xff] }
 0x2ca   : > { %v1461_v56 = vpop.f32.mrf.mxu2  ;;  %v1655_v4 = vpop.f32.mrf.mxu3 }
 0x2cb   : > { %v1976_v53 = vmax.f32 %v1944_v49, 0.0  ;;  %v1521_v58 = vadd.f32 %v1461_v56, %v1326_v44  ;;  %v1852_v17 = vpop.f32.mrf.mxu0  ;;  %v5865_v48 = vpop.f32.mrf.mxu1 }
 0x2cd   : > { %2063 = vst [vmem:[#allocation2 + $0xe1] sm:$0xff] %v1976_v53  ;;  %v1715_v19 = vadd.f32 %v1655_v4, %v1521_v58  ;;  %2248 = vmatmul.f32.gmra.mxu1 %v1976_v53 }
 0x2ce   : > { %2669 = vmatmul.f32.gmra.mxu0 %v2598_v10 }
 0x2cf   : > { %v1909_v42 = vadd.f32 %v1849_v8, %v1715_v19  ;;  %2313 = vmatmul.f32.gmra.mxu2 %v2596_v3  ;;  %2475 = vmatmul.f32.gmra.mxu3 %v2404_v23  ;;  %v2601_v19 = vld [vmem:[#allocation2 + $0x60] sm:$0xff]  ;;  %v2825_v23 = vld [vmem:[#allocation3 + $0x218] sm:$0xff] }
 0x2d0   : > { %2850 = vmatpush.msrb.mxu1 %v2825_v23 }
 0x2d1   : > { %v1945_v16 = vadd.f32 %v5739_v25, %v1909_v42  ;;  %v2407_v42 = vld [vmem:[#allocation2 + $0x4a] sm:$0xff] }
 0x2d2   : > { %v1464_v11 = vpop.f32.mrf.mxu2  ;;  %v1658_v18 = vpop.f32.mrf.mxu3 }
 0x2d3   : > { %v1977_v38 = vmax.f32 %v1945_v16, 0.0  ;;  %v1522_v63 = vadd.f32 %v1464_v11, %v1327_v40  ;;  %v1855_v13 = vpop.f32.mrf.mxu0  ;;  %v5870_v6 = vpop.f32.mrf.mxu1 }
 0x2d5   : > { %2064 = vst [vmem:[#allocation2 + $0xf1] sm:$0xff] %v1977_v38  ;;  %v1716_v54 = vadd.f32 %v1658_v18, %v1522_v63  ;;  %2251 = vmatmul.f32.gmra.mxu1 %v1977_v38 }
 0x2d6   : > { %2672 = vmatmul.f32.gmra.mxu0 %v2599_v46 }
 0x2d7   : > { %v1910_v3 = vadd.f32 %v1852_v17, %v1716_v54  ;;  %2316 = vmatmul.f32.gmra.mxu2 %v2597_v36  ;;  %2478 = vmatmul.f32.gmra.mxu3 %v2405_v26  ;;  %v2602_v54 = vld [vmem:[#allocation2 + $0x68] sm:$0xff] }
 0x2d9   : > { %v1946_v5 = vadd.f32 %v5739_v25, %v1910_v3 }
 0x2da   : > { %v1467_v33 = vpop.f32.mrf.mxu2  ;;  %v1661_v2 = vpop.f32.mrf.mxu3 }
 0x2db   : > { %v1978_v14 = vmax.f32 %v1946_v5, 0.0  ;;  %v1523_v34 = vadd.f32 %v1467_v33, %v1328_v0  ;;  %v1858_v8 = vpop.f32.mrf.mxu0  ;;  %v5875_v28 = vpop.f32.mrf.mxu1 }
 0x2dd   : > { %2065 = vst [vmem:[#allocation2 + $0xf9] sm:$0xff] %v1978_v14  ;;  %v1717_v15 = vadd.f32 %v1661_v2, %v1523_v34  ;;  %2254 = vmatmul.f32.gmra.mxu1 %v1978_v14  ;;  %v2603_v34 = vld [vmem:[#allocation2 + $0x78] sm:$0xff] }
 0x2de   : > { %2675 = vmatmul.f32.gmra.mxu0 %v2600_v43 }
 0x2df   : > { %v1911_v36 = vadd.f32 %v1855_v13, %v1717_v15  ;;  %2319 = vmatmul.f32.gmra.mxu2 %v2598_v10  ;;  %2481 = vmatmul.f32.gmra.mxu3 %v2406_v1  ;;  %v2409_v15 = vld [vmem:[#allocation2 + $0x62] sm:$0xff] }
 0x2e1   : > { %v1947_v41 = vadd.f32 %v5739_v25, %v1911_v36 }
 0x2e2   : > { %v1470_v44 = vpop.f32.mrf.mxu2  ;;  %v1664_v49 = vpop.f32.mrf.mxu3 }
 0x2e3   : > { %v1979_v56 = vmax.f32 %v1947_v41, 0.0  ;;  %v1524_v4 = vadd.f32 %v1470_v44, %v1329_v60  ;;  %v1861_v53 = vpop.f32.mrf.mxu0  ;;  %v5880_v58 = vpop.f32.mrf.mxu1 }
 0x2e5   : > { %2066 = vst [vmem:[#allocation2 + $0x109] sm:$0xff] %v1979_v56  ;;  %v1718_v17 = vadd.f32 %v1664_v49, %v1524_v4  ;;  %2257 = vmatmul.f32.gmra.mxu1 %v1979_v56  ;;  %v2604_v4 = vld [vmem:[#allocation2 + $0x80] sm:$0xff] }
 0x2e6   : > { %2678 = vmatmul.f32.gmra.mxu0 %v2601_v19 }
 0x2e7   : > { %v1912_v10 = vadd.f32 %v1858_v8, %v1718_v17  ;;  %2322 = vmatmul.f32.gmra.mxu2 %v2599_v46  ;;  %2484 = vmatmul.f32.gmra.mxu3 %v2407_v42  ;;  %v2824_v8 = vld [vmem:[#allocation3 + $0x210] sm:$0xff] }
 0x2e8   : > { %2851 = vmatpush.msrb.mxu1 %v2824_v8 }
 0x2e9   : > { %v1948_v9 = vadd.f32 %v5739_v25, %v1912_v10 }
 0x2ea   : > { %v1473_v40 = vpop.f32.mrf.mxu2  ;;  %v1667_v16 = vpop.f32.mrf.mxu3 }
 0x2eb   : > { %v1980_v11 = vmax.f32 %v1948_v9, 0.0  ;;  %v1525_v18 = vadd.f32 %v1473_v40, %v1330_v27  ;;  %v1864_v38 = vpop.f32.mrf.mxu0  ;;  %v5885_v63 = vpop.f32.mrf.mxu1 }
 0x2ed   : > { %2067 = vst [vmem:[#allocation2 + $0x111] sm:$0xff] %v1980_v11  ;;  %v1719_v13 = vadd.f32 %v1667_v16, %v1525_v18  ;;  %2260 = vmatmul.f32.gmra.mxu1 %v1980_v11  ;;  %v2605_v16 = vld [vmem:[#allocation2 + $0x90] sm:$0xff]  ;;  %v2823_v11 = vld [vmem:[#allocation3 + $0x208] sm:$0xff] }
 0x2ee   : > { %2681 = vmatmul.f32.gmra.mxu0 %v2602_v54  ;;  %v2411_v18 = vld [vmem:[#allocation2 + $0x7a] sm:$0xff]  ;;  %2852 = vmatpush.msrb.mxu1 %v2823_v11 }
 0x2ef   : > { %v1913_v46 = vadd.f32 %v1861_v53, %v1719_v13  ;;  %2325 = vmatmul.f32.gmra.mxu2 %v2600_v43  ;;  %2487 = vmatmul.f32.gmra.mxu3 %v2408_v29  ;;  %v2410_v53 = vld [vmem:[#allocation2 + $0x6a] sm:$0xff] }
 0x2f1   : > { %v1949_v55 = vadd.f32 %v5739_v25, %v1913_v46  ;;  %v5897_v25 = vld [vmem:[%s6720_s2] ss:$0 sm:$0xff] }
 0x2f2   : > { %v1476_v26 = vpop.f32.mrf.mxu2  ;;  %v1670_v3 = vpop.f32.mrf.mxu3 }
 0x2f3   : > { %v1981_v0 = vmax.f32 %v1949_v55, 0.0  ;;  %v1526_v5 = vadd.f32 %v1476_v26, %v1331_v47  ;;  %v1867_v33 = vpop.f32.mrf.mxu0  ;;  %v5890_v2 = vpop.f32.mrf.mxu1 }
 0x2f5   : > { %2068 = vst [vmem:[#allocation2 + $0x121] sm:$0xff] %v1981_v0  ;;  %v1720_v14 = vadd.f32 %v1670_v3, %v1526_v5  ;;  %2263 = vmatmul.f32.gmra.mxu1 %v1981_v0  ;;  %v2606_v3 = vld [vmem:[#allocation2 + $0x98] sm:$0xff]  ;;  %v2412_v0 = vld [vmem:[#allocation2 + $0x82] sm:$0xff] }
 0x2f6   : > { %2684 = vmatmul.f32.gmra.mxu0 %v2603_v34 }
 0x2f7   : > { %v1914_v43 = vadd.f32 %v1864_v38, %v1720_v14  ;;  %2328 = vmatmul.f32.gmra.mxu2 %v2601_v19  ;;  %2490 = vmatmul.f32.gmra.mxu3 %v2409_v15 }
 0x2f9   : > { %v1950_v21 = vadd.f32 %v5897_v25, %v1914_v43 }
 0x2fa   : > { %v1479_v1 = vpop.f32.mrf.mxu2  ;;  %v1673_v36 = vpop.f32.mrf.mxu3 }
 0x2fb   : > { %v1982_v60 = vmax.f32 %v1950_v21, 0.0  ;;  %v1527_v41 = vadd.f32 %v1479_v1, %v1332_v24  ;;  %v1870_v44 = vpop.f32.mrf.mxu0  ;;  %v5900_v49 = vpop.f32.mrf.mxu1  ;;  %v2822_v24 = vld [vmem:[#allocation3 + $0x200] sm:$0xff]  ;;  %v2607_v1 = vld [vmem:[#allocation2 + $0xa8] sm:$0xff] }
 0x2fc   : > { %2853 = vmatpush.msrb.mxu1 %v2822_v24  ;;  %v2416_v24 = vld [vmem:[#allocation2 + $0xb2] sm:$0xff] }
 0x2fd   : > { %2069 = vst [vmem:[#allocation2 + $0x129] sm:$0xff] %v1982_v60  ;;  %v1721_v56 = vadd.f32 %v1673_v36, %v1527_v41  ;;  %2266 = vmatmul.f32.gmra.mxu1 %v1982_v60  ;;  %v3031_v36 = vld [vmem:[#allocation3 + $0x2f8] sm:$0xff]  ;;  %v2413_v60 = vld [vmem:[#allocation2 + $0x92] sm:$0xff] }
 0x2fe   : > { %2687 = vmatmul.f32.gmra.mxu0 %v2604_v4  ;;  %3032 = vmatpush.msra.mxu2 %v3031_v36 }
 0x2ff   : > { %v1915_v7 = vadd.f32 %v1867_v33, %v1721_v56  ;;  %2331 = vmatmul.f32.gmra.mxu2 %v2602_v54  ;;  %2493 = vmatmul.f32.gmra.mxu3 %v2410_v53 }
 0x300   : > { %3033 = vmatpush.msra.mxu2 %v3030_v31 }
 0x301   : > { %v1951_v17 = vadd.f32 %v5897_v25, %v1915_v7 }
 0x302   : > { %v1482_v19 = vpop.f32.mrf.mxu2  ;;  %v1676_v23 = vpop.f32.mrf.mxu3 }
 0x303   : > { %v1983_v42 = vmax.f32 %v1951_v17, 0.0  ;;  %v1528_v10 = vadd.f32 %v1482_v19, %v1333_v59  ;;  %v1873_v27 = vpop.f32.mrf.mxu0  ;;  %v5905_v9 = vpop.f32.mrf.mxu1  ;;  %v2608_v17 = vld [vmem:[#allocation2 + $0xb0] sm:$0xff] }
 0x305   : > { %2070 = vst [vmem:[#allocation2 + $0x139] sm:$0xff] %v1983_v42  ;;  %v1722_v40 = vadd.f32 %v1676_v23, %v1528_v10  ;;  %2269 = vmatmul.f32.gmra.mxu1 %v1983_v42  ;;  %v3226_v23 = vld [vmem:[#allocation3 + $0x378] sm:$0xff] }
 0x306   : > { %2690 = vmatmul.f32.gmra.mxu0 %v2605_v16  ;;  %v3420_v42 = vld [vmem:[#allocation3 + $0x3f8] sm:$0xff]  ;;  %3227 = vmatpush.msra.mxu3 %v3226_v23 }
 0x307   : > { %v1916_v38 = vadd.f32 %v1870_v44, %v1722_v40  ;;  %2334 = vmatmul.f32.gmra.mxu2 %v2603_v34  ;;  %2496 = vmatmul.f32.gmra.mxu3 %v2411_v18  ;;  %v3614_v10 = vld [vmem:[#allocation3 + $0x478] sm:$0xff]  ;;  %v1337_v40 = vadd.f32 %v5819_v30, %v5692_v61  ;;  %v1338_v61 = vadd.f32 %v5830_v62, %v5708_v51  ;;  %v3029_v51 = vld [vmem:[#allocation3 + $0x2e8] sm:$0xff]  ;;  %v6739_v62 = vld [vmem:[#allocation9_spill] sm:$0xff] }
 0x308   : > { %3421 = vmatpush.msra.mxu0 %v3420_v42  ;;  %3615 = vmatpush.msra.mxu1 %v3614_v10 }
 0x309   : > { %v1952_v57 = vadd.f32 %v5897_v25, %v1916_v38  ;;  %3034 = vmatpush.msra.mxu2 %v3029_v51  ;;  %v3417_v51 = vld [vmem:[#allocation3 + $0x3e0] sm:$0xff] }
 0x30a   : > { %v1485_v13 = vpop.f32.mrf.mxu2  ;;  %v1679_v54 = vpop.f32.mrf.mxu3 }
 0x30b   : > { %v1984_v29 = vmax.f32 %v1952_v57, 0.0  ;;  %v1529_v46 = vadd.f32 %v1485_v13, %v1334_v45  ;;  %v1876_v47 = vpop.f32.mrf.mxu0  ;;  %v5910_v55 = vpop.f32.mrf.mxu1 }
 0x30d   : > { %2071 = vst [vmem:[#allocation2 + $0x141] sm:$0xff] %v1984_v29  ;;  %v1723_v26 = vadd.f32 %v1679_v54, %v1529_v46  ;;  %2272 = vmatmul.f32.gmra.mxu1 %v1984_v29  ;;  %v2609_v29 = vld [vmem:[#allocation2 + $0xc0] sm:$0xff] }
 0x30e   : > { %2693 = vmatmul.f32.gmra.mxu0 %v2606_v3  ;;  %v3225_v46 = vld [vmem:[#allocation3 + $0x370] sm:$0xff] }
 0x30f   : > { %v1917_v5 = vadd.f32 %v1873_v27, %v1723_v26  ;;  %2337 = vmatmul.f32.gmra.mxu2 %v2604_v4  ;;  %2499 = vmatmul.f32.gmra.mxu3 %v2412_v0  ;;  %v2414_v27 = vld [vmem:[#allocation2 + $0x9a] sm:$0xff] }
 0x310   : > { %3228 = vmatpush.msra.mxu3 %v3225_v46 }
 0x311   : > { %v1953_v37 = vadd.f32 %v5897_v25, %v1917_v5 }
 0x312   : > { %v1488_v33 = vpop.f32.mrf.mxu2  ;;  %v1682_v14 = vpop.f32.mrf.mxu3 }
 0x313   : > { %v1985_v34 = vmax.f32 %v1953_v37, 0.0  ;;  %v1530_v8 = vadd.f32 %v1488_v33, %v1335_v50  ;;  %v1879_v15 = vpop.f32.mrf.mxu0  ;;  %v5915_v43 = vpop.f32.mrf.mxu1 }
 0x315   : > { %2072 = vst [vmem:[#allocation2 + $0x151] sm:$0xff] %v1985_v34  ;;  %v1724_v21 = vadd.f32 %v1682_v14, %v1530_v8  ;;  %2275 = vmatmul.f32.gmra.mxu1 %v1985_v34  ;;  %v2610_v34 = vld [vmem:[#allocation2 + $0xc8] sm:$0xff]  ;;  %v3419_v8 = vld [vmem:[#allocation3 + $0x3f0] sm:$0xff] }
 0x316   : > { %2696 = vmatmul.f32.gmra.mxu0 %v2607_v1 }
 0x317   : > { %v1918_v41 = vadd.f32 %v1876_v47, %v1724_v21  ;;  %2340 = vmatmul.f32.gmra.mxu2 %v2605_v16  ;;  %2502 = vmatmul.f32.gmra.mxu3 %v2413_v60  ;;  %v2415_v47 = vld [vmem:[#allocation2 + $0xaa] sm:$0xff] }
 0x318   : > { %3422 = vmatpush.msra.mxu0 %v3419_v8 }
 0x319   : > { %v1954_v22 = vadd.f32 %v5897_v25, %v1918_v41 }
 0x31a   : > { %v1491_v44 = vpop.f32.mrf.mxu2  ;;  %v1685_v56 = vpop.f32.mrf.mxu3 }
 0x31b   : > { %v1986_v4 = vmax.f32 %v1954_v22, 0.0  ;;  %v1531_v53 = vadd.f32 %v1491_v44, %v1336_v32  ;;  %v1882_v7 = vpop.f32.mrf.mxu0  ;;  %v5920_v59 = vpop.f32.mrf.mxu1 }
 0x31d   : > { %2073 = vst [vmem:[#allocation2 + $0x159] sm:$0xff] %v1986_v4  ;;  %v1725_v19 = vadd.f32 %v1685_v56, %v1531_v53  ;;  %2278 = vmatmul.f32.gmra.mxu1 %v1986_v4  ;;  %v2789_v4 = vld [vmem:[#allocation2 + $0x19] sm:$0xff] }
 0x31e   : > { %2699 = vmatmul.f32.gmra.mxu0 %v2608_v17 }
 0x31f   : > { %v1919_v39 = vadd.f32 %v1879_v15, %v1725_v19  ;;  %2343 = vmatmul.f32.gmra.mxu2 %v2606_v3  ;;  %2505 = vmatmul.f32.gmra.mxu3 %v2414_v27  ;;  %v3613_v15 = vld [vmem:[#allocation3 + $0x470] sm:$0xff] }
 0x320   : > { %3616 = vmatpush.msra.mxu1 %v3613_v15  ;;  %v2417_v19 = vld [vmem:[#allocation2 + $0xc2] sm:$0xff]  ;;  %v5954_v15 = vld [vmem:[#allocation2 + $0x39] sm:$0xff] }
 0x321   : > { %v1955_v16 = vadd.f32 %v5897_v25, %v1919_v39 }
 0x322   : > { %v1494_v11 = vpop.f32.mrf.mxu2  ;;  %v1688_v18 = vpop.f32.mrf.mxu3 }
 0x323   : > { %v1987_v38 = vmax.f32 %v1955_v16, 0.0  ;;  %v1532_v45 = vadd.f32 %v1494_v11, %v1337_v40  ;;  %v1885_v57 = vpop.f32.mrf.mxu0  ;;  %v5925_v13 = vpop.f32.mrf.mxu1  ;;  %v2790_v16 = vld [vmem:[#allocation2 + $0x21] sm:$0xff] }
 0x325   : > { %2074 = vst [vmem:[#allocation2 + $0x169] sm:$0xff] %v1987_v38  ;;  %v1726_v54 = vadd.f32 %v1688_v18, %v1532_v45  ;;  %2281 = vmatmul.f32.gmra.mxu1 %v1987_v38  ;;  %v2612_v18 = vld [vmem:[#allocation2 + $0xe0] sm:$0xff]  ;;  %v3418_v38 = vld [vmem:[#allocation3 + $0x3e8] sm:$0xff] }
 0x326   : > { %2702 = vmatmul.f32.gmra.mxu0 %v2609_v29  ;;  %v3612_v45 = vld [vmem:[#allocation3 + $0x468] sm:$0xff] }
 0x327   : > { %v1920_v26 = vadd.f32 %v1882_v7, %v1726_v54  ;;  %2346 = vmatmul.f32.gmra.mxu2 %v2607_v1  ;;  %2508 = vmatmul.f32.gmra.mxu3 %v2415_v47  ;;  %v1339_v1 = vadd.f32 %v5838_v12, %v6739_v62  ;;  %v2611_v7 = vld [vmem:[#allocation2 + $0xd8] sm:$0xff]  ;;  %v3611_v62 = vld [vmem:[#allocation3 + $0x460] sm:$0xff] }
 0x328   : > { %3617 = vmatpush.msra.mxu1 %v3612_v45  ;;  %3423 = vmatpush.msra.mxu0 %v3418_v38  ;;  %v2422_v38 = vld [vmem:[#allocation2 + $0xfa] sm:$0xff] }
 0x329   : > { %v1956_v30 = vadd.f32 %v5897_v25, %v1920_v26  ;;  %v3026_v45 = vld [vmem:[#allocation3 + $0x2d0] sm:$0xff] }
 0x32a   : > { %v1497_v3 = vpop.f32.mrf.mxu2  ;;  %v1691_v0 = vpop.f32.mrf.mxu3  ;;  %3618 = vmatpush.msra.mxu1 %v3611_v62  ;;  %3424 = vmatpush.msra.mxu0 %v3417_v51  ;;  %v2618_v62 = vld [vmem:[#allocation2 + $0x128] sm:$0xff] }
 0x32b   : > { %v1988_v5 = vmax.f32 %v1956_v30, 0.0  ;;  %v1533_v50 = vadd.f32 %v1497_v3, %v1338_v61  ;;  %v1888_v37 = vpop.f32.mrf.mxu0  ;;  %v5930_v33 = vpop.f32.mrf.mxu1  ;;  %v5946_v61 = vld [vmem:[#allocation2 + $0x31] sm:$0xff] }
 0x32c   : > { %v2613_v3 = vld [vmem:[#allocation2 + $0xf0] sm:$0xff] }
 0x32d   : > { %2075 = vst [vmem:[#allocation2 + $0x171] sm:$0xff] %v1988_v5  ;;  %v1727_v14 = vadd.f32 %v1691_v0, %v1533_v50  ;;  %2284 = vmatmul.f32.gmra.mxu1 %v1988_v5  ;;  %v3223_v0 = vld [vmem:[#allocation3 + $0x360] sm:$0xff]  ;;  %v2419_v5 = vld [vmem:[#allocation2 + $0xda] sm:$0xff] }
 0x32e   : > { %2705 = vmatmul.f32.gmra.mxu0 %v2610_v34 }
 0x32f   : > { %v1921_v21 = vadd.f32 %v1885_v57, %v1727_v14  ;;  %2349 = vmatmul.f32.gmra.mxu2 %v2608_v17  ;;  %2511 = vmatmul.f32.gmra.mxu3 %v2416_v24  ;;  %v3224_v17 = vld [vmem:[#allocation3 + $0x368] sm:$0xff]  ;;  %v2418_v57 = vld [vmem:[#allocation2 + $0xca] sm:$0xff] }
 0x330   : > { %3229 = vmatpush.msra.mxu3 %v3224_v17  ;;  %v3222_v17 = vld [vmem:[#allocation3 + $0x358] sm:$0xff] }
 0x331   : > { %v1957_v36 = vadd.f32 %v5897_v25, %v1921_v21  ;;  %v2614_v21 = vld [vmem:[#allocation2 + $0xf8] sm:$0xff] }
 0x332   : > { %v1500_v60 = vpop.f32.mrf.mxu2  ;;  %v1694_v41 = vpop.f32.mrf.mxu3  ;;  %3230 = vmatpush.msra.mxu3 %v3223_v0  ;;  %v3221_v0 = vld [vmem:[#allocation3 + $0x350] sm:$0xff] }
 0x333   : > { %v1989_v32 = vmax.f32 %v1957_v36, 0.0  ;;  %v1534_v22 = vadd.f32 %v1500_v60, %v1339_v1  ;;  %v2661_v44 = vpop.f32.mrf.mxu0  ;;  %v5935_v56 = vpop.f32.mrf.mxu1  ;;  %v2420_v1 = vld [vmem:[#allocation2 + $0xe2] sm:$0xff] }
 0x334   : > { %v3027_v36 = vld [vmem:[#allocation3 + $0x2d8] sm:$0xff]  ;;  %3231 = vmatpush.msra.mxu3 %v3222_v17 }
 0x335   : > { %2076 = vst [vmem:[#allocation2 + $0x181] sm:$0xff] %v1989_v32  ;;  %v1728_v53 = vadd.f32 %v1694_v41, %v1534_v22  ;;  %2854 = vmatmul.f32.vlgmr.msrb.gmra.mxu1 %v2789_v4  ;;  %v5962_v4 = vld [vmem:[#allocation2 + $0x49] sm:$0xff] }
 0x336   : > { %2708 = vmatmul.f32.gmra.mxu0 %v2611_v7  ;;  %3232 = vmatpush.msra.mxu3 %v3221_v0 }
 0x337   : > { %v1922_v23 = vadd.f32 %v1888_v37, %v1728_v53  ;;  %2352 = vmatmul.f32.gmra.mxu2 %v2609_v29  ;;  %2514 = vmatmul.f32.gmra.mxu3 %v2417_v19  ;;  %v2421_v19 = vld [vmem:[#allocation2 + $0xf2] sm:$0xff] }
 0x339   : > { %v1958_v12 = vadd.f32 %v5897_v25, %v1922_v23  ;;  %v3028_v25 = vld [vmem:[#allocation3 + $0x2e0] sm:$0xff] }
 0x33a   : > { %v2305_v42 = vpop.f32.mrf.mxu2  ;;  %v2467_v10 = vpop.f32.mrf.mxu3  ;;  %3035 = vmatpush.msra.mxu2 %v3028_v25 }
 0x33b   : > { %v1990_v27 = vmax.f32 %v1958_v12, 0.0  ;;  %v2306_v39 = vadd.f32 %v2305_v42, %v5846_v20  ;;  %v2664_v31 = vpop.f32.mrf.mxu0  ;;  %v5939_v40 = vpop.f32.mrf.mxu1 }
 0x33c   : > { %3036 = vmatpush.msra.mxu2 %v3027_v36  ;;  %v3609_v36 = vld [vmem:[#allocation3 + $0x450] sm:$0xff] }
 0x33d   : > { %2077 = vst [vmem:[#allocation2 + $0x189] sm:$0xff] %v1990_v27  ;;  %v2563_v11 = vadd.f32 %v2467_v10, %v2306_v39  ;;  %2857 = vmatmul.f32.gmra.mxu1 %v2790_v16  ;;  %v5970_v39 = vld [vmem:[#allocation2 + $0x51] sm:$0xff] }
 0x33e   : > { %2711 = vmatmul.f32.gmra.mxu0 %v2612_v18  ;;  %v2616_v16 = vld [vmem:[#allocation2 + $0x110] sm:$0xff]  ;;  %3037 = vmatpush.msra.mxu2 %v3026_v45  ;;  %v6002_v45 = vld [vmem:[#allocation2 + $0x81] sm:$0xff] }
 0x33f   : > { %2355 = vmatmul.f32.gmra.mxu2 %v2610_v34  ;;  %2517 = vmatmul.f32.gmra.mxu3 %v2418_v57  ;;  %v5941_v54 = vadd.f32 %v2661_v44, %v2563_v11  ;;  %v3416_v11 = vld [vmem:[#allocation3 + $0x3d8] sm:$0xff] }
 0x340   : > { %3425 = vmatpush.msra.mxu0 %v3416_v11 }
 0x342   : > { %v2308_v20 = vpop.f32.mrf.mxu2  ;;  %v2470_v29 = vpop.f32.mrf.mxu3 }
 0x343   : > { %v2309_v46 = vadd.f32 %v2308_v20, %v5855_v52  ;;  %v2667_v47 = vpop.f32.mrf.mxu0  ;;  %v5944_v26 = vpop.f32.mrf.mxu1 }
 0x345   : > { %v2564_v30 = vadd.f32 %v2470_v29, %v2309_v46  ;;  %2860 = vmatmul.f32.gmra.mxu1 %v5946_v61 }
 0x346   : > { %2714 = vmatmul.f32.gmra.mxu0 %v2613_v3 }
 0x347   : > { %2358 = vmatmul.f32.gmra.mxu2 %v2611_v7  ;;  %2520 = vmatmul.f32.gmra.mxu3 %v2419_v5  ;;  %v5949_v50 = vadd.f32 %v2664_v31, %v2564_v30  ;;  %v2615_v7 = vld [vmem:[#allocation2 + $0x108] sm:$0xff] }
 0x348   : > { %v2423_v5 = vld [vmem:[#allocation2 + $0x10a] sm:$0xff] }
 0x34a   : > { %v2311_v37 = vpop.f32.mrf.mxu2  ;;  %v2473_v14 = vpop.f32.mrf.mxu3 }
 0x34b   : > { %v2312_v52 = vadd.f32 %v2311_v37, %v5860_v35  ;;  %v2670_v34 = vpop.f32.mrf.mxu0  ;;  %v5952_v8 = vpop.f32.mrf.mxu1 }
 0x34d   : > { %v2565_v24 = vadd.f32 %v2473_v14, %v2312_v52  ;;  %2863 = vmatmul.f32.gmra.mxu1 %v5954_v15 }
 0x34e   : > { %2717 = vmatmul.f32.gmra.mxu0 %v2614_v21 }
 0x34f   : > { %2361 = vmatmul.f32.gmra.mxu2 %v2612_v18  ;;  %2523 = vmatmul.f32.gmra.mxu3 %v2420_v1  ;;  %v5957_v60 = vadd.f32 %v2667_v47, %v2565_v24  ;;  %v3610_v18 = vld [vmem:[#allocation3 + $0x458] sm:$0xff]  ;;  %v3415_v1 = vld [vmem:[#allocation3 + $0x3d0] sm:$0xff] }
 0x350   : > { %3619 = vmatpush.msra.mxu1 %v3610_v18  ;;  %v5978_v47 = vld [vmem:[#allocation2 + $0x61] sm:$0xff]  ;;  %3426 = vmatpush.msra.mxu0 %v3415_v1  ;;  %v6012_v1 = vld [vmem:[#allocation2 + $0x150] sm:$0xff] }
 0x352   : > { %v2314_v35 = vpop.f32.mrf.mxu2  ;;  %v2476_v41 = vpop.f32.mrf.mxu3  ;;  %3620 = vmatpush.msra.mxu1 %v3609_v36  ;;  %v3413_v36 = vld [vmem:[#allocation3 + $0x3c0] sm:$0xff] }
 0x353   : > { %v2315_v32 = vadd.f32 %v2314_v35, %v5865_v48  ;;  %v2673_v22 = vpop.f32.mrf.mxu0  ;;  %v5960_v44 = vpop.f32.mrf.mxu1  ;;  %v2424_v35 = vld [vmem:[#allocation2 + $0x112] sm:$0xff] }
 0x355   : > { %v2566_v53 = vadd.f32 %v2476_v41, %v2315_v32  ;;  %2866 = vmatmul.f32.gmra.mxu1 %v5962_v4  ;;  %v3025_v41 = vld [vmem:[#allocation3 + $0x2c8] sm:$0xff] }
 0x356   : > { %2720 = vmatmul.f32.gmra.mxu0 %v2615_v7  ;;  %3038 = vmatpush.msra.mxu2 %v3025_v41  ;;  %v3023_v41 = vld [vmem:[#allocation3 + $0x2b8] sm:$0xff] }
 0x357   : > { %2364 = vmatmul.f32.gmra.mxu2 %v2613_v3  ;;  %2526 = vmatmul.f32.gmra.mxu3 %v2421_v19  ;;  %v5965_v23 = vadd.f32 %v2670_v34, %v2566_v53  ;;  %v2617_v3 = vld [vmem:[#allocation2 + $0x120] sm:$0xff] }
 0x358   : > { %v5994_v19 = vld [vmem:[#allocation2 + $0x79] sm:$0xff] }
 0x35a   : > { %v2317_v12 = vpop.f32.mrf.mxu2  ;;  %v2479_v42 = vpop.f32.mrf.mxu3 }
 0x35b   : > { %v2318_v48 = vadd.f32 %v2317_v12, %v5870_v6  ;;  %v2676_v10 = vpop.f32.mrf.mxu0  ;;  %v5968_v27 = vpop.f32.mrf.mxu1 }
 0x35d   : > { %v2567_v31 = vadd.f32 %v2479_v42, %v2318_v48  ;;  %2869 = vmatmul.f32.gmra.mxu1 %v5970_v39  ;;  %v2619_v42 = vld [vmem:[#allocation2 + $0x138] sm:$0xff] }
 0x35e   : > { %2723 = vmatmul.f32.gmra.mxu0 %v2616_v16  ;;  %v3220_v48 = vld [vmem:[#allocation3 + $0x348] sm:$0xff] }
 0x35f   : > { %2367 = vmatmul.f32.gmra.mxu2 %v2614_v21  ;;  %2529 = vmatmul.f32.gmra.mxu3 %v2422_v38  ;;  %v5973_v57 = vadd.f32 %v2673_v22, %v2567_v31  ;;  %v5986_v21 = vld [vmem:[#allocation2 + $0x69] sm:$0xff] }
 0x360   : > { %3233 = vmatpush.msra.mxu3 %v3220_v48 }
 0x362   : > { %v2320_v6 = vpop.f32.mrf.mxu2  ;;  %v2482_v25 = vpop.f32.mrf.mxu3 }
 0x363   : > { %v2321_v20 = vadd.f32 %v2320_v6, %v5875_v28  ;;  %v2679_v29 = vpop.f32.mrf.mxu0  ;;  %v5976_v46 = vpop.f32.mrf.mxu1 }
 0x365   : > { %v2568_v30 = vadd.f32 %v2482_v25, %v2321_v20  ;;  %2872 = vmatmul.f32.gmra.mxu1 %v5978_v47  ;;  %v2620_v25 = vld [vmem:[#allocation2 + $0x140] sm:$0xff]  ;;  %v3414_v20 = vld [vmem:[#allocation3 + $0x3c8] sm:$0xff] }
 0x366   : > { %2726 = vmatmul.f32.gmra.mxu0 %v2617_v3 }
 0x367   : > { %2370 = vmatmul.f32.gmra.mxu2 %v2615_v7  ;;  %2532 = vmatmul.f32.gmra.mxu3 %v2423_v5  ;;  %v5981_v37 = vadd.f32 %v2676_v10, %v2568_v30  ;;  %v2425_v10 = vld [vmem:[#allocation2 + $0x122] sm:$0xff]  ;;  %v2426_v30 = vld [vmem:[#allocation2 + $0x12a] sm:$0xff] }
 0x368   : > { %3427 = vmatpush.msra.mxu0 %v3414_v20  ;;  %v2428_v20 = vld [vmem:[#allocation2 + $0x142] sm:$0xff] }
 0x36a   : > { %v2323_v14 = vpop.f32.mrf.mxu2  ;;  %v2485_v52 = vpop.f32.mrf.mxu3  ;;  %3428 = vmatpush.msra.mxu0 %v3413_v36 }
 0x36b   : > { %v2324_v28 = vadd.f32 %v2323_v14, %v5880_v58  ;;  %v2682_v34 = vpop.f32.mrf.mxu0  ;;  %v5984_v24 = vpop.f32.mrf.mxu1 }
 0x36d   : > { %v2569_v51 = vadd.f32 %v2485_v52, %v2324_v28  ;;  %2875 = vmatmul.f32.gmra.mxu1 %v5986_v21 }
 0x36e   : > { %2729 = vmatmul.f32.gmra.mxu0 %v2618_v62 }
 0x36f   : > { %2373 = vmatmul.f32.gmra.mxu2 %v2616_v16  ;;  %2535 = vmatmul.f32.gmra.mxu3 %v2424_v35  ;;  %v5989_v32 = vadd.f32 %v2679_v29, %v2569_v51  ;;  %v3608_v29 = vld [vmem:[#allocation3 + $0x448] sm:$0xff] }
 0x370   : > { %3621 = vmatpush.msra.mxu1 %v3608_v29  ;;  %v2427_v35 = vld [vmem:[#allocation2 + $0x13a] sm:$0xff] }
 0x371   : > { %v3021_v29 = vld [vmem:[#allocation3 + $0x2a8] sm:$0xff] }
 0x372   : > { %v2326_v58 = vpop.f32.mrf.mxu2  ;;  %v2488_v22 = vpop.f32.mrf.mxu3 }
 0x373   : > { %v2327_v53 = vadd.f32 %v2326_v58, %v5885_v63  ;;  %v2685_v7 = vpop.f32.mrf.mxu0  ;;  %v5992_v17 = vpop.f32.mrf.mxu1  ;;  %v3412_v58 = vld [vmem:[#allocation3 + $0x3b8] sm:$0xff] }
 0x374   : > { %3429 = vmatpush.msra.mxu0 %v3412_v58  ;;  %v6032_v58 = vld [vmem:[#allocation2 + $0xa9] sm:$0xff] }
 0x375   : > { %v2570_v12 = vadd.f32 %v2488_v22, %v2327_v53  ;;  %2878 = vmatmul.f32.gmra.mxu1 %v5994_v19 }
 0x376   : > { %2732 = vmatmul.f32.gmra.mxu0 %v2619_v42 }
 0x377   : > { %2376 = vmatmul.f32.gmra.mxu2 %v2617_v3  ;;  %2538 = vmatmul.f32.gmra.mxu3 %v2425_v10  ;;  %v5997_v31 = vadd.f32 %v2682_v34, %v2570_v12  ;;  %v3024_v3 = vld [vmem:[#allocation3 + $0x2c0] sm:$0xff] }
 0x378   : > { %3039 = vmatpush.msra.mxu2 %v3024_v3  ;;  %v6010_v34 = vld [vmem:[#allocation2 + $0x91] sm:$0xff] }
 0x379   : > { %v3607_v3 = vld [vmem:[#allocation3 + $0x440] sm:$0xff] }
 0x37a   : > { %v2329_v16 = vpop.f32.mrf.mxu2  ;;  %v2491_v11 = vpop.f32.mrf.mxu3  ;;  %3040 = vmatpush.msra.mxu2 %v3023_v41  ;;  %3622 = vmatpush.msra.mxu1 %v3607_v3 }
 0x37b   : > { %v2330_v63 = vadd.f32 %v2329_v16, %v5890_v2  ;;  %v2688_v18 = vpop.f32.mrf.mxu0  ;;  %v6000_v38 = vpop.f32.mrf.mxu1  ;;  %v6021_v16 = vld [vmem:[#allocation2 + $0x158] sm:$0xff] }
 0x37d   : > { %v2571_v6 = vadd.f32 %v2491_v11, %v2330_v63  ;;  %2881 = vmatmul.f32.gmra.mxu1 %v6002_v45  ;;  %v3022_v63 = vld [vmem:[#allocation3 + $0x2b0] sm:$0xff] }
 0x37e   : > { %2735 = vmatmul.f32.gmra.mxu0 %v2620_v25  ;;  %3041 = vmatpush.msra.mxu2 %v3022_v63  ;;  %v2429_v63 = vld [vmem:[#allocation2 + $0x152] sm:$0xff] }
 0x37f   : > { %2379 = vmatmul.f32.gmra.mxu2 %v2618_v62  ;;  %2541 = vmatmul.f32.gmra.mxu3 %v2426_v30  ;;  %v6005_v0 = vadd.f32 %v2685_v7, %v2571_v6  ;;  %v3219_v62 = vld [vmem:[#allocation3 + $0x340] sm:$0xff]  ;;  %v3411_v6 = vld [vmem:[#allocation3 + $0x3b0] sm:$0xff]  ;;  %v3410_v30 = vld [vmem:[#allocation3 + $0x3a8] sm:$0xff] }
 0x380   : > { %3234 = vmatpush.msra.mxu3 %v3219_v62  ;;  %3430 = vmatpush.msra.mxu0 %v3411_v6  ;;  %v3017_v6 = vld [vmem:[#allocation3 + $0x288] sm:$0xff] }
 0x381   : > { %3042 = vmatpush.msra.mxu2 %v3021_v29  ;;  %v3212_v29 = vld [vmem:[#allocation3 + $0x308] sm:$0xff] }
 0x382   : > { %v2332_v2 = vpop.f32.mrf.mxu2  ;;  %v2494_v5 = vpop.f32.mrf.mxu3  ;;  %3431 = vmatpush.msra.mxu0 %v3410_v30  ;;  %v3016_v30 = vld [vmem:[#allocation3 + $0x280] sm:$0xff] }
 0x383   : > { %v2333_v14 = vadd.f32 %v2332_v2, %v5900_v49  ;;  %v2691_v52 = vpop.f32.mrf.mxu0  ;;  %v6008_v28 = vpop.f32.mrf.mxu1  ;;  %v3218_v49 = vld [vmem:[#allocation3 + $0x338] sm:$0xff] }
 0x384   : > { %3235 = vmatpush.msra.mxu3 %v3218_v49 }
 0x385   : > { %v2572_v51 = vadd.f32 %v2494_v5, %v2333_v14  ;;  %2884 = vmatmul.f32.gmra.mxu1 %v6010_v34  ;;  %v3020_v5 = vld [vmem:[#allocation3 + $0x2a0] sm:$0xff] }
 0x386   : > { %2738 = vmatmul.f32.gmra.mxu0 %v6012_v1  ;;  %v3215_v14 = vld [vmem:[#allocation3 + $0x320] sm:$0xff]  ;;  %3043 = vmatpush.msra.mxu2 %v3020_v5 }
 0x387   : > { %2382 = vmatmul.f32.gmra.mxu2 %v2619_v42  ;;  %2544 = vmatmul.f32.gmra.mxu3 %v2427_v35  ;;  %v6016_v22 = vadd.f32 %v2688_v18, %v2572_v51  ;;  %v6023_v42 = vld [vmem:[#allocation2 + $0x99] sm:$0xff]  ;;  %v3409_v51 = vld [vmem:[#allocation3 + $0x3a0] sm:$0xff]  ;;  %v3019_v35 = vld [vmem:[#allocation3 + $0x298] sm:$0xff] }
 0x388   : > { %v3217_v18 = vld [vmem:[#allocation3 + $0x330] sm:$0xff]  ;;  %3432 = vmatpush.msra.mxu0 %v3409_v51  ;;  %3044 = vmatpush.msra.mxu2 %v3019_v35  ;;  %v2624_v35 = vld [vmem:[#allocation2 + $0x170] sm:$0xff] }
 0x389   : > { %3236 = vmatpush.msra.mxu3 %v3217_v18  ;;  %v3407_v18 = vld [vmem:[#allocation3 + $0x390] sm:$0xff] }
 0x38a   : > { %v2335_v53 = vpop.f32.mrf.mxu2  ;;  %v2497_v7 = vpop.f32.mrf.mxu3 }
 0x38b   : > { %v2336_v12 = vadd.f32 %v2335_v53, %v5905_v9  ;;  %v2694_v48 = vpop.f32.mrf.mxu0  ;;  %v6019_v10 = vpop.f32.mrf.mxu1  ;;  %v3216_v9 = vld [vmem:[#allocation3 + $0x328] sm:$0xff] }
 0x38c   : > { %3237 = vmatpush.msra.mxu3 %v3216_v9  ;;  %v3406_v9 = vld [vmem:[#allocation3 + $0x388] sm:$0xff] }
 0x38d   : > { %v2573_v11 = vadd.f32 %v2497_v7, %v2336_v12  ;;  %2887 = vmatmul.f32.gmra.mxu1 %v6023_v42  ;;  %v2623_v7 = vld [vmem:[#allocation2 + $0x168] sm:$0xff] }
 0x38e   : > { %2741 = vmatmul.f32.gmra.mxu0 %v6021_v16  ;;  %3238 = vmatpush.msra.mxu3 %v3215_v14  ;;  %v3408_v12 = vld [vmem:[#allocation3 + $0x398] sm:$0xff]  ;;  %v3211_v14 = vld [vmem:[#allocation3 + $0x300] sm:$0xff] }
 0x38f   : > { %2385 = vmatmul.f32.gmra.mxu2 %v2620_v25  ;;  %2547 = vmatmul.f32.gmra.mxu3 %v2428_v20  ;;  %v6027_v2 = vadd.f32 %v2691_v52, %v2573_v11  ;;  %v3214_v52 = vld [vmem:[#allocation3 + $0x318] sm:$0xff]  ;;  %v3018_v11 = vld [vmem:[#allocation3 + $0x290] sm:$0xff] }
 0x390   : > { %3239 = vmatpush.msra.mxu3 %v3214_v52  ;;  %3433 = vmatpush.msra.mxu0 %v3408_v12  ;;  %v3606_v52 = vld [vmem:[#allocation3 + $0x438] sm:$0xff] }
 0x391   : > { %6740 = vst [vmem:[#allocation10_spill] sm:$0xff] %v6027_v2  ;;  %3045 = vmatpush.msra.mxu2 %v3018_v11  ;;  %3623 = vmatpush.msra.mxu1 %v3606_v52  ;;  %v3605_v52 = vld [vmem:[#allocation3 + $0x430] sm:$0xff]  ;;  %v6183_v2 = vld [vmem:[#allocation2 + $0x92] sm:$0xff] }
 0x392   : > { %v2338_v62 = vpop.f32.mrf.mxu2  ;;  %v2500_v36 = vpop.f32.mrf.mxu3  ;;  %3434 = vmatpush.msra.mxu0 %v3407_v18 }
 0x393   : > { %v2339_v25 = vadd.f32 %v2338_v62, %v5910_v55  ;;  %v2697_v41 = vpop.f32.mrf.mxu0  ;;  %v6030_v49 = vpop.f32.mrf.mxu1  ;;  %v3213_v55 = vld [vmem:[#allocation3 + $0x310] sm:$0xff]  ;;  %3046 = vmatpush.msra.mxu2 %v3017_v6  ;;  %3624 = vmatpush.msra.mxu1 %v3605_v52 }
 0x394   : > { %3240 = vmatpush.msra.mxu3 %v3213_v55  ;;  %3435 = vmatpush.msra.mxu0 %v3406_v9  ;;  %v6050_v6 = vld [vmem:[#allocation2 + $0xc1] sm:$0xff] }
 0x395   : > { %v2574_v53 = vadd.f32 %v2500_v36, %v2339_v25  ;;  %2890 = vmatmul.f32.gmra.mxu1 %v6032_v58  ;;  %v6041_v36 = vld [vmem:[#allocation2 + $0xb1] sm:$0xff]  ;;  %3047 = vmatpush.msra.mxu2 %v3016_v30  ;;  %v2625_v9 = vld [vmem:[#allocation2 + $0x180] sm:$0xff] }
 0x396   : > { %2744 = vmatmul.f32.gmra.mxu0 %v2623_v7  ;;  %3241 = vmatpush.msra.mxu3 %v3212_v29  ;;  %v3405_v25 = vld [vmem:[#allocation3 + $0x380] sm:$0xff] }
 0x397   : > { %2388 = vmatmul.f32.gmra.mxu2 %v6012_v1  ;;  %2550 = vmatmul.f32.gmra.mxu3 %v2429_v63  ;;  %v6036_v20 = vadd.f32 %v2694_v48, %v2574_v53  ;;  %v2430_v53 = vld [vmem:[#allocation2 + $0x15a] sm:$0xff]  ;;  %v2431_v30 = vld [vmem:[#allocation2 + $0x16a] sm:$0xff] }
 0x398   : > { %3242 = vmatpush.msra.mxu3 %v3211_v14  ;;  %3436 = vmatpush.msra.mxu0 %v3405_v25  ;;  %v2626_v25 = vld [vmem:[#allocation2 + $0x188] sm:$0xff] }
 0x399   : > { %6741 = vst [vmem:[#allocation11_spill] sm:$0xff] %v6036_v20  ;;  %v6171_v20 = vld [vmem:[#allocation2 + $0x82] sm:$0xff] }
 0x39a   : > { %v2341_v3 = vpop.f32.mrf.mxu2  ;;  %v2503_v5 = vpop.f32.mrf.mxu3 }
 0x39b   : > { %v2342_v51 = vadd.f32 %v2341_v3, %v5915_v43  ;;  %v2700_v62 = vpop.f32.mrf.mxu0  ;;  %v6039_v1 = vpop.f32.mrf.mxu1 }
 0x39d   : > { %v2575_v48 = vadd.f32 %v2503_v5, %v2342_v51  ;;  %2893 = vmatmul.f32.gmra.mxu1 %v6041_v36  ;;  %v6058_v51 = vld [vmem:[#allocation2 + $0xc9] sm:$0xff] }
 0x39e   : > { %2747 = vmatmul.f32.gmra.mxu0 %v2624_v35 }
 0x39f   : > { %2391 = vmatmul.f32.gmra.mxu2 %v6021_v16  ;;  %2553 = vmatmul.f32.gmra.mxu3 %v2430_v53  ;;  %v6045_v43 = vadd.f32 %v2697_v41, %v2575_v48  ;;  %v2432_v53 = vld [vmem:[#allocation2 + $0x172] sm:$0xff] }
 0x3a1   : > { %6742 = vst [vmem:[#allocation12_spill] sm:$0xff] %v6045_v43  ;;  %v6159_v43 = vld [vmem:[#allocation2 + $0x7a] sm:$0xff] }
 0x3a2   : > { %v2344_v12 = vpop.f32.mrf.mxu2  ;;  %v2506_v11 = vpop.f32.mrf.mxu3 }
 0x3a3   : > { %v2345_v63 = vadd.f32 %v2344_v12, %v5920_v59  ;;  %v2703_v55 = vpop.f32.mrf.mxu0  ;;  %v6048_v18 = vpop.f32.mrf.mxu1 }
 0x3a5   : > { %v2576_v29 = vadd.f32 %v2506_v11, %v2345_v63  ;;  %2896 = vmatmul.f32.gmra.mxu1 %v6050_v6 }
 0x3a6   : > { %2750 = vmatmul.f32.gmra.mxu0 %v2625_v9 }
 0x3a7   : > { %2394 = vmatmul.f32.gmra.mxu2 %v2623_v7  ;;  %2556 = vmatmul.f32.gmra.mxu3 %v2431_v30  ;;  %v6053_v16 = vadd.f32 %v2700_v62, %v2576_v29  ;;  %v6066_v29 = vld [vmem:[#allocation2 + $0xd9] sm:$0xff] }
 0x3a8   : > { %v2983_v30 = vld [vmem:[#allocation2 + $0x1a] sm:$0xff] }
 0x3a9   : > { %6743 = vst [vmem:[#allocation9_spill] sm:$0xff] %v6053_v16  ;;  %v6147_v16 = vld [vmem:[#allocation2 + $0x6a] sm:$0xff] }
 0x3aa   : > { %v2347_v41 = vpop.f32.mrf.mxu2  ;;  %v2509_v3 = vpop.f32.mrf.mxu3 }
 0x3ab   : > { %v2348_v5 = vadd.f32 %v2347_v41, %v5925_v13  ;;  %v2706_v59 = vpop.f32.mrf.mxu0  ;;  %v6056_v14 = vpop.f32.mrf.mxu1  ;;  %v3178_v41 = vld [vmem:[#allocation2 + $0x30] sm:$0xff] }
 0x3ad   : > { %v2577_v48 = vadd.f32 %v2509_v3, %v2348_v5  ;;  %2899 = vmatmul.f32.gmra.mxu1 %v6058_v51 }
 0x3ae   : > { %2753 = vmatmul.f32.gmra.mxu0 %v2626_v25  ;;  %v6075_v25 = vld [vmem:[#allocation2 + $0xe1] sm:$0xff] }
 0x3af   : > { %2397 = vmatmul.f32.gmra.mxu2 %v2624_v35  ;;  %2559 = vmatmul.f32.gmra.mxu3 %v2432_v53  ;;  %v6061_v7 = vadd.f32 %v2703_v55, %v2577_v48  ;;  %v3604_v53 = vld [vmem:[#allocation3 + $0x428] sm:$0xff] }
 0x3b0   : > { %3625 = vmatpush.msra.mxu1 %v3604_v53 }
 0x3b1   : > { %6744 = vst [vmem:[#allocation13_spill] sm:$0xff] %v6061_v7  ;;  %v6135_v7 = vld [vmem:[#allocation2 + $0x62] sm:$0xff] }
 0x3b2   : > { %v2350_v62 = vpop.f32.mrf.mxu2  ;;  %v2512_v12 = vpop.f32.mrf.mxu3 }
 0x3b3   : > { %v2351_v13 = vadd.f32 %v2350_v62, %v5930_v33  ;;  %v2709_v11 = vpop.f32.mrf.mxu0  ;;  %v6064_v63 = vpop.f32.mrf.mxu1  ;;  %v2984_v62 = vld [vmem:[#allocation2 + $0x22] sm:$0xff] }
 0x3b5   : > { %v2578_v9 = vadd.f32 %v2512_v12, %v2351_v13  ;;  %2902 = vmatmul.f32.gmra.mxu1 %v6066_v29  ;;  %v3179_v12 = vld [vmem:[#allocation2 + $0x38] sm:$0xff] }
 0x3b6   : > { %3437 = vmatmul.f32.vlgmr.msra.gmra.mxu0 %v5946_v61 }
 0x3b7   : > { %3048 = vmatmul.f32.vlgmr.msra.gmra.mxu2 %v2983_v30  ;;  %3243 = vmatmul.f32.vlgmr.msra.gmra.mxu3 %v3178_v41  ;;  %v6070_v35 = vadd.f32 %v2706_v59, %v2578_v9  ;;  %v6084_v41 = vld [vmem:[#allocation2 + $0xf1] sm:$0xff] }
 0x3b9   : > { %6745 = vst [vmem:[#allocation14_spill] sm:$0xff] %v6070_v35  ;;  %v6123_v35 = vld [vmem:[#allocation2 + $0x52] sm:$0xff] }
 0x3ba   : > { %v2353_v55 = vpop.f32.mrf.mxu2  ;;  %v2515_v3 = vpop.f32.mrf.mxu3 }
 0x3bb   : > { %v2354_v33 = vadd.f32 %v2353_v55, %v5935_v56  ;;  %v2712_v5 = vpop.f32.mrf.mxu0  ;;  %v6073_v48 = vpop.f32.mrf.mxu1 }
 0x3bd   : > { %v2579_v52 = vadd.f32 %v2515_v3, %v2354_v33  ;;  %2905 = vmatmul.f32.gmra.mxu1 %v6075_v25  ;;  %v6087_v3 = vld [vmem:[#allocation2 + $0x32] sm:$0xff] }
 0x3be   : > { %3440 = vmatmul.f32.gmra.mxu0 %v5954_v15  ;;  %v3180_v15 = vld [vmem:[#allocation2 + $0x48] sm:$0xff] }
 0x3bf   : > { %3051 = vmatmul.f32.gmra.mxu2 %v2984_v62  ;;  %3246 = vmatmul.f32.gmra.mxu3 %v3179_v12  ;;  %v6079_v61 = vadd.f32 %v2709_v11, %v2579_v52  ;;  %v6096_v12 = vld [vmem:[#allocation2 + $0xf9] sm:$0xff] }
 0x3c1   : > { %6746 = vst [vmem:[#allocation15_spill] sm:$0xff] %v6079_v61  ;;  %v6111_v61 = vld [vmem:[#allocation2 + $0x4a] sm:$0xff] }
 0x3c2   : > { %v2356_v59 = vpop.f32.mrf.mxu2  ;;  %v2518_v56 = vpop.f32.mrf.mxu3 }
 0x3c3   : > { %v2357_v13 = vadd.f32 %v2356_v59, %v5939_v40  ;;  %v2715_v9 = vpop.f32.mrf.mxu0  ;;  %v6082_v30 = vpop.f32.mrf.mxu1 }
 0x3c5   : > { %v2580_v55 = vadd.f32 %v2518_v56, %v2357_v13  ;;  %2908 = vmatmul.f32.gmra.mxu1 %v6084_v41  ;;  %v3603_v56 = vld [vmem:[#allocation3 + $0x420] sm:$0xff]  ;;  %v6099_v13 = vld [vmem:[#allocation2 + $0x3a] sm:$0xff] }
 0x3c6   : > { %3443 = vmatmul.f32.gmra.mxu0 %v5962_v4  ;;  %v3181_v4 = vld [vmem:[#allocation2 + $0x50] sm:$0xff]  ;;  %3626 = vmatpush.msra.mxu1 %v3603_v56 }
 0x3c7   : > { %3054 = vmatmul.f32.gmra.mxu2 %v6087_v3  ;;  %3249 = vmatmul.f32.gmra.mxu3 %v3180_v15  ;;  %v6091_v11 = vadd.f32 %v2712_v5, %v2580_v55 }
 0x3c9   : > { %6747 = vst [vmem:[#allocation16_spill] sm:$0xff] %v6091_v11 }
 0x3ca   : > { %v2359_v33 = vpop.f32.mrf.mxu2  ;;  %v2521_v40 = vpop.f32.mrf.mxu3 }
 0x3cb   : > { %v2360_v52 = vadd.f32 %v2359_v33, %v5944_v26  ;;  %v2718_v53 = vpop.f32.mrf.mxu0  ;;  %v6094_v62 = vpop.f32.mrf.mxu1 }
 0x3cd   : > { %v2581_v59 = vadd.f32 %v2521_v40, %v2360_v52  ;;  %2911 = vmatmul.f32.gmra.mxu1 %v6096_v12  ;;  %v6108_v52 = vld [vmem:[#allocation2 + $0x109] sm:$0xff] }
 0x3ce   : > { %3446 = vmatmul.f32.gmra.mxu0 %v5970_v39  ;;  %v3182_v39 = vld [vmem:[#allocation2 + $0x60] sm:$0xff] }
 0x3cf   : > { %3057 = vmatmul.f32.gmra.mxu2 %v6099_v13  ;;  %3252 = vmatmul.f32.gmra.mxu3 %v3181_v4  ;;  %v6103_v5 = vadd.f32 %v2715_v9, %v2581_v59 }
 0x3d1   : > { %6748 = vst [vmem:[#allocation17_spill] sm:$0xff] %v6103_v5  ;;  %v3602_v5 = vld [vmem:[#allocation3 + $0x418] sm:$0xff] }
 0x3d2   : > { %v2362_v26 = vpop.f32.mrf.mxu2  ;;  %v2524_v55 = vpop.f32.mrf.mxu3  ;;  %3627 = vmatpush.msra.mxu1 %v3602_v5 }
 0x3d3   : > { %v2363_v15 = vadd.f32 %v2362_v26, %v5952_v8  ;;  %v2721_v33 = vpop.f32.mrf.mxu0  ;;  %v6106_v40 = vpop.f32.mrf.mxu1 }
 0x3d5   : > { %v2582_v11 = vadd.f32 %v2524_v55, %v2363_v15  ;;  %2914 = vmatmul.f32.gmra.mxu1 %v6108_v52  ;;  %v6120_v55 = vld [vmem:[#allocation2 + $0x111] sm:$0xff] }
 0x3d6   : > { %3449 = vmatmul.f32.gmra.mxu0 %v5978_v47  ;;  %v3183_v47 = vld [vmem:[#allocation2 + $0x68] sm:$0xff] }
 0x3d7   : > { %3060 = vmatmul.f32.gmra.mxu2 %v6111_v61  ;;  %3255 = vmatmul.f32.gmra.mxu3 %v3182_v39  ;;  %v6115_v9 = vadd.f32 %v2718_v53, %v2582_v11 }
 0x3d9   : > { %6749 = vst [vmem:[#allocation18_spill] sm:$0xff] %v6115_v9 }
 0x3da   : > { %v2365_v59 = vpop.f32.mrf.mxu2  ;;  %v2527_v8 = vpop.f32.mrf.mxu3 }
 0x3db   : > { %v2366_v56 = vadd.f32 %v2365_v59, %v5960_v44  ;;  %v2724_v4 = vpop.f32.mrf.mxu0  ;;  %v6118_v26 = vpop.f32.mrf.mxu1 }
 0x3dd   : > { %v2583_v15 = vadd.f32 %v2527_v8, %v2366_v56  ;;  %2917 = vmatmul.f32.gmra.mxu1 %v6120_v55  ;;  %v6132_v56 = vld [vmem:[#allocation2 + $0x121] sm:$0xff] }
 0x3de   : > { %3452 = vmatmul.f32.gmra.mxu0 %v5986_v21  ;;  %v3184_v21 = vld [vmem:[#allocation2 + $0x78] sm:$0xff] }
 0x3df   : > { %3063 = vmatmul.f32.gmra.mxu2 %v6123_v35  ;;  %3258 = vmatmul.f32.gmra.mxu3 %v3183_v47  ;;  %v6127_v11 = vadd.f32 %v2721_v33, %v2583_v15 }
 0x3e1   : > { %6750 = vst [vmem:[#allocation19_spill] sm:$0xff] %v6127_v11  ;;  %v3601_v11 = vld [vmem:[#allocation3 + $0x410] sm:$0xff] }
 0x3e2   : > { %v2368_v44 = vpop.f32.mrf.mxu2  ;;  %v2530_v53 = vpop.f32.mrf.mxu3  ;;  %3628 = vmatpush.msra.mxu1 %v3601_v11 }
 0x3e3   : > { %v2369_v39 = vadd.f32 %v2368_v44, %v5968_v27  ;;  %v2727_v59 = vpop.f32.mrf.mxu0  ;;  %v6130_v8 = vpop.f32.mrf.mxu1 }
 0x3e5   : > { %v2584_v9 = vadd.f32 %v2530_v53, %v2369_v39  ;;  %2920 = vmatmul.f32.gmra.mxu1 %v6132_v56  ;;  %v6144_v53 = vld [vmem:[#allocation2 + $0x129] sm:$0xff] }
 0x3e6   : > { %3455 = vmatmul.f32.gmra.mxu0 %v5994_v19  ;;  %v3185_v19 = vld [vmem:[#allocation2 + $0x80] sm:$0xff] }
 0x3e7   : > { %3066 = vmatmul.f32.gmra.mxu2 %v6135_v7  ;;  %3261 = vmatmul.f32.gmra.mxu3 %v3184_v21  ;;  %v6139_v5 = vadd.f32 %v2724_v4, %v2584_v9 }
 0x3e9   : > { %6751 = vst [vmem:[#allocation20_spill] sm:$0xff] %v6139_v5 }
 0x3ea   : > { %v2371_v33 = vpop.f32.mrf.mxu2  ;;  %v2533_v27 = vpop.f32.mrf.mxu3 }
 0x3eb   : > { %v2372_v15 = vadd.f32 %v2371_v33, %v5976_v46  ;;  %v2730_v47 = vpop.f32.mrf.mxu0  ;;  %v6142_v44 = vpop.f32.mrf.mxu1 }
 0x3ed   : > { %v2585_v39 = vadd.f32 %v2533_v27, %v2372_v15  ;;  %2923 = vmatmul.f32.gmra.mxu1 %v6144_v53  ;;  %v6156_v15 = vld [vmem:[#allocation2 + $0x139] sm:$0xff] }
 0x3ee   : > { %3458 = vmatmul.f32.gmra.mxu0 %v6002_v45  ;;  %v3186_v45 = vld [vmem:[#allocation2 + $0x90] sm:$0xff] }
 0x3ef   : > { %3069 = vmatmul.f32.gmra.mxu2 %v6147_v16  ;;  %3264 = vmatmul.f32.gmra.mxu3 %v3185_v19  ;;  %v6151_v9 = vadd.f32 %v2727_v59, %v2585_v39 }
 0x3f1   : > { %6752 = vst [vmem:[#allocation21_spill] sm:$0xff] %v6151_v9  ;;  %v3600_v9 = vld [vmem:[#allocation3 + $0x408] sm:$0xff] }
 0x3f2   : > { %v2374_v46 = vpop.f32.mrf.mxu2  ;;  %v2536_v4 = vpop.f32.mrf.mxu3  ;;  %3629 = vmatpush.msra.mxu1 %v3600_v9 }
 0x3f3   : > { %v2375_v21 = vadd.f32 %v2374_v46, %v5984_v24  ;;  %v2733_v33 = vpop.f32.mrf.mxu0  ;;  %v6154_v27 = vpop.f32.mrf.mxu1 }
 0x3f5   : > { %v2586_v5 = vadd.f32 %v2536_v4, %v2375_v21  ;;  %2926 = vmatmul.f32.gmra.mxu1 %v6156_v15  ;;  %v6168_v4 = vld [vmem:[#allocation2 + $0x141] sm:$0xff] }
 0x3f6   : > { %3461 = vmatmul.f32.gmra.mxu0 %v6010_v34  ;;  %v3187_v34 = vld [vmem:[#allocation2 + $0x98] sm:$0xff] }
 0x3f7   : > { %3072 = vmatmul.f32.gmra.mxu2 %v6159_v43  ;;  %3267 = vmatmul.f32.gmra.mxu3 %v3186_v45  ;;  %v6163_v11 = vadd.f32 %v2730_v47, %v2586_v5 }
 0x3f9   : > { %6753 = vst [vmem:[#allocation22_spill] sm:$0xff] %v6163_v11 }
 0x3fa   : > { %v2377_v59 = vpop.f32.mrf.mxu2  ;;  %v2539_v24 = vpop.f32.mrf.mxu3 }
 0x3fb   : > { %v2378_v39 = vadd.f32 %v2377_v59, %v5992_v17  ;;  %v2736_v19 = vpop.f32.mrf.mxu0  ;;  %v6166_v46 = vpop.f32.mrf.mxu1 }
 0x3fd   : > { %v2587_v21 = vadd.f32 %v2539_v24, %v2378_v39  ;;  %2929 = vmatmul.f32.gmra.mxu1 %v6168_v4  ;;  %v6180_v39 = vld [vmem:[#allocation2 + $0x151] sm:$0xff] }
 0x3fe   : > { %3464 = vmatmul.f32.gmra.mxu0 %v6023_v42  ;;  %v3188_v42 = vld [vmem:[#allocation2 + $0xa8] sm:$0xff] }
 0x3ff   : > { %3075 = vmatmul.f32.gmra.mxu2 %v6171_v20  ;;  %3270 = vmatmul.f32.gmra.mxu3 %v3187_v34  ;;  %v6175_v5 = vadd.f32 %v2733_v33, %v2587_v21 }
 0x401   : > { %6754 = vst [vmem:[#allocation23_spill] sm:$0xff] %v6175_v5  ;;  %v3599_v5 = vld [vmem:[#allocation3 + $0x400] sm:$0xff] }
 0x402   : > { %v2380_v17 = vpop.f32.mrf.mxu2  ;;  %v2542_v47 = vpop.f32.mrf.mxu3  ;;  %3630 = vmatpush.msra.mxu1 %v3599_v5 }
 0x403   : > { %v2381_v45 = vadd.f32 %v2380_v17, %v6000_v38  ;;  %v2739_v59 = vpop.f32.mrf.mxu0  ;;  %v6178_v24 = vpop.f32.mrf.mxu1  ;;  %v6192_v17 = vld [vmem:[#allocation2 + $0x159] sm:$0xff] }
 0x404   : > { %6755 = vst [vmem:[#allocation24_spill] sm:$0xff] %v6178_v24  ;;  %v6195_v24 = vld [vmem:[#allocation2 + $0x9a] sm:$0xff] }
 0x405   : > { %v2588_v11 = vadd.f32 %v2542_v47, %v2381_v45  ;;  %2932 = vmatmul.f32.gmra.mxu1 %v6180_v39 }
 0x406   : > { %3467 = vmatmul.f32.gmra.mxu0 %v6032_v58  ;;  %v3189_v58 = vld [vmem:[#allocation2 + $0xb0] sm:$0xff] }
 0x407   : > { %3078 = vmatmul.f32.gmra.mxu2 %v6183_v2  ;;  %3273 = vmatmul.f32.gmra.mxu3 %v3188_v42  ;;  %v6187_v9 = vadd.f32 %v2736_v19, %v2588_v11 }
 0x409   : > { %6756 = vst [vmem:[#allocation25_spill] sm:$0xff] %v6187_v9  ;;  %v6207_v9 = vld [vmem:[#allocation2 + $0xaa] sm:$0xff] }
 0x40a   : > { %v2383_v33 = vpop.f32.mrf.mxu2  ;;  %v2545_v38 = vpop.f32.mrf.mxu3 }
 0x40b   : > { %v2384_v21 = vadd.f32 %v2383_v33, %v6008_v28  ;;  %v6190_v34 = vpop.f32.mrf.mxu1  ;;  %v2742_v45 = vpop.f32.mrf.mxu0 }
 0x40d   : > { %v2589_v47 = vadd.f32 %v2545_v38, %v2384_v21  ;;  %2935 = vmatmul.f32.gmra.mxu1 %v6192_v17  ;;  %v6204_v38 = vld [vmem:[#allocation2 + $0x169] sm:$0xff] }
 0x40e   : > { %3470 = vmatmul.f32.gmra.mxu0 %v6041_v36  ;;  %v3190_v36 = vld [vmem:[#allocation2 + $0xc0] sm:$0xff] }
 0x40f   : > { %3081 = vmatmul.f32.gmra.mxu2 %v6195_v24  ;;  %3276 = vmatmul.f32.gmra.mxu3 %v3189_v58  ;;  %v6199_v11 = vadd.f32 %v2739_v59, %v2589_v47 }
 0x411   : > { %6757 = vst [vmem:[#allocation26_spill] sm:$0xff] %v6199_v11  ;;  %v6219_v11 = vld [vmem:[#allocation2 + $0xb2] sm:$0xff] }
 0x412   : > { %v2386_v28 = vpop.f32.mrf.mxu2  ;;  %v2548_v19 = vpop.f32.mrf.mxu3 }
 0x413   : > { %v2387_v42 = vadd.f32 %v2386_v28, %v6019_v10  ;;  %v6202_v33 = vpop.f32.mrf.mxu1  ;;  %v2745_v5 = vpop.f32.mrf.mxu0 }
 0x415   : > { %v2590_v21 = vadd.f32 %v2548_v19, %v2387_v42  ;;  %2938 = vmatmul.f32.gmra.mxu1 %v6204_v38  ;;  %v6216_v19 = vld [vmem:[#allocation2 + $0x171] sm:$0xff] }
 0x416   : > { %3473 = vmatmul.f32.gmra.mxu0 %v6050_v6  ;;  %v3191_v6 = vld [vmem:[#allocation2 + $0xc8] sm:$0xff] }
 0x417   : > { %3084 = vmatmul.f32.gmra.mxu2 %v6207_v9  ;;  %3279 = vmatmul.f32.gmra.mxu3 %v3190_v36  ;;  %v6211_v59 = vadd.f32 %v2742_v45, %v2590_v21 }
 0x419   : > { %6758 = vst [vmem:[#allocation27_spill] sm:$0xff] %v6211_v59 }
 0x41a   : > { %v2389_v47 = vpop.f32.mrf.mxu2  ;;  %v2551_v10 = vpop.f32.mrf.mxu3 }
 0x41b   : > { %v2390_v58 = vadd.f32 %v2389_v47, %v6030_v49  ;;  %v6214_v28 = vpop.f32.mrf.mxu1  ;;  %v2748_v21 = vpop.f32.mrf.mxu0 }
 0x41c   : > { %6759 = vst [vmem:[#allocation28_spill] sm:$0xff] %v6214_v28  ;;  %v6231_v28 = vld [vmem:[#allocation2 + $0xc2] sm:$0xff] }
 0x41d   : > { %v2591_v42 = vadd.f32 %v2551_v10, %v2390_v58  ;;  %2941 = vmatmul.f32.gmra.mxu1 %v6216_v19  ;;  %v6228_v10 = vld [vmem:[#allocation2 + $0x181] sm:$0xff] }
 0x41e   : > { %3476 = vmatmul.f32.gmra.mxu0 %v6058_v51  ;;  %v3192_v51 = vld [vmem:[#allocation2 + $0xd8] sm:$0xff] }
 0x41f   : > { %3087 = vmatmul.f32.gmra.mxu2 %v6219_v11  ;;  %3282 = vmatmul.f32.gmra.mxu3 %v3191_v6  ;;  %v6223_v45 = vadd.f32 %v2745_v5, %v2591_v42 }
 0x421   : > { %6760 = vst [vmem:[#allocation29_spill] sm:$0xff] %v6223_v45 }
 0x422   : > { %v2392_v36 = vpop.f32.mrf.mxu2  ;;  %v2554_v49 = vpop.f32.mrf.mxu3 }
 0x423   : > { %v2393_v47 = vadd.f32 %v2392_v36, %v6039_v1  ;;  %v6226_v59 = vpop.f32.mrf.mxu1  ;;  %v2751_v45 = vpop.f32.mrf.mxu0 }
 0x424   : > { %6761 = vst [vmem:[#allocation30_spill] sm:$0xff] %v6226_v59  ;;  %v6243_v59 = vld [vmem:[#allocation2 + $0xca] sm:$0xff] }
 0x425   : > { %v2592_v58 = vadd.f32 %v2554_v49, %v2393_v47  ;;  %2944 = vmatmul.f32.gmra.mxu1 %v6228_v10  ;;  %v6240_v49 = vld [vmem:[#allocation2 + $0x189] sm:$0xff] }
 0x426   : > { %3479 = vmatmul.f32.gmra.mxu0 %v6066_v29  ;;  %v3193_v29 = vld [vmem:[#allocation2 + $0xe0] sm:$0xff] }
 0x427   : > { %3090 = vmatmul.f32.gmra.mxu2 %v6231_v28  ;;  %3285 = vmatmul.f32.gmra.mxu3 %v3192_v51  ;;  %v6235_v5 = vadd.f32 %v2748_v21, %v2592_v58 }
 0x429   : > { %6762 = vst [vmem:[#allocation31_spill] sm:$0xff] %v6235_v5 }
 0x42a   : > { %v2395_v42 = vpop.f32.mrf.mxu2  ;;  %v2557_v6 = vpop.f32.mrf.mxu3 }
 0x42b   : > { %v2396_v1 = vadd.f32 %v2395_v42, %v6048_v18  ;;  %v6238_v36 = vpop.f32.mrf.mxu1 }
 0x42c   : > { %6763 = vst [vmem:[#allocation32_spill] sm:$0xff] %v6238_v36  ;;  %v3194_v36 = vld [vmem:[#allocation2 + $0xf0] sm:$0xff] }
 0x42d   : > { %v2593_v47 = vadd.f32 %v2557_v6, %v2396_v1  ;;  %2947 = vmatmul.f32.gmra.mxu1 %v6240_v49  ;;  %v2754_v6 = vpop.f32.mrf.mxu0  ;;  %v6253_v1 = vld [vmem:[#allocation2 + $0xda] sm:$0xff] }
 0x42e   : > { %3482 = vmatmul.f32.gmra.mxu0 %v6075_v25 }
 0x42f   : > { %3093 = vmatmul.f32.gmra.mxu2 %v6243_v59  ;;  %3288 = vmatmul.f32.gmra.mxu3 %v3193_v29  ;;  %v6247_v21 = vadd.f32 %v2751_v45, %v2593_v47  ;;  %v3195_v47 = vld [vmem:[#allocation2 + $0xf8] sm:$0xff]  ;;  %v3198_v29 = vld [vmem:[#allocation2 + $0x120] sm:$0xff] }
 0x431   : > { %6764 = vst [vmem:[#allocation33_spill] sm:$0xff] %v6247_v21  ;;  %v6336_v21 = vld [vmem:[#allocation2 + $0x142] sm:$0xff] }
 0x432   : > { %v2398_v58 = vpop.f32.mrf.mxu2  ;;  %v2560_v42 = vpop.f32.mrf.mxu3 }
 0x433   : > { %v2399_v18 = vadd.f32 %v2398_v58, %v6056_v14  ;;  %v6250_v51 = vpop.f32.mrf.mxu1  ;;  %v6262_v14 = vld [vmem:[#allocation2 + $0xe2] sm:$0xff] }
 0x434   : > { %6765 = vst [vmem:[#allocation34_spill] sm:$0xff] %v6250_v51  ;;  %v3199_v58 = vld [vmem:[#allocation2 + $0x128] sm:$0xff] }
 0x435   : > { %v2594_v5 = vadd.f32 %v2560_v42, %v2399_v18  ;;  %3631 = vmatmul.f32.vlgmr.msra.gmra.mxu1 %v6087_v3  ;;  %v3200_v18 = vld [vmem:[#allocation2 + $0x138] sm:$0xff]  ;;  %v3403_v51 = vld [vmem:[#allocation2 + $0x1a1] sm:$0xff] }
 0x436   : > { %3485 = vmatmul.f32.gmra.mxu0 %v6084_v41  ;;  %v6269_v41 = vld [vmem:[#allocation2 + $0xf2] sm:$0xff] }
 0x437   : > { %3096 = vmatmul.f32.gmra.mxu2 %v6253_v1  ;;  %3291 = vmatmul.f32.gmra.mxu3 %v3194_v36  ;;  %v6257_v25 = vadd.f32 %v2754_v6, %v2594_v5  ;;  %v3196_v5 = vld [vmem:[#allocation2 + $0x108] sm:$0xff]  ;;  %v3197_v36 = vld [vmem:[#allocation2 + $0x110] sm:$0xff] }
 0x439   : > { %6766 = vst [vmem:[#allocation35_spill] sm:$0xff] %v6257_v25 }
 0x43a   : > { %v6303_v42 = vpop.f32.mrf.mxu2 }
 0x43b   : > { %v6259_v45 = vpop.f32.mrf.mxu1 }
 0x43c   : > { %6767 = vst [vmem:[#allocation36_spill] sm:$0xff] %v6259_v45 }
 0x43d   : > { %3634 = vmatmul.f32.gmra.mxu1 %v6099_v13 }
 0x43e   : > { %3488 = vmatmul.f32.gmra.mxu0 %v6096_v12  ;;  %v6276_v12 = vld [vmem:[#allocation2 + $0xfa] sm:$0xff] }
 0x43f   : > { %3099 = vmatmul.f32.gmra.mxu2 %v6262_v14  ;;  %3294 = vmatmul.f32.gmra.mxu3 %v3195_v47  ;;  %v6310_v47 = vld [vmem:[#allocation2 + $0x12a] sm:$0xff] }
 0x443   : > { %v6266_v3 = vpop.f32.mrf.mxu1 }
 0x444   : > { %6768 = vst [vmem:[#allocation37_spill] sm:$0xff] %v6266_v3 }
 0x445   : > { %3637 = vmatmul.f32.gmra.mxu1 %v6111_v61 }
 0x446   : > { %3491 = vmatmul.f32.gmra.mxu0 %v6108_v52  ;;  %v6283_v52 = vld [vmem:[#allocation2 + $0x10a] sm:$0xff] }
 0x447   : > { %3102 = vmatmul.f32.gmra.mxu2 %v6269_v41  ;;  %3297 = vmatmul.f32.gmra.mxu3 %v3196_v5  ;;  %v6316_v5 = vpop.f32.mrf.mxu2 }
 0x44b   : > { %v6273_v13 = vpop.f32.mrf.mxu1 }
 0x44c   : > { %6769 = vst [vmem:[#allocation38_spill] sm:$0xff] %v6273_v13 }
 0x44d   : > { %3640 = vmatmul.f32.gmra.mxu1 %v6123_v35 }
 0x44e   : > { %3494 = vmatmul.f32.gmra.mxu0 %v6120_v55  ;;  %v6290_v55 = vld [vmem:[#allocation2 + $0x112] sm:$0xff] }
 0x44f   : > { %3105 = vmatmul.f32.gmra.mxu2 %v6276_v12  ;;  %3300 = vmatmul.f32.gmra.mxu3 %v3197_v36 }
 0x453   : > { %v6280_v61 = vpop.f32.mrf.mxu1 }
 0x454   : > { %6770 = vst [vmem:[#allocation39_spill] sm:$0xff] %v6280_v61 }
 0x455   : > { %3643 = vmatmul.f32.gmra.mxu1 %v6135_v7 }
 0x456   : > { %3497 = vmatmul.f32.gmra.mxu0 %v6132_v56  ;;  %v6297_v56 = vld [vmem:[#allocation2 + $0x122] sm:$0xff] }
 0x457   : > { %3108 = vmatmul.f32.gmra.mxu2 %v6283_v52  ;;  %3303 = vmatmul.f32.gmra.mxu3 %v3198_v29 }
 0x45b   : > { %v6287_v35 = vpop.f32.mrf.mxu1 }
 0x45c   : > { %6771 = vst [vmem:[#allocation40_spill] sm:$0xff] %v6287_v35 }
 0x45d   : > { %3646 = vmatmul.f32.gmra.mxu1 %v6147_v16  ;;  %v6301_v16 = vpop.f32.mrf.mxu0 }
 0x45e   : > { %3500 = vmatmul.f32.gmra.mxu0 %v6144_v53  ;;  %v6305_v53 = vpop.f32.mrf.mxu3 }
 0x45f   : > { %3111 = vmatmul.f32.gmra.mxu2 %v6290_v55  ;;  %3306 = vmatmul.f32.gmra.mxu3 %v3199_v58  ;;  %v6323_v58 = vld [vmem:[#allocation2 + $0x13a] sm:$0xff] }
 0x463   : > { %v6294_v7 = vpop.f32.mrf.mxu1 }
 0x464   : > { %6772 = vst [vmem:[#allocation41_spill] sm:$0xff] %v6294_v7 }
 0x465   : > { %3649 = vmatmul.f32.gmra.mxu1 %v6159_v43  ;;  %v3201_v43 = vld [vmem:[#allocation2 + $0x140] sm:$0xff] }
 0x466   : > { %3503 = vmatmul.f32.gmra.mxu0 %v6156_v15  ;;  %v6314_v15 = vpop.f32.mrf.mxu0  ;;  %v6318_v36 = vpop.f32.mrf.mxu3 }
 0x467   : > { %3114 = vmatmul.f32.gmra.mxu2 %v6297_v56  ;;  %3309 = vmatmul.f32.gmra.mxu3 %v3200_v18 }
 0x46b   : > { %v6307_v6 = vpop.f32.mrf.mxu1 }
 0x46c   : > { %6773 = vst [vmem:[#allocation42_spill] sm:$0xff] %v6307_v6  ;;  %v3204_v6 = vld [vmem:[#allocation2 + $0x168] sm:$0xff] }
 0x46d   : > { %3652 = vmatmul.f32.gmra.mxu1 %v6171_v20  ;;  %v3202_v20 = vld [vmem:[#allocation2 + $0x150] sm:$0xff] }
 0x46e   : > { %3506 = vmatmul.f32.gmra.mxu0 %v6168_v4  ;;  %v6329_v18 = vpop.f32.mrf.mxu0  ;;  %v6333_v25 = vpop.f32.mrf.mxu3 }
 0x46f   : > { %3117 = vmatmul.f32.gmra.mxu2 %v6310_v47  ;;  %3312 = vmatmul.f32.gmra.mxu3 %v3201_v43  ;;  %v6331_v43 = vpop.f32.mrf.mxu2 }
 0x473   : > { %v6320_v29 = vpop.f32.mrf.mxu1 }
 0x474   : > { %6774 = vst [vmem:[#allocation43_spill] sm:$0xff] %v6320_v29  ;;  %v6347_v29 = vld [vmem:[#allocation2 + $0x152] sm:$0xff] }
 0x475   : > { %3655 = vmatmul.f32.gmra.mxu1 %v6183_v2  ;;  %v3203_v2 = vld [vmem:[#allocation2 + $0x158] sm:$0xff] }
 0x476   : > { %3509 = vmatmul.f32.gmra.mxu0 %v6180_v39 }
 0x477   : > { %3120 = vmatmul.f32.gmra.mxu2 %v6323_v58  ;;  %3315 = vmatmul.f32.gmra.mxu3 %v3202_v20  ;;  %v6343_v20 = vpop.f32.mrf.mxu0 }
 0x47b   : > { %v6327_v4 = vpop.f32.mrf.mxu1 }
 0x47c   : > { %6775 = vst [vmem:[#allocation44_spill] sm:$0xff] %v6327_v4  ;;  %v6345_v4 = vpop.f32.mrf.mxu2 }
 0x47d   : > { %3658 = vmatmul.f32.gmra.mxu1 %v6195_v24  ;;  %v6350_v24 = vpop.f32.mrf.mxu3 }
 0x47e   : > { %3512 = vmatmul.f32.gmra.mxu0 %v6192_v17 }
 0x47f   : > { %3123 = vmatmul.f32.gmra.mxu2 %v6336_v21  ;;  %3318 = vmatmul.f32.gmra.mxu3 %v3203_v2  ;;  %v6356_v2 = vld [vmem:[#allocation2 + $0x15a] sm:$0xff] }
 0x483   : > { %v6340_v39 = vpop.f32.mrf.mxu1 }
 0x484   : > { %6776 = vst [vmem:[#allocation45_spill] sm:$0xff] %v6340_v39  ;;  %v6360_v39 = vpop.f32.mrf.mxu0 }
 0x485   : > { %3661 = vmatmul.f32.gmra.mxu1 %v6207_v9  ;;  %v3205_v9 = vld [vmem:[#allocation2 + $0x170] sm:$0xff]  ;;  %v6364_v7 = vpop.f32.mrf.mxu3 }
 0x486   : > { %3515 = vmatmul.f32.gmra.mxu0 %v6204_v38  ;;  %v6362_v38 = vpop.f32.mrf.mxu2 }
 0x487   : > { %3126 = vmatmul.f32.gmra.mxu2 %v6347_v29  ;;  %3321 = vmatmul.f32.gmra.mxu3 %v3204_v6  ;;  %v6369_v6 = vld [vmem:[#allocation2 + $0x16a] sm:$0xff] }
 0x48b   : > { %v6353_v17 = vpop.f32.mrf.mxu1 }
 0x48c   : > { %6777 = vst [vmem:[#allocation46_spill] sm:$0xff] %v6353_v17 }
 0x48d   : > { %3664 = vmatmul.f32.gmra.mxu1 %v6219_v11  ;;  %v3206_v11 = vld [vmem:[#allocation2 + $0x180] sm:$0xff]  ;;  %v6377_v17 = vpop.f32.mrf.mxu3 }
 0x48e   : > { %3518 = vmatmul.f32.gmra.mxu0 %v6216_v19  ;;  %v6373_v19 = vpop.f32.mrf.mxu0 }
 0x48f   : > { %3129 = vmatmul.f32.gmra.mxu2 %v6356_v2  ;;  %3324 = vmatmul.f32.gmra.mxu3 %v3205_v9  ;;  %v6375_v9 = vpop.f32.mrf.mxu2 }
 0x493   : > { %v6366_v35 = vpop.f32.mrf.mxu1 }
 0x494   : > { %6778 = vst [vmem:[#allocation47_spill] sm:$0xff] %v6366_v35  ;;  %v6382_v35 = vld [vmem:[#allocation2 + $0x172] sm:$0xff] }
 0x495   : > { %3667 = vmatmul.f32.gmra.mxu1 %v6231_v28  ;;  %6780 = vst [vmem:[#allocation49_spill] sm:$0xff] %v6382_v35  ;;  %v3207_v28 = vld [vmem:[#allocation2 + $0x188] sm:$0xff]  ;;  %v6392_v45 = vpop.f32.mrf.mxu3 }
 0x496   : > { %3521 = vmatmul.f32.gmra.mxu0 %v6228_v10  ;;  %v6388_v13 = vpop.f32.mrf.mxu0 }
 0x497   : > { %3132 = vmatmul.f32.gmra.mxu2 %v6369_v6  ;;  %3327 = vmatmul.f32.gmra.mxu3 %v3206_v11  ;;  %v3402_v11 = vld [vmem:[#allocation2 + $0x199] sm:$0xff]  ;;  %v6390_v3 = vpop.f32.mrf.mxu2 }
 0x49b   : > { %v6379_v61 = vpop.f32.mrf.mxu1 }
 0x49c   : > { %6779 = vst [vmem:[#allocation48_spill] sm:$0xff] %v6379_v61 }
 0x49d   : > { %3670 = vmatmul.f32.gmra.mxu1 %v6243_v59  ;;  %v6395_v59 = vld [vmem:[#allocation2 + $0x182] sm:$0xff] }
 0x49e   : > { %3524 = vmatmul.f32.gmra.mxu0 %v6240_v49  ;;  %6782 = vst [vmem:[#allocation51_spill] sm:$0xff] %v6395_v59  ;;  %v4474_v49 = vld [vmem:[#allocation2] sm:$0xff] }
 0x49f   : > { %3135 = vmatmul.f32.gmra.mxu2 %v6382_v35  ;;  %3330 = vmatmul.f32.gmra.mxu3 %v3207_v28  ;;  %v2951_v28 = vadd.f32 %v6064_v63, %v5941_v54  ;;  %v6405_v35 = vpop.f32.mrf.mxu0  ;;  %v6411_v54 = vpop.f32.mrf.mxu3  ;;  %v2952_v63 = vadd.f32 %v6073_v48, %v5949_v50  ;;  %v2953_v48 = vadd.f32 %v6082_v30, %v5957_v60 }
 0x4a3   : > { %v6386_v10 = vpop.f32.mrf.mxu1 }
 0x4a4   : > { %6781 = vst [vmem:[#allocation50_spill] sm:$0xff] %v6386_v10  ;;  %v3145_v10 = vadd.f32 %v6303_v42, %v2951_v28  ;;  %v4342_v28 = vld [vmem:[%s4759_s10 + $0x19] sm:$0xff] }
 0x4a5   : > { %3673 = vmatmul.f32.gmra.mxu1 %v6253_v1 }
 0x4a6   : > { %3527 = vmatmul.f32.gmra.mxu0 %v3402_v11  ;;  %v3340_v1 = vadd.f32 %v6305_v53, %v3145_v10  ;;  %v6407_v11 = vld [vmem:[#allocation2 + $0x18a] sm:$0xff]  ;;  %v6421_v53 = vld [vmem:[%s6722_s4] ss:$0 sm:$0xff] }
 0x4a7   : > { %3138 = vmatmul.f32.gmra.mxu2 %v6395_v59  ;;  %3333 = vmatmul.f32.gmra.mxu3 %v4474_v49  ;;  %v6409_v59 = vpop.f32.mrf.mxu2 }
 0x4a8   : > { %v3534_v42 = vadd.f32 %v6301_v16, %v3340_v1  ;;  %v3147_v1 = vadd.f32 %v6331_v43, %v2953_v48 }
 0x4aa   : > { %v3342_v60 = vadd.f32 %v6333_v25, %v3147_v1 }
 0x4ab   : > { %v6401_v61 = vpop.f32.mrf.mxu1 }
 0x4ad   : > { %3676 = vmatmul.f32.gmra.mxu1 %v6262_v14  ;;  %v3146_v14 = vadd.f32 %v6316_v5, %v2952_v63 }
 0x4ae   : > { %3530 = vmatmul.f32.gmra.mxu0 %v3403_v51 }
 0x4af   : > { %3141 = vmatmul.f32.gmra.mxu2 %v6407_v11  ;;  %3336 = vmatmul.f32.gmra.mxu3 %v4474_v49  ;;  %v3341_v49 = vadd.f32 %v6318_v36, %v3146_v14  ;;  %v6432_v5 = vpop.f32.mrf.mxu2  ;;  %v4343_v36 = vld [vmem:[%s4759_s10 + $0x21] sm:$0xff]  ;;  %v6443_v14 = vpop.f32.mrf.mxu3 }
 0x4b3   : > { %v3632_v51 = vpop.f32.mrf.mxu1 }
 0x4b4   : > { %v3728_v10 = vadd.f32 %v3632_v51, %v3534_v42  ;;  %v3535_v42 = vadd.f32 %v6314_v15, %v3341_v49  ;;  %v2954_v15 = vadd.f32 %v6094_v62, %v5965_v23 }
 0x4b5   : > { %3679 = vmatmul.f32.gmra.mxu1 %v6269_v41 }
 0x4b6   : > { %v3796_v50 = vadd.f32 %v6421_v53, %v3728_v10  ;;  %v3148_v10 = vadd.f32 %v6345_v4, %v2954_v15  ;;  %v2955_v4 = vadd.f32 %v6106_v40, %v5973_v57 }
 0x4b7   : > { %v6451_v48 = vpop.f32.mrf.mxu2 }
 0x4b8   : > { %v3828_v16 = vadd.f32 %v4342_v28, %v3796_v50  ;;  %v6448_v28 = vpop.f32.mrf.mxu0  ;;  %v3536_v50 = vadd.f32 %v6329_v18, %v3342_v60  ;;  %v3343_v23 = vadd.f32 %v6350_v24, %v3148_v10  ;;  %v3149_v18 = vadd.f32 %v6362_v38, %v2955_v4  ;;  %v4345_v60 = vld [vmem:[%s4759_s10 + $0x39] sm:$0xff]  ;;  %v4347_v4 = vld [vmem:[%s4759_s10 + $0x51] sm:$0xff] }
 0x4b9   : > { %v2956_v38 = vadd.f32 %v6118_v26, %v5981_v37 }
 0x4ba   : > { %v3860_v63 = vmax.f32 %v3828_v16, 0.0  ;;  %v4344_v16 = vld [vmem:[%s4759_s10 + $0x31] sm:$0xff]  ;;  %v3344_v57 = vadd.f32 %v6364_v7, %v3149_v18 }
 0x4bb   : > { %v3635_v51 = vpop.f32.mrf.mxu1 }
 0x4bc   : > { %3892 = vst [vmem:[%s6436_s8] sm:$0xff] %v3860_v63  ;;  %v3729_v41 = vadd.f32 %v3635_v51, %v3535_v42  ;;  %v6460_v63 = vpop.f32.mrf.mxu3  ;;  %v3537_v51 = vadd.f32 %v6343_v20, %v3343_v23 }
 0x4bd   : > { %3682 = vmatmul.f32.gmra.mxu1 %v6276_v12 }
 0x4be   : > { %v3797_v30 = vadd.f32 %v6421_v53, %v3729_v41 }
 0x4bf   : > { %v6467_v24 = vpop.f32.mrf.mxu2 }
 0x4c0   : > { %v3829_v43 = vadd.f32 %v4343_v36, %v3797_v30  ;;  %v6464_v36 = vpop.f32.mrf.mxu0  ;;  %v3150_v30 = vadd.f32 %v6375_v9, %v2956_v38 }
 0x4c2   : > { %v3861_v49 = vmax.f32 %v3829_v43, 0.0  ;;  %v3538_v43 = vadd.f32 %v6360_v39, %v3344_v57  ;;  %v3345_v7 = vadd.f32 %v6377_v17, %v3150_v30  ;;  %v2957_v39 = vadd.f32 %v6130_v8, %v5989_v32 }
 0x4c3   : > { %v3638_v12 = vpop.f32.mrf.mxu1  ;;  %v2958_v8 = vadd.f32 %v6142_v44, %v5997_v31 }
 0x4c4   : > { %3893 = vst [vmem:[%s6436_s8 + $0x8] sm:$0xff] %v3861_v49  ;;  %v3730_v25 = vadd.f32 %v3638_v12, %v3536_v50  ;;  %v6477_v10 = vpop.f32.mrf.mxu3  ;;  %v3539_v23 = vadd.f32 %v6373_v19, %v3345_v7 }
 0x4c5   : > { %3685 = vmatmul.f32.gmra.mxu1 %v6283_v52 }
 0x4c6   : > { %v3798_v62 = vadd.f32 %v6421_v53, %v3730_v25  ;;  %v3151_v25 = vadd.f32 %v6390_v3, %v2957_v39  ;;  %v4350_v39 = vld [vmem:[%s4759_s10 + $0x79] sm:$0xff] }
 0x4c7   : > { %v6486_v26 = vpop.f32.mrf.mxu2 }
 0x4c8   : > { %v3830_v1 = vadd.f32 %v4344_v16, %v3798_v62  ;;  %v6483_v12 = vpop.f32.mrf.mxu0 }
 0x4ca   : > { %v3862_v42 = vmax.f32 %v3830_v1, 0.0  ;;  %v3346_v1 = vadd.f32 %v6392_v45, %v3151_v25  ;;  %v4348_v45 = vld [vmem:[%s4759_s10 + $0x61] sm:$0xff] }
 0x4cb   : > { %v3641_v41 = vpop.f32.mrf.mxu1 }
 0x4cc   : > { %3894 = vst [vmem:[%s6436_s8 + $0x10] sm:$0xff] %v3862_v42  ;;  %v3731_v52 = vadd.f32 %v3641_v41, %v3537_v51  ;;  %v6493_v17 = vpop.f32.mrf.mxu3  ;;  %v3152_v42 = vadd.f32 %v6409_v59, %v2958_v8  ;;  %v3540_v41 = vadd.f32 %v6388_v13, %v3346_v1  ;;  %v2959_v59 = vadd.f32 %v6154_v27, %v6005_v0 }
 0x4cd   : > { %3688 = vmatmul.f32.gmra.mxu1 %v6290_v55  ;;  %v4346_v55 = vld [vmem:[%s4759_s10 + $0x49] sm:$0xff] }
 0x4ce   : > { %v3799_v40 = vadd.f32 %v6421_v53, %v3731_v52  ;;  %v3347_v31 = vadd.f32 %v6411_v54, %v3152_v42  ;;  %v3153_v13 = vadd.f32 %v6432_v5, %v2959_v59  ;;  %v2960_v5 = vadd.f32 %v6166_v46, %v6016_v22 }
 0x4cf   : > { %v6503_v18 = vpop.f32.mrf.mxu2 }
 0x4d0   : > { %v3831_v20 = vadd.f32 %v4345_v60, %v3799_v40  ;;  %v6501_v3 = vpop.f32.mrf.mxu0  ;;  %v3348_v0 = vadd.f32 %v6443_v14, %v3153_v13 }
 0x4d2   : > { %v3863_v15 = vmax.f32 %v3831_v20, 0.0  ;;  %v3541_v20 = vadd.f32 %v6405_v35, %v3347_v31  ;;  %v3154_v35 = vadd.f32 %v6451_v48, %v2960_v5  ;;  %v6783_v48 = vld [vmem:[#allocation10_spill] sm:$0xff]  ;;  %v6789_v5 = vld [vmem:[#allocation28_spill] sm:$0xff] }
 0x4d3   : > { %v3644_v49 = vpop.f32.mrf.mxu1 }
 0x4d4   : > { %3895 = vst [vmem:[%s6436_s8 + $0x18] sm:$0xff] %v3863_v15  ;;  %v3732_v50 = vadd.f32 %v3644_v49, %v3538_v43  ;;  %v6512_v60 = vpop.f32.mrf.mxu3  ;;  %v4349_v15 = vld [vmem:[%s4759_s10 + $0x69] sm:$0xff]  ;;  %v3349_v22 = vadd.f32 %v6460_v63, %v3154_v35 }
 0x4d5   : > { %3691 = vmatmul.f32.gmra.mxu1 %v6297_v56 }
 0x4d6   : > { %v3800_v37 = vadd.f32 %v6421_v53, %v3732_v50 }
 0x4d7   : > { %v6520_v30 = vpop.f32.mrf.mxu2 }
 0x4d8   : > { %v3832_v9 = vadd.f32 %v4346_v55, %v3800_v37  ;;  %v6517_v40 = vpop.f32.mrf.mxu0  ;;  %v3542_v55 = vadd.f32 %v6448_v28, %v3348_v0 }
 0x4da   : > { %v3864_v16 = vmax.f32 %v3832_v9, 0.0  ;;  %v6784_v9 = vld [vmem:[#allocation24_spill] sm:$0xff] }
 0x4db   : > { %v3647_v62 = vpop.f32.mrf.mxu1  ;;  %v2961_v25 = vadd.f32 %v6784_v9, %v6783_v48  ;;  %v6791_v9 = vld [vmem:[#allocation13_spill] sm:$0xff] }
 0x4dc   : > { %3896 = vst [vmem:[%s6436_s8 + $0x20] sm:$0xff] %v3864_v16  ;;  %v3733_v56 = vadd.f32 %v3647_v62, %v3539_v23  ;;  %v6529_v49 = vpop.f32.mrf.mxu3  ;;  %v3543_v62 = vadd.f32 %v6464_v36, %v3349_v22  ;;  %v6790_v22 = vld [vmem:[#allocation51_spill] sm:$0xff] }
 0x4dd   : > { %3694 = vmatmul.f32.gmra.mxu1 %v6310_v47  ;;  %v3155_v16 = vadd.f32 %v6467_v24, %v2961_v25  ;;  %v6792_v25 = vld [vmem:[#allocation30_spill] sm:$0xff] }
 0x4de   : > { %v3801_v32 = vadd.f32 %v6421_v53, %v3733_v56 }
 0x4df   : > { %v6536_v14 = vpop.f32.mrf.mxu2  ;;  %v3350_v63 = vadd.f32 %v6477_v10, %v3155_v16 }
 0x4e0   : > { %v3833_v19 = vadd.f32 %v4347_v4, %v3801_v32  ;;  %v6533_v37 = vpop.f32.mrf.mxu0 }
 0x4e2   : > { %v3865_v51 = vmax.f32 %v3833_v19, 0.0  ;;  %v6785_v19 = vld [vmem:[#allocation11_spill] sm:$0xff] }
 0x4e3   : > { %v3650_v52 = vpop.f32.mrf.mxu1  ;;  %v2962_v36 = vadd.f32 %v6190_v34, %v6785_v19  ;;  %v6786_v34 = vld [vmem:[#allocation12_spill] sm:$0xff] }
 0x4e4   : > { %3897 = vst [vmem:[%s6436_s8 + $0x28] sm:$0xff] %v3865_v51  ;;  %v3734_v47 = vadd.f32 %v3650_v52, %v3540_v41  ;;  %v6546_v56 = vpop.f32.mrf.mxu3  ;;  %v3544_v52 = vadd.f32 %v6483_v12, %v3350_v63  ;;  %v2963_v59 = vadd.f32 %v6202_v33, %v6786_v34 }
 0x4e5   : > { %3697 = vmatmul.f32.gmra.mxu1 %v6323_v58  ;;  %v3156_v51 = vadd.f32 %v6486_v26, %v2962_v36  ;;  %v6793_v36 = vld [vmem:[#allocation14_spill] sm:$0xff] }
 0x4e6   : > { %v3802_v44 = vadd.f32 %v6421_v53, %v3734_v47  ;;  %v3157_v13 = vadd.f32 %v6503_v18, %v2963_v59 }
 0x4e7   : > { %v3094_v24 = vpop.f32.mrf.mxu2  ;;  %v3351_v31 = vadd.f32 %v6493_v17, %v3156_v51  ;;  %v4353_v17 = vld [vmem:[%s4759_s10 + $0x99] sm:$0xff] }
 0x4e8   : > { %v3834_v57 = vadd.f32 %v4348_v45, %v3802_v44  ;;  %v6552_v32 = vpop.f32.mrf.mxu0  ;;  %v4352_v45 = vld [vmem:[%s4759_s10 + $0x91] sm:$0xff] }
 0x4ea   : > { %v3866_v38 = vmax.f32 %v3834_v57, 0.0 }
 0x4eb   : > { %v3653_v58 = vpop.f32.mrf.mxu1 }
 0x4ec   : > { %3898 = vst [vmem:[%s6436_s8 + $0x30] sm:$0xff] %v3866_v38  ;;  %v3735_v54 = vadd.f32 %v3653_v58, %v3541_v20  ;;  %v3289_v10 = vpop.f32.mrf.mxu3  ;;  %v3545_v20 = vadd.f32 %v6501_v3, %v3351_v31 }
 0x4ed   : > { %3700 = vmatmul.f32.gmra.mxu1 %v6336_v21 }
 0x4ee   : > { %v3803_v27 = vadd.f32 %v6421_v53, %v3735_v54  ;;  %v6787_v54 = vld [vmem:[#allocation49_spill] sm:$0xff] }
 0x4ef   : > { %v3097_v12 = vpop.f32.mrf.mxu2 }
 0x4f0   : > { %v3835_v43 = vadd.f32 %v4349_v15, %v3803_v27  ;;  %v6566_v26 = vpop.f32.mrf.mxu0  ;;  %v3352_v15 = vadd.f32 %v6512_v60, %v3157_v13  ;;  %v6788_v27 = vld [vmem:[#allocation9_spill] sm:$0xff]  ;;  %v6796_v13 = vld [vmem:[#allocation34_spill] sm:$0xff] }
 0x4f1   : > { %v4354_v60 = vld [vmem:[%s4759_s10 + $0xa9] sm:$0xff] }
 0x4f2   : > { %v3867_v50 = vmax.f32 %v3835_v43, 0.0  ;;  %v2964_v43 = vadd.f32 %v6789_v5, %v6788_v27  ;;  %v6797_v5 = vld [vmem:[#allocation16_spill] sm:$0xff] }
 0x4f3   : > { %v3656_v7 = vpop.f32.mrf.mxu1 }
 0x4f4   : > { %3899 = vst [vmem:[%s6436_s8 + $0x38] sm:$0xff] %v3867_v50  ;;  %v3736_v21 = vadd.f32 %v3656_v7, %v3542_v55  ;;  %v3292_v0 = vpop.f32.mrf.mxu3  ;;  %v3158_v35 = vadd.f32 %v6520_v30, %v2964_v43  ;;  %v3546_v55 = vadd.f32 %v6517_v40, %v3352_v15  ;;  %v2965_v30 = vadd.f32 %v6792_v25, %v6791_v9  ;;  %v6798_v43 = vld [vmem:[#allocation36_spill] sm:$0xff]  ;;  %v6799_v9 = vld [vmem:[#allocation17_spill] sm:$0xff] }
 0x4f5   : > { %3703 = vmatmul.f32.gmra.mxu1 %v6347_v29  ;;  %v4351_v29 = vld [vmem:[%s4759_s10 + $0x81] sm:$0xff]  ;;  %v6800_v25 = vld [vmem:[#allocation37_spill] sm:$0xff] }
 0x4f6   : > { %v3804_v46 = vadd.f32 %v6421_v53, %v3736_v21  ;;  %v3159_v40 = vadd.f32 %v6536_v14, %v2965_v30  ;;  %v2969_v30 = vadd.f32 %v6800_v25, %v6799_v9 }
 0x4f7   : > { %v3100_v7 = vpop.f32.mrf.mxu2 }
 0x4f8   : > { %v3836_v28 = vadd.f32 %v4350_v39, %v3804_v46  ;;  %v3486_v3 = vpop.f32.mrf.mxu0  ;;  %v3353_v46 = vadd.f32 %v6529_v49, %v3158_v35  ;;  %v4355_v49 = vld [vmem:[%s4759_s10 + $0xb1] sm:$0xff] }
 0x4fa   : > { %v3868_v23 = vmax.f32 %v3836_v28, 0.0 }
 0x4fb   : > { %v3659_v4 = vpop.f32.mrf.mxu1 }
 0x4fc   : > { %3900 = vst [vmem:[%s6436_s8 + $0x40] sm:$0xff] %v3868_v23  ;;  %v3737_v1 = vadd.f32 %v3659_v4, %v3543_v62  ;;  %v3295_v16 = vpop.f32.mrf.mxu3  ;;  %v3547_v62 = vadd.f32 %v6533_v37, %v3353_v46 }
 0x4fd   : > { %3706 = vmatmul.f32.gmra.mxu1 %v6356_v2 }
 0x4fe   : > { %v3805_v8 = vadd.f32 %v6421_v53, %v3737_v1 }
 0x4ff   : > { %v3103_v63 = vpop.f32.mrf.mxu2 }
 0x500   : > { %v3837_v42 = vadd.f32 %v4351_v29, %v3805_v8  ;;  %v3489_v1 = vpop.f32.mrf.mxu0  ;;  %v3354_v8 = vadd.f32 %v6546_v56, %v3159_v40  ;;  %v3163_v40 = vadd.f32 %v3103_v63, %v2969_v30 }
 0x502   : > { %v3869_v41 = vmax.f32 %v3837_v42, 0.0  ;;  %v6794_v42 = vld [vmem:[#allocation32_spill] sm:$0xff] }
 0x503   : > { %v3662_v47 = vpop.f32.mrf.mxu1  ;;  %v2966_v14 = vadd.f32 %v6794_v42, %v6793_v36  ;;  %v6802_v36 = vld [vmem:[#allocation38_spill] sm:$0xff] }
 0x504   : > { %3901 = vst [vmem:[%s6436_s8 + $0x48] sm:$0xff] %v3869_v41  ;;  %v3738_v2 = vadd.f32 %v3662_v47, %v3544_v52  ;;  %v3548_v52 = vadd.f32 %v6552_v32, %v3354_v8  ;;  %v3596_v47 = vld [vmem:[#allocation2 + $0x19a] sm:$0xff] }
 0x505   : > { %3709 = vmatmul.f32.gmra.mxu1 %v6369_v6  ;;  %v3160_v41 = vadd.f32 %v3094_v24, %v2966_v14 }
 0x506   : > { %v3806_v44 = vadd.f32 %v6421_v53, %v3738_v2  ;;  %v3298_v2 = vpop.f32.mrf.mxu3 }
 0x507   : > { %v3106_v59 = vpop.f32.mrf.mxu2  ;;  %v3358_v8 = vadd.f32 %v3298_v2, %v3163_v40 }
 0x508   : > { %v3838_v57 = vadd.f32 %v4352_v45, %v3806_v44  ;;  %v4356_v44 = vld [vmem:[%s4759_s10 + $0xc1] sm:$0xff]  ;;  %v3492_v56 = vpop.f32.mrf.mxu0 }
 0x50a   : > { %v3870_v38 = vmax.f32 %v3838_v57, 0.0  ;;  %v6795_v57 = vld [vmem:[#allocation15_spill] sm:$0xff] }
 0x50b   : > { %v3665_v58 = vpop.f32.mrf.mxu1  ;;  %v2967_v24 = vadd.f32 %v6796_v13, %v6795_v57 }
 0x50c   : > { %3902 = vst [vmem:[%s6436_s8 + $0x50] sm:$0xff] %v3870_v38  ;;  %v3739_v6 = vadd.f32 %v3665_v58, %v3545_v20 }
 0x50d   : > { %3712 = vmatmul.f32.gmra.mxu1 %v6787_v54  ;;  %v3161_v20 = vadd.f32 %v3097_v12, %v2967_v24 }
 0x50e   : > { %v3807_v33 = vadd.f32 %v6421_v53, %v3739_v6  ;;  %v3597_v6 = vld [vmem:[#allocation2 + $0x1a2] sm:$0xff]  ;;  %v3301_v15 = vpop.f32.mrf.mxu3 }
 0x510   : > { %v3839_v18 = vadd.f32 %v4353_v17, %v3807_v33  ;;  %v3356_v33 = vadd.f32 %v3292_v0, %v3161_v20  ;;  %v3495_v35 = vpop.f32.mrf.mxu0 }
 0x512   : > { %v3871_v50 = vmax.f32 %v3839_v18, 0.0  ;;  %v2968_v18 = vadd.f32 %v6798_v43, %v6797_v5 }
 0x513   : > { %v3668_v21 = vpop.f32.mrf.mxu1 }
 0x514   : > { %3903 = vst [vmem:[%s6436_s8 + $0x58] sm:$0xff] %v3871_v50  ;;  %v3740_v39 = vadd.f32 %v3668_v21, %v3546_v55  ;;  %v3109_v50 = vpop.f32.mrf.mxu2  ;;  %v3162_v55 = vadd.f32 %v3100_v7, %v2968_v18  ;;  %v3550_v21 = vadd.f32 %v3486_v3, %v3356_v33  ;;  %v6806_v33 = vld [vmem:[#allocation40_spill] sm:$0xff] }
 0x515   : > { %3715 = vmatmul.f32.gmra.mxu1 %v6790_v22  ;;  %v4358_v22 = vld [vmem:[%s4759_s10 + $0xd9] sm:$0xff] }
 0x516   : > { %v3808_v48 = vadd.f32 %v6421_v53, %v3740_v39  ;;  %v3357_v46 = vadd.f32 %v3295_v16, %v3162_v55 }
 0x518   : > { %v3840_v28 = vadd.f32 %v4354_v60, %v3808_v48  ;;  %v3304_v48 = vpop.f32.mrf.mxu3  ;;  %v3551_v7 = vadd.f32 %v3489_v1, %v3357_v46 }
 0x51a   : > { %v3872_v23 = vmax.f32 %v3840_v28, 0.0 }
 0x51b   : > { %v3671_v4 = vpop.f32.mrf.mxu1 }
 0x51c   : > { %3904 = vst [vmem:[%s6436_s8 + $0x60] sm:$0xff] %v3872_v23  ;;  %v3741_v29 = vadd.f32 %v3671_v4, %v3547_v62  ;;  %v3498_v23 = vpop.f32.mrf.mxu0  ;;  %v3112_v3 = vpop.f32.mrf.mxu2 }
 0x51d   : > { %3718 = vmatmul.f32.gmra.mxu1 %v6407_v11  ;;  %v3355_v11 = vadd.f32 %v3289_v10, %v3160_v41  ;;  %v4357_v10 = vld [vmem:[%s4759_s10 + $0xc9] sm:$0xff] }
 0x51e   : > { %v3809_v19 = vadd.f32 %v6421_v53, %v3741_v29 }
 0x51f   : > { %v3549_v58 = vadd.f32 %v6566_v26, %v3355_v11  ;;  %v6803_v11 = vld [vmem:[#allocation19_spill] sm:$0xff] }
 0x520   : > { %v3841_v51 = vadd.f32 %v4355_v49, %v3809_v19  ;;  %v4359_v49 = vld [vmem:[%s4759_s10 + $0xe1] sm:$0xff]  ;;  %v6801_v19 = vld [vmem:[#allocation18_spill] sm:$0xff] }
 0x521   : > { %v2970_v42 = vadd.f32 %v6802_v36, %v6801_v19 }
 0x522   : > { %v3873_v37 = vmax.f32 %v3841_v51, 0.0  ;;  %v3307_v51 = vpop.f32.mrf.mxu3 }
 0x523   : > { %v3674_v45 = vpop.f32.mrf.mxu1  ;;  %v3164_v41 = vadd.f32 %v3106_v59, %v2970_v42 }
 0x524   : > { %3905 = vst [vmem:[%s6436_s8 + $0x68] sm:$0xff] %v3873_v37  ;;  %v3742_v31 = vadd.f32 %v3674_v45, %v3548_v52  ;;  %v3552_v37 = vadd.f32 %v3492_v56, %v3358_v8  ;;  %v3501_v52 = vpop.f32.mrf.mxu0  ;;  %v3115_v45 = vpop.f32.mrf.mxu2 }
 0x525   : > { %3721 = vmatmul.f32.gmra.mxu1 %v3596_v47 }
 0x526   : > { %v3810_v34 = vadd.f32 %v6421_v53, %v3742_v31  ;;  %v4360_v31 = vld [vmem:[%s4759_s10 + $0xf1] sm:$0xff] }
 0x528   : > { %v3842_v38 = vadd.f32 %v4356_v44, %v3810_v34  ;;  %v3359_v44 = vadd.f32 %v3301_v15, %v3164_v41  ;;  %v6804_v34 = vld [vmem:[#allocation39_spill] sm:$0xff] }
 0x529   : > { %v2971_v57 = vadd.f32 %v6804_v34, %v6803_v11 }
 0x52a   : > { %v3874_v32 = vmax.f32 %v3842_v38, 0.0  ;;  %v3553_v59 = vadd.f32 %v3495_v35, %v3359_v44  ;;  %v3310_v56 = vpop.f32.mrf.mxu3 }
 0x52b   : > { %v3677_v17 = vpop.f32.mrf.mxu1  ;;  %v3165_v24 = vadd.f32 %v3109_v50, %v2971_v57 }
 0x52c   : > { %3906 = vst [vmem:[%s6436_s8 + $0x70] sm:$0xff] %v3874_v32  ;;  %v3743_v54 = vadd.f32 %v3677_v17, %v3549_v58  ;;  %v4361_v58 = vld [vmem:[%s4759_s10 + $0xf9] sm:$0xff]  ;;  %v3504_v17 = vpop.f32.mrf.mxu0  ;;  %v3118_v15 = vpop.f32.mrf.mxu2 }
 0x52d   : > { %3724 = vmatmul.f32.gmra.mxu1 %v3597_v6  ;;  %v3360_v6 = vadd.f32 %v3304_v48, %v3165_v24 }
 0x52e   : > { %v3811_v27 = vadd.f32 %v6421_v53, %v3743_v54 }
 0x530   : > { %v3843_v12 = vadd.f32 %v4357_v10, %v3811_v27  ;;  %v6805_v10 = vld [vmem:[#allocation20_spill] sm:$0xff] }
 0x531   : > { %v2972_v27 = vadd.f32 %v6806_v33, %v6805_v10 }
 0x532   : > { %v3875_v26 = vmax.f32 %v3843_v12, 0.0  ;;  %v3554_v12 = vadd.f32 %v3498_v23, %v3360_v6  ;;  %v3313_v55 = vpop.f32.mrf.mxu3  ;;  %v6814_v6 = vld [vmem:[#allocation44_spill] sm:$0xff] }
 0x533   : > { %v3680_v39 = vpop.f32.mrf.mxu1  ;;  %v3166_v43 = vadd.f32 %v3112_v3, %v2972_v27 }
 0x534   : > { %3907 = vst [vmem:[%s6436_s8 + $0x78] sm:$0xff] %v3875_v26  ;;  %v3744_v60 = vadd.f32 %v3680_v39, %v3550_v21  ;;  %v4362_v26 = vld [vmem:[%s4759_s10 + $0x109] sm:$0xff]  ;;  %v3121_v9 = vpop.f32.mrf.mxu2 }
 0x535   : > { %v3361_v21 = vadd.f32 %v3307_v51, %v3166_v43 }
 0x536   : > { %v3812_v0 = vadd.f32 %v6421_v53, %v3744_v60  ;;  %v6807_v60 = vld [vmem:[#allocation21_spill] sm:$0xff] }
 0x538   : > { %v3844_v28 = vadd.f32 %v4358_v22, %v3812_v0  ;;  %v6808_v22 = vld [vmem:[#allocation41_spill] sm:$0xff]  ;;  %v3507_v0 = vpop.f32.mrf.mxu0 }
 0x539   : > { %v2973_v46 = vadd.f32 %v6808_v22, %v6807_v60 }
 0x53a   : > { %v3876_v62 = vmax.f32 %v3844_v28, 0.0  ;;  %v3555_v28 = vadd.f32 %v3501_v52, %v3361_v21  ;;  %v6816_v21 = vld [vmem:[#allocation45_spill] sm:$0xff] }
 0x53b   : > { %v3683_v4 = vpop.f32.mrf.mxu1  ;;  %v3167_v25 = vadd.f32 %v3115_v45, %v2973_v46  ;;  %v6812_v45 = vld [vmem:[#allocation43_spill] sm:$0xff] }
 0x53c   : > { %3908 = vst [vmem:[%s6436_s8 + $0x80] sm:$0xff] %v3876_v62  ;;  %v3745_v29 = vadd.f32 %v3683_v4, %v3551_v7  ;;  %v4363_v62 = vld [vmem:[%s4759_s10 + $0x111] sm:$0xff]  ;;  %v3316_v4 = vpop.f32.mrf.mxu3  ;;  %v3124_v51 = vpop.f32.mrf.mxu2 }
 0x53d   : > { %v3362_v7 = vadd.f32 %v3310_v56, %v3167_v25  ;;  %v4365_v56 = vld [vmem:[%s4759_s10 + $0x129] sm:$0xff] }
 0x53e   : > { %v3813_v16 = vadd.f32 %v6421_v53, %v3745_v29  ;;  %v6809_v29 = vld [vmem:[#allocation22_spill] sm:$0xff] }
 0x540   : > { %v3845_v14 = vadd.f32 %v4359_v49, %v3813_v16  ;;  %v6810_v49 = vld [vmem:[#allocation42_spill] sm:$0xff]  ;;  %v3510_v36 = vpop.f32.mrf.mxu0 }
 0x541   : > { %v2974_v8 = vadd.f32 %v6810_v49, %v6809_v29 }
 0x542   : > { %v3877_v63 = vmax.f32 %v3845_v14, 0.0  ;;  %v3556_v14 = vadd.f32 %v3504_v17, %v3362_v7 }
 0x543   : > { %v3686_v1 = vpop.f32.mrf.mxu1  ;;  %v3168_v19 = vadd.f32 %v3118_v15, %v2974_v8 }
 0x544   : > { %3909 = vst [vmem:[%s6436_s8 + $0x88] sm:$0xff] %v3877_v63  ;;  %v3746_v47 = vadd.f32 %v3686_v1, %v3552_v37  ;;  %v4364_v37 = vld [vmem:[%s4759_s10 + $0x121] sm:$0xff] }
 0x545   : > { %v3363_v1 = vadd.f32 %v3313_v55, %v3168_v19 }
 0x546   : > { %v3814_v2 = vadd.f32 %v6421_v53, %v3746_v47  ;;  %v6811_v47 = vld [vmem:[#allocation23_spill] sm:$0xff] }
 0x547   : > { %v3557_v57 = vadd.f32 %v3507_v0, %v3363_v1 }
 0x548   : > { %v3846_v13 = vadd.f32 %v4360_v31, %v3814_v2  ;;  %v2975_v31 = vadd.f32 %v6812_v45, %v6811_v47  ;;  %v3319_v2 = vpop.f32.mrf.mxu3  ;;  %v3513_v24 = vpop.f32.mrf.mxu0 }
 0x54a   : > { %v3878_v38 = vmax.f32 %v3846_v13, 0.0  ;;  %v3169_v11 = vadd.f32 %v3121_v9, %v2975_v31 }
 0x54b   : > { %v3689_v20 = vpop.f32.mrf.mxu1 }
 0x54c   : > { %3910 = vst [vmem:[%s6436_s8 + $0x90] sm:$0xff] %v3878_v38  ;;  %v3747_v32 = vadd.f32 %v3689_v20, %v3553_v59  ;;  %v3127_v59 = vpop.f32.mrf.mxu2  ;;  %v3364_v20 = vadd.f32 %v3316_v4, %v3169_v11 }
 0x54e   : > { %v3815_v54 = vadd.f32 %v6421_v53, %v3747_v32  ;;  %v3558_v33 = vadd.f32 %v3510_v36, %v3364_v20 }
 0x550   : > { %v3847_v5 = vadd.f32 %v4361_v58, %v3815_v54  ;;  %v6813_v58 = vld [vmem:[#allocation25_spill] sm:$0xff]  ;;  %v3322_v27 = vpop.f32.mrf.mxu3 }
 0x551   : > { %v2976_v17 = vadd.f32 %v6814_v6, %v6813_v58 }
 0x552   : > { %v3879_v18 = vmax.f32 %v3847_v5, 0.0 }
 0x553   : > { %v3692_v35 = vpop.f32.mrf.mxu1  ;;  %v3170_v15 = vadd.f32 %v3124_v51, %v2976_v17 }
 0x554   : > { %3911 = vst [vmem:[%s6436_s8 + $0x98] sm:$0xff] %v3879_v18  ;;  %v3748_v50 = vadd.f32 %v3692_v35, %v3554_v12  ;;  %v4366_v18 = vld [vmem:[%s4759_s10 + $0x139] sm:$0xff]  ;;  %v3516_v35 = vpop.f32.mrf.mxu0  ;;  %v3130_v55 = vpop.f32.mrf.mxu2 }
 0x555   : > { %v3365_v12 = vadd.f32 %v3319_v2, %v3170_v15 }
 0x556   : > { %v3816_v39 = vadd.f32 %v6421_v53, %v3748_v50 }
 0x557   : > { %v3559_v0 = vadd.f32 %v3513_v24, %v3365_v12  ;;  %v6824_v12 = vld [vmem:[#allocation50_spill] sm:$0xff] }
 0x558   : > { %v3848_v48 = vadd.f32 %v4362_v26, %v3816_v39  ;;  %v6815_v26 = vld [vmem:[#allocation26_spill] sm:$0xff]  ;;  %v3325_v25 = vpop.f32.mrf.mxu3 }
 0x559   : > { %v2977_v39 = vadd.f32 %v6816_v21, %v6815_v26 }
 0x55a   : > { %v3880_v30 = vmax.f32 %v3848_v48, 0.0 }
 0x55b   : > { %v3695_v40 = vpop.f32.mrf.mxu1  ;;  %v3171_v22 = vadd.f32 %v3127_v59, %v2977_v39  ;;  %v6822_v59 = vld [vmem:[#allocation48_spill] sm:$0xff] }
 0x55c   : > { %3912 = vst [vmem:[%s6436_s8 + $0xa0] sm:$0xff] %v3880_v30  ;;  %v3749_v23 = vadd.f32 %v3695_v40, %v3555_v28  ;;  %v4367_v30 = vld [vmem:[%s4759_s10 + $0x141] sm:$0xff]  ;;  %v3133_v29 = vpop.f32.mrf.mxu2 }
 0x55d   : > { %v3366_v28 = vadd.f32 %v3322_v27, %v3171_v22  ;;  %v4370_v27 = vld [vmem:[%s4759_s10 + $0x169] sm:$0xff] }
 0x55e   : > { %v3817_v3 = vadd.f32 %v6421_v53, %v3749_v23  ;;  %v6817_v23 = vld [vmem:[#allocation27_spill] sm:$0xff] }
 0x560   : > { %v3849_v16 = vadd.f32 %v4363_v62, %v3817_v3  ;;  %v6818_v62 = vld [vmem:[#allocation46_spill] sm:$0xff]  ;;  %v3519_v3 = vpop.f32.mrf.mxu0 }
 0x561   : > { %v2978_v7 = vadd.f32 %v6818_v62, %v6817_v23 }
 0x562   : > { %v3881_v42 = vmax.f32 %v3849_v16, 0.0  ;;  %v3560_v16 = vadd.f32 %v3516_v35, %v3366_v28 }
 0x563   : > { %v3698_v41 = vpop.f32.mrf.mxu1  ;;  %v3172_v49 = vadd.f32 %v3130_v55, %v2978_v7 }
 0x564   : > { %3913 = vst [vmem:[%s6436_s8 + $0xa8] sm:$0xff] %v3881_v42  ;;  %v3750_v63 = vadd.f32 %v3698_v41, %v3556_v14  ;;  %v4368_v42 = vld [vmem:[%s4759_s10 + $0x151] sm:$0xff]  ;;  %v3328_v41 = vpop.f32.mrf.mxu3  ;;  %v3136_v2 = vpop.f32.mrf.mxu2 }
 0x565   : > { %v3367_v14 = vadd.f32 %v3325_v25, %v3172_v49  ;;  %v4372_v49 = vld [vmem:[%s4759_s10 + $0x181] sm:$0xff] }
 0x566   : > { %v3818_v52 = vadd.f32 %v6421_v53, %v3750_v63  ;;  %v6819_v63 = vld [vmem:[#allocation29_spill] sm:$0xff] }
 0x568   : > { %v3850_v44 = vadd.f32 %v4364_v37, %v3818_v52  ;;  %v6820_v37 = vld [vmem:[#allocation47_spill] sm:$0xff]  ;;  %v3522_v47 = vpop.f32.mrf.mxu0 }
 0x569   : > { %v2979_v1 = vadd.f32 %v6820_v37, %v6819_v63 }
 0x56a   : > { %v3882_v34 = vmax.f32 %v3850_v44, 0.0  ;;  %v3561_v44 = vadd.f32 %v3519_v3, %v3367_v14 }
 0x56b   : > { %v3701_v13 = vpop.f32.mrf.mxu1  ;;  %v3173_v45 = vadd.f32 %v3133_v29, %v2979_v1 }
 0x56c   : > { %3914 = vst [vmem:[%s6436_s8 + $0xb0] sm:$0xff] %v3882_v34  ;;  %v3751_v38 = vadd.f32 %v3701_v13, %v3557_v57  ;;  %v4369_v57 = vld [vmem:[%s4759_s10 + $0x159] sm:$0xff] }
 0x56d   : > { %v3368_v13 = vadd.f32 %v3328_v41, %v3173_v45  ;;  %v4373_v41 = vld [vmem:[%s4759_s10 + $0x189] sm:$0xff] }
 0x56e   : > { %v3819_v32 = vadd.f32 %v6421_v53, %v3751_v38  ;;  %v6821_v38 = vld [vmem:[#allocation31_spill] sm:$0xff] }
 0x56f   : > { %v3562_v17 = vadd.f32 %v3522_v47, %v3368_v13 }
 0x570   : > { %v3851_v54 = vadd.f32 %v4365_v56, %v3819_v32  ;;  %v2980_v56 = vadd.f32 %v6822_v59, %v6821_v38  ;;  %v3331_v32 = vpop.f32.mrf.mxu3 }
 0x572   : > { %v3883_v10 = vmax.f32 %v3851_v54, 0.0  ;;  %v3174_v58 = vadd.f32 %v3136_v2, %v2980_v56 }
 0x573   : > { %v3704_v5 = vpop.f32.mrf.mxu1 }
 0x574   : > { %3915 = vst [vmem:[%s6436_s8 + $0xb8] sm:$0xff] %v3883_v10  ;;  %v3752_v43 = vadd.f32 %v3704_v5, %v3558_v33  ;;  %v3525_v10 = vpop.f32.mrf.mxu0  ;;  %v3139_v33 = vpop.f32.mrf.mxu2  ;;  %v3369_v5 = vadd.f32 %v3331_v32, %v3174_v58 }
 0x576   : > { %v3820_v50 = vadd.f32 %v6421_v53, %v3752_v43  ;;  %v3563_v39 = vadd.f32 %v3525_v10, %v3369_v5 }
 0x578   : > { %v3852_v60 = vadd.f32 %v4366_v18, %v3820_v50  ;;  %v6823_v18 = vld [vmem:[#allocation33_spill] sm:$0xff]  ;;  %v3334_v55 = vpop.f32.mrf.mxu3 }
 0x579   : > { %v2981_v35 = vadd.f32 %v6824_v12, %v6823_v18 }
 0x57a   : > { %v3884_v46 = vmax.f32 %v3852_v60, 0.0 }
 0x57b   : > { %v3707_v48 = vpop.f32.mrf.mxu1  ;;  %v3175_v26 = vadd.f32 %v3139_v33, %v2981_v35 }
 0x57c   : > { %3916 = vst [vmem:[%s6436_s8 + $0xc0] sm:$0xff] %v3884_v46  ;;  %v3753_v9 = vadd.f32 %v3707_v48, %v3559_v0  ;;  %v3528_v46 = vpop.f32.mrf.mxu0  ;;  %v4371_v0 = vld [vmem:[%s4759_s10 + $0x171] sm:$0xff]  ;;  %v3142_v25 = vpop.f32.mrf.mxu2 }
 0x57d   : > { %v3370_v48 = vadd.f32 %v3334_v55, %v3175_v26 }
 0x57e   : > { %v3821_v40 = vadd.f32 %v6421_v53, %v3753_v9 }
 0x57f   : > { %v3564_v23 = vadd.f32 %v3528_v46, %v3370_v48 }
 0x580   : > { %v3853_v4 = vadd.f32 %v4367_v30, %v3821_v40  ;;  %v6825_v30 = vld [vmem:[#allocation35_spill] sm:$0xff]  ;;  %v3337_v3 = vpop.f32.mrf.mxu3 }
 0x581   : > { %v2982_v28 = vadd.f32 %v6401_v61, %v6825_v30 }
 0x582   : > { %v3885_v8 = vmax.f32 %v3853_v4, 0.0 }
 0x583   : > { %v3710_v19 = vpop.f32.mrf.mxu1  ;;  %v3176_v62 = vadd.f32 %v3142_v25, %v2982_v28 }
 0x584   : > { %3917 = vst [vmem:[%s6436_s8 + $0xc8] sm:$0xff] %v3885_v8  ;;  %v3754_v36 = vadd.f32 %v3710_v19, %v3560_v16  ;;  %v3531_v19 = vpop.f32.mrf.mxu0 }
 0x585   : > { %v3371_v8 = vadd.f32 %v3337_v3, %v3176_v62 }
 0x586   : > { %v3822_v51 = vadd.f32 %v6421_v53, %v3754_v36 }
 0x587   : > { %v3565_v61 = vadd.f32 %v3531_v19, %v3371_v8 }
 0x588   : > { %v3854_v52 = vadd.f32 %v4368_v42, %v3822_v51 }
 0x58a   : > { %v3886_v31 = vmax.f32 %v3854_v52, 0.0 }
 0x58b   : > { %v3713_v11 = vpop.f32.mrf.mxu1 }
 0x58c   : > { %3918 = vst [vmem:[%s6436_s8 + $0xd0] sm:$0xff] %v3886_v31  ;;  %v3755_v34 = vadd.f32 %v3713_v11, %v3561_v44 }
 0x58e   : > { %v3823_v24 = vadd.f32 %v6421_v53, %v3755_v34 }
 0x590   : > { %v3855_v20 = vadd.f32 %v4369_v57, %v3823_v24 }
 0x592   : > { %v3887_v6 = vmax.f32 %v3855_v20, 0.0 }
 0x593   : > { %v3716_v54 = vpop.f32.mrf.mxu1 }
 0x594   : > { %3919 = vst [vmem:[%s6436_s8 + $0xd8] sm:$0xff] %v3887_v6  ;;  %v3756_v15 = vadd.f32 %v3716_v54, %v3562_v17 }
 0x596   : > { %v3824_v43 = vadd.f32 %v6421_v53, %v3756_v15 }
 0x598   : > { %v3856_v50 = vadd.f32 %v4370_v27, %v3824_v43 }
 0x59a   : > { %v3888_v21 = vmax.f32 %v3856_v50, 0.0 }
 0x59b   : > { %v3719_v60 = vpop.f32.mrf.mxu1 }
 0x59c   : > { %3920 = vst [vmem:[%s6436_s8 + $0xe0] sm:$0xff] %v3888_v21  ;;  %v3757_v22 = vadd.f32 %v3719_v60, %v3563_v39 }
 0x59e   : > { %v3825_v9 = vadd.f32 %v6421_v53, %v3757_v22 }
 0x5a0   : > { %v3857_v40 = vadd.f32 %v4371_v0, %v3825_v9 }
 0x5a2   : > { %v3889_v7 = vmax.f32 %v3857_v40, 0.0 }
 0x5a3   : > { %v3722_v4 = vpop.f32.mrf.mxu1 }
 0x5a4   : > { %3921 = vst [vmem:[%s6436_s8 + $0xe8] sm:$0xff] %v3889_v7  ;;  %v3758_v29 = vadd.f32 %v3722_v4, %v3564_v23 }
 0x5a6   : > { %v3826_v16 = vadd.f32 %v6421_v53, %v3758_v29 }
 0x5a8   : > { %v3858_v36 = vadd.f32 %v4372_v49, %v3826_v16 }
 0x5aa   : > { %v3890_v42 = vmax.f32 %v3858_v36, 0.0 }
 0x5ab   : > { %v3725_v14 = vpop.f32.mrf.mxu1 }
 0x5ac   : > { %3922 = vst [vmem:[%s6436_s8 + $0xf0] sm:$0xff] %v3890_v42  ;;  %v3759_v51 = vadd.f32 %v3725_v14, %v3565_v61 }
 0x5ae   : > { %v3827_v63 = vadd.f32 %v6421_v53, %v3759_v51 }
 0x5b0   : > { %v3859_v37 = vadd.f32 %v4373_v41, %v3827_v63 }
 0x5b2   : > { %v3891_v1 = vmax.f32 %v3859_v37, 0.0 }
 0x5b4   : > { %3923 = vst [vmem:[%s6436_s8 + $0xf8] sm:$0xff] %v3891_v1 }
 0x5b5   : > { %4532 = shalt.err (!%p4529_p8)
}
 0x5b6   : > { %s4577_s6 = smov 128   ;;  %s4578_s7 = smov 8  }
 0x5b7   : > { %4417 = dma.vmem_to_hbm [thread:$0]  (%p4647_p5), %s3938_s14, 4096, %s3940_s15, %s3925_s22, %s4577_s6, %s4577_s6, %s4578_s7  }
 0x5b8 PF: > { %p4429_p9 = scmp.ge.s32.totalorder %s4571_s21, 2  ;;  %s3954_s8 = sand.u32 1, %s4559_s18  }
 0x5b9   : > { %s3955_s9 = scalar_lea.sflag [#allocation5], %s3954_s8 }
 0x5ba   : > { %p4424_p10 = pnand %p4429_p9, %p4651_p6 }
 0x5bc   : > { %p4425_p11 = pneg %p4424_p10 }
 0x5be   : > { %4554 = dma.done.wait (%p4425_p11), %s3955_s9, 4096  }
 0x5bf   : > { %4556 = vsyncadd (%p4425_p11), %s3955_s9, 4294963200  ;;  %p16_p12 = scmp.ge.s32.totalorder %s4634_s24, 4   ;;  %s6826_s18 = smov %s4563_s19 }
 0x5c0   : > { %s6827_s19 = smov %s4567_s20  ;;  %s6828_s20 = smov %s4645_s27 }
 0x5c1   : > { %s6829_s21 = smov %s4634_s24  ;;  %18 = sbr.rel (!%p16_p12) target bundleno = 4 (0x4), region = 100 }
 0x5c6   :  { %3961 = vsyncpa [#allocation4], 1 }
 0x5c7   :  { %3963 = vsyncpa [#allocation4 + $0x1], 1 }
 0x5c8   :  { %3964 = vsyncpa [#allocation5], 1 }
 0x5c9   :  { %3966 = vsyncpa [#allocation5 + $0x1], 1 }

</bundles_post_ra>
